<compile_context>
chip_gen: v5e
topology: v5e:2x2
jax: 0.10.0
libtpu: 0.0.40
codegen_flags: <defaults>
</compile_context>

<pallas_src>
import functools

import numpy as np
import jax
import jax.numpy as jnp
from jax import lax
from jax.experimental import pallas as pl
from jax.experimental.pallas import tpu as pltpu

BN_EPS = 1e-5
NEG_SLOPE = 0.1
C_PAD = 128                      # lane-dense padded output-channel count
MAX_TILE_M = 512                 # rows per grid step (tiled fallback)
FUSED_VMEM_BUDGET = 8 * 1024 * 1024


def _round_up(x, m):
    return (x + m - 1) // m * m


def _cdiv(a, b):
    return -(-a // b)


# ------------------------------ Pallas kernels -------------------------------
def _fused_conv_bn_lrelu_kernel(p_ref, w_ref, g_ref, b_ref, o_ref, *, inv_m):
    """Whole conv stage in one step: matmul + batch stats + BN fold + LReLU.

    Padded rows of p are zero so they contribute nothing to the stats
    (divide by the real row count via inv_m); padded channels carry
    gamma = beta = 0 so they stay exactly zero.
    """
    y = jnp.dot(p_ref[...], w_ref[...], preferred_element_type=jnp.float32)
    ssum = jnp.sum(y, axis=0, keepdims=True)                 # (1, C_PAD)
    ssq = jnp.sum(y * y, axis=0, keepdims=True)              # (1, C_PAD)
    mean = ssum * inv_m
    var = jnp.maximum(ssq * inv_m - mean * mean, 0.0)        # biased batch var
    s = g_ref[...] * lax.rsqrt(var + BN_EPS)                 # EUP rsqrt
    t = b_ref[...] - mean * s
    z = y * s + t
    z = jnp.maximum(z, NEG_SLOPE * z)                        # LeakyReLU(0.1)
    o_ref[...] = z.astype(o_ref.dtype)


def _matmul_stats_kernel(p_ref, w_ref, y_ref, stats_ref):
    """Tiled fallback pass 1: MXU matmul + per-block per-channel sum / sumsq."""
    y = jnp.dot(p_ref[...], w_ref[...], preferred_element_type=jnp.float32)
    y_ref[...] = y.astype(y_ref.dtype)
    ssum = jnp.sum(y, axis=0, keepdims=True)
    ssq = jnp.sum(y * y, axis=0, keepdims=True)
    stats = jnp.concatenate([ssum, ssq], axis=0)             # (2, C_PAD)
    stats_ref[...] = stats.reshape(stats_ref.shape)


def _scale_shift_lrelu_kernel(y_ref, s_ref, t_ref, o_ref):
    """Tiled fallback pass 2: folded BN (scale/shift) + LeakyReLU(0.1)."""
    z = y_ref[...].astype(jnp.float32) * s_ref[...] + t_ref[...]
    z = jnp.maximum(z, NEG_SLOPE * z)
    o_ref[...] = z.astype(o_ref.dtype)


def _classifier_kernel(x_ref, w1_ref, b1_ref, w2_ref, b2_ref, o_ref):
    """fc1 + LeakyReLU + fc2 in one kernel; h stays in VMEM."""
    h = jnp.dot(x_ref[...], w1_ref[...], preferred_element_type=jnp.float32)
    h = h + b1_ref[...]
    h = jnp.maximum(h, NEG_SLOPE * h)
    y = jnp.dot(h.astype(w2_ref.dtype), w2_ref[...],
                preferred_element_type=jnp.float32)
    o_ref[...] = y + b2_ref[...]


# ------------------------------- host glue -----------------------------------
def _im2col(x_nhwc, kh, kw, stride, pad):
    """Extract conv patches (layout glue; all math happens in the kernels)."""
    N, H, W, C = x_nhwc.shape
    Ho = (H + 2 * pad - kh) // stride + 1
    Wo = (W + 2 * pad - kw) // stride + 1
    xp = jnp.pad(x_nhwc, ((0, 0), (pad, pad), (pad, pad), (0, 0)))
    cols = []
    for i in range(kh):
        for j in range(kw):
            sl = lax.slice(
                xp,
                (0, i, j, 0),
                (N, i + stride * (Ho - 1) + 1, j + stride * (Wo - 1) + 1, C),
                (1, stride, stride, 1))
            cols.append(sl)                           # (N, Ho, Wo, C)
    patches = jnp.concatenate(cols, axis=-1)          # (N, Ho, Wo, kh*kw*C)
    return patches.reshape(N * Ho * Wo, kh * kw * C), (N, Ho, Wo)


def _conv_bn_lrelu(x_nhwc, w_pad, g_pad, b_pad, cout, kh, kw, stride, pad):
    """conv (im2col matmul) + training-mode BN + LeakyReLU(0.1), fused."""
    K_pad = w_pad.shape[0]
    patches, (N, Ho, Wo) = _im2col(x_nhwc, kh, kw, stride, pad)
    M, K = patches.shape

    # Fused single-step path: whole activation lives in VMEM.
    M_pad = _round_up(M, 16)                          # bf16 sublane packing
    fused_bytes = (2 * M_pad * K_pad * 2 +            # p (double-buffered)
                   2 * K_pad * C_PAD * 2 +            # w
                   2 * M_pad * C_PAD * 2 +            # bf16 out
                   2 * M_pad * C_PAD * 4)             # f32 y + temporaries
    if fused_bytes <= FUSED_VMEM_BUDGET:
        p = jnp.zeros((M_pad, K_pad), jnp.bfloat16)
        p = p.at[:M, :K].set(patches.astype(jnp.bfloat16))
        cost = pl.CostEstimate(
            flops=2 * M_pad * K_pad * C_PAD,
            transcendentals=C_PAD,
            bytes_accessed=p.size * 2 + w_pad.size * 2 + M_pad * C_PAD * 2)
        out = pl.pallas_call(
            functools.partial(_fused_conv_bn_lrelu_kernel, inv_m=1.0 / M),
            out_shape=jax.ShapeDtypeStruct((M_pad, C_PAD), jnp.bfloat16),
            grid=(1,),
            in_specs=[pl.BlockSpec((M_pad, K_pad), lambda i: (0, 0)),
                      pl.BlockSpec((K_pad, C_PAD), lambda i: (0, 0)),
                      pl.BlockSpec((1, C_PAD), lambda i: (0, 0)),
                      pl.BlockSpec((1, C_PAD), lambda i: (0, 0))],
            out_specs=pl.BlockSpec((M_pad, C_PAD), lambda i: (0, 0)),
            cost_estimate=cost,
        )(p, w_pad, g_pad, b_pad)
        return out[:M, :cout].reshape(N, Ho, Wo, cout)

    # -------- tiled two-pass fallback (large M): parallel M grid --------
    nb0 = max(2, _cdiv(M, MAX_TILE_M))                # nb>=2: keep v7x TCs busy
    tile_m = _round_up(_cdiv(M, nb0), 16)             # mult. of 16 for bf16
    M_pad = _round_up(M, tile_m)
    nb = M_pad // tile_m
    p = jnp.zeros((M_pad, K_pad), jnp.bfloat16)
    p = p.at[:M, :K].set(patches.astype(jnp.bfloat16))

    y, stats = pl.pallas_call(
        _matmul_stats_kernel,
        out_shape=(jax.ShapeDtypeStruct((M_pad, C_PAD), jnp.bfloat16),
                   jax.ShapeDtypeStruct((nb, 2, C_PAD), jnp.float32)),
        grid=(nb,),
        in_specs=[pl.BlockSpec((tile_m, K_pad), lambda i: (i, 0)),
                  pl.BlockSpec((K_pad, C_PAD), lambda i: (0, 0))],
        out_specs=(pl.BlockSpec((tile_m, C_PAD), lambda i: (i, 0)),
                   pl.BlockSpec((1, 2, C_PAD), lambda i: (i, 0, 0))),
        compiler_params=pltpu.CompilerParams(
            dimension_semantics=("parallel",),
            vmem_limit_bytes=32 * 1024 * 1024),       # v5e default is 16 MiB
    )(p, w_pad)

    ssum = jnp.sum(stats[:, 0, :], axis=0)
    ssq = jnp.sum(stats[:, 1, :], axis=0)
    mean = ssum / M
    var = jnp.maximum(ssq / M - mean * mean, 0.0)
    s = g_pad[0] * lax.rsqrt(var + BN_EPS)
    t = b_pad[0] - mean * s

    out = pl.pallas_call(
        _scale_shift_lrelu_kernel,
        out_shape=jax.ShapeDtypeStruct((M_pad, C_PAD), jnp.bfloat16),
        grid=(nb,),
        in_specs=[pl.BlockSpec((tile_m, C_PAD), lambda i: (i, 0)),
                  pl.BlockSpec((1, C_PAD), lambda i: (0, 0)),
                  pl.BlockSpec((1, C_PAD), lambda i: (0, 0))],
        out_specs=pl.BlockSpec((tile_m, C_PAD), lambda i: (i, 0)),
        compiler_params=pltpu.CompilerParams(
            dimension_semantics=("parallel",)),
    )(y, s.reshape(1, C_PAD), t.reshape(1, C_PAD))
    return out[:M, :cout].reshape(N, Ho, Wo, cout)


def _classifier(feat, kp):
    """SN-Linear(100) + LeakyReLU + SN-Linear(1), one kernel, bf16 MXU."""
    M, K = feat.shape
    M_pad = _round_up(M, 16)
    K_pad = kp["fc1_w"].shape[0]
    xp = jnp.zeros((M_pad, K_pad), jnp.bfloat16)
    xp = xp.at[:M, :K].set(feat.astype(jnp.bfloat16))
    out = pl.pallas_call(
        _classifier_kernel,
        out_shape=jax.ShapeDtypeStruct((M_pad, C_PAD), jnp.float32),
        grid=(1,),
        in_specs=[pl.BlockSpec((M_pad, K_pad), lambda i: (0, 0)),
                  pl.BlockSpec((K_pad, C_PAD), lambda i: (0, 0)),
                  pl.BlockSpec((1, C_PAD), lambda i: (0, 0)),
                  pl.BlockSpec((C_PAD, C_PAD), lambda i: (0, 0)),
                  pl.BlockSpec((1, C_PAD), lambda i: (0, 0))],
        out_specs=pl.BlockSpec((M_pad, C_PAD), lambda i: (0, 0)),
    )(xp, kp["fc1_w"], kp["fc1_b"], kp["fc2_w"], kp["fc2_b"])
    return out[:M, :1]


def _center_crop_nchw(x, ch, cw):
    H, W = x.shape[2], x.shape[3]
    top = (H - ch) // 2
    left = (W - cw) // 2
    return x[:, :, top:top + ch, left:left + cw]


def sn_discriminator_forward(x_nchw, kp, *, couts):
    dis_blocks = len(couts)
    crop = 4 * (2 ** dis_blocks)
    x = _center_crop_nchw(x_nchw, crop, crop)
    x = jnp.transpose(x, (0, 2, 3, 1))                # NCHW -> NHWC
    for blk, cout in zip(kp["blocks"], couts):
        x = _conv_bn_lrelu(x, blk["w1"], blk["g1"], blk["bt1"], cout, 3, 3, 1, 1)
        x = _conv_bn_lrelu(x, blk["w2"], blk["g2"], blk["bt2"], cout, 4, 4, 2, 1)
    x = jnp.transpose(x, (0, 3, 1, 2))                # NHWC -> NCHW
    feat = x.reshape(x.shape[0], -1)                  # flatten(start_dim=1)
    return _classifier(feat, kp)


# --------------------------- parameter construction --------------------------
def _spectral_norm(w_mat, key, n_iter=1, eps=1e-12):
    """PyTorch-style spectral norm: single power-iteration sigma estimate."""
    u = jax.random.normal(key, (w_mat.shape[0],), jnp.float32)
    u = u / (jnp.linalg.norm(u) + eps)
    v = w_mat.T @ u
    for _ in range(n_iter):
        v = w_mat.T @ u
        v = v / (jnp.linalg.norm(v) + eps)
        u = w_mat @ v
        u = u / (jnp.linalg.norm(u) + eps)
    sigma = u @ (w_mat @ v)
    return w_mat / sigma


def _init_conv(key, kh, kw, cin, cout, scale=0.1):
    # kaiming_normal_(a=0, mode='fan_in'), *= scale, then spectral norm.
    # Conv bias is omitted: it is zero-init and training-mode BN cancels it.
    k_w, k_u = jax.random.split(key)
    fan_in = cin * kh * kw
    w = jax.random.normal(k_w, (kh, kw, cin, cout), jnp.float32)
    w = w * np.sqrt(2.0 / fan_in) * scale
    w2d = w.reshape(kh * kw * cin, cout)              # (K, Cout), matches im2col
    w2d = _spectral_norm(w2d.T, k_u).T                # SN on the (Cout, K) view
    return w2d


def init_params(key, in_channels, num_features, dis_blocks):
    chan_pairs = [(in_channels, num_features)]
    for i in range(dis_blocks - 1):
        chan_pairs.append((num_features * min(2 ** i, 8),
                           num_features * min(2 ** (i + 1), 8)))
    blocks = []
    for cin, cout in chan_pairs:
        key, k1, k2 = jax.random.split(key, 3)
        blocks.append(dict(
            w1=_init_conv(k1, 3, 3, cin, cout),
            g1=jnp.ones((cout,), jnp.float32),
            bt1=jnp.zeros((cout,), jnp.float32),
            w2=_init_conv(k2, 4, 4, cout, cout),
            g2=jnp.ones((cout,), jnp.float32),
            bt2=jnp.zeros((cout,), jnp.float32),
        ))
    cls_in = num_features * min(2 ** (dis_blocks - 1), 8) * 4 * 4
    key, kw1, ku1, kb1, kw2, ku2, kb2 = jax.random.split(key, 7)
    fc1_w = jax.random.normal(kw1, (cls_in, 100), jnp.float32) / np.sqrt(cls_in)
    fc1_w = _spectral_norm(fc1_w.T, ku1).T
    fc1_b = jax.random.uniform(kb1, (100,), jnp.float32,
                               -1.0 / np.sqrt(cls_in), 1.0 / np.sqrt(cls_in))
    fc2_w = jax.random.normal(kw2, (100, 1), jnp.float32) / np.sqrt(100.0)
    fc2_w = _spectral_norm(fc2_w.T, ku2).T
    fc2_b = jax.random.uniform(kb2, (1,), jnp.float32, -0.1, 0.1)
    return dict(blocks=blocks, fc1_w=fc1_w, fc1_b=fc1_b,
                fc2_w=fc2_w, fc2_b=fc2_b)


def prepare_params(params):
    """Pre-pad (lane-dense) and pre-cast all weights ONCE (not per forward)."""
    def pad_conv(w2d):
        K, cout = w2d.shape
        K_pad = _round_up(K, 128)
        wp = jnp.zeros((K_pad, C_PAD), jnp.bfloat16)
        return wp.at[:K, :cout].set(w2d.astype(jnp.bfloat16))

    def pad_vec(v):
        return jnp.zeros((1, C_PAD), jnp.float32).at[0, :v.shape[0]].set(v)

    blocks = []
    for blk in params["blocks"]:
        blocks.append(dict(
            w1=pad_conv(blk["w1"]), g1=pad_vec(blk["g1"]), bt1=pad_vec(blk["bt1"]),
            w2=pad_conv(blk["w2"]), g2=pad_vec(blk["g2"]), bt2=pad_vec(blk["bt2"])))
    cls_in, nh = params["fc1_w"].shape
    K1 = _round_up(cls_in, 128)
    fc1_w = jnp.zeros((K1, C_PAD), jnp.bfloat16)
    fc1_w = fc1_w.at[:cls_in, :nh].set(params["fc1_w"].astype(jnp.bfloat16))
    fc1_b = jnp.zeros((1, C_PAD), jnp.float32).at[0, :nh].set(params["fc1_b"])
    fc2_w = jnp.zeros((C_PAD, C_PAD), jnp.bfloat16)
    fc2_w = fc2_w.at[:nh, :1].set(params["fc2_w"].astype(jnp.bfloat16))
    fc2_b = jnp.zeros((1, C_PAD), jnp.float32).at[0, :1].set(params["fc2_b"])
    return dict(blocks=blocks, fc1_w=fc1_w, fc1_b=fc1_b,
                fc2_w=fc2_w, fc2_b=fc2_b)


# ----------------------------- pure-JAX reference -----------------------------
def _bn_lrelu_ref(y, g, b):
    mean = jnp.mean(y, axis=(0, 1, 2), keepdims=True)
    var = jnp.mean((y - mean) ** 2, axis=(0, 1, 2), keepdims=True)
    z = (y - mean) * lax.rsqrt(var + BN_EPS) * g.reshape(1, 1, 1, -1) \
        + b.reshape(1, 1, 1, -1)
    return jnp.where(z >= 0, z, NEG_SLOPE * z)


def ref_forward(x_nchw, params):
    dis_blocks = len(params["blocks"])
    crop = 4 * (2 ** dis_blocks)
    x = _center_crop_nchw(x_nchw, crop, crop)
    x = jnp.transpose(x, (0, 2, 3, 1))
    for blk in params["blocks"]:
        cout = blk["w1"].shape[1]
        cin = blk["w1"].shape[0] // 9
        w1 = blk["w1"].reshape(3, 3, cin, cout)
        x = lax.conv_general_dilated(
            x, w1, (1, 1), ((1, 1), (1, 1)),
            dimension_numbers=("NHWC", "HWIO", "NHWC"),
            precision=lax.Precision.HIGHEST)
        x = _bn_lrelu_ref(x, blk["g1"], blk["bt1"])
        w2 = blk["w2"].reshape(4, 4, cout, cout)
        x = lax.conv_general_dilated(
            x, w2, (2, 2), ((1, 1), (1, 1)),
            dimension_numbers=("NHWC", "HWIO", "NHWC"),
            precision=lax.Precision.HIGHEST)
        x = _bn_lrelu_ref(x, blk["g2"], blk["bt2"])
    x = jnp.transpose(x, (0, 3, 1, 2))
    feat = x.reshape(x.shape[0], -1)
    h = feat @ params["fc1_w"] + params["fc1_b"]
    h = jnp.where(h >= 0, h, NEG_SLOPE * h)
    return h @ params["fc2_w"] + params["fc2_b"]


# ----------------------------------- main -------------------------------------
if __name__ == "__main__":
    IN_CH, NUM_FEATURES, DIS_BLOCKS = 4, 8, 2        # crop_size = 4*2^2 = 16
    N, H, W = 3, 20, 20

    key = jax.random.PRNGKey(0)
    kx, kp = jax.random.split(key)
    x = jax.random.normal(kx, (N, IN_CH, H, W), jnp.float32)   # NCHW like torch
    params = init_params(kp, IN_CH, NUM_FEATURES, DIS_BLOCKS)
    kparams = prepare_params(params)                  # padded/bf16, built once
    couts = tuple(int(b["w1"].shape[1]) for b in params["blocks"])

    fwd = jax.jit(functools.partial(sn_discriminator_forward, couts=couts))
    out = jax.block_until_ready(fwd(x, kparams))
    assert out.shape == (N, 1), out.shape

    ref = jax.block_until_ready(ref_forward(x, params))
    # bf16 MXU operands + bf16 stored activations -> modest tolerance vs the
    # f32 reference (stats / BN-fold math stays in f32 inside the kernels).
    np.testing.assert_allclose(np.asarray(out), np.asarray(ref),
                               rtol=8e-2, atol=3e-2)

    print("KERNEL_OK")
</pallas_src>

<mosaic_0001>
module attributes {stable_mosaic.version = 11 : i64} {
  func.func @_fused_conv_bn_lrelu_kernel(%arg0: i32, %arg1: memref<768x128xbf16, #tpu.memory_space<vmem>>, %arg2: memref<128x128xbf16, #tpu.memory_space<vmem>>, %arg3: memref<1x128xf32, #tpu.memory_space<vmem>>, %arg4: memref<1x128xf32, #tpu.memory_space<vmem>>, %arg5: memref<768x128xbf16, #tpu.memory_space<vmem>>) attributes {dimension_semantics = [#tpu.dimension_semantics<arbitrary>], iteration_bounds = array<i64: 1>, scalar_prefetch = 0 : i64, scratch_operands = 0 : i64, tpu.core_type = #tpu.core_type<tc>, window_params = [{pipeline_mode = #tpu.pipeline_mode<synchronous>, transform_indices = @transform_0, window_bounds = array<i64: 768, 128>}, {pipeline_mode = #tpu.pipeline_mode<synchronous>, transform_indices = @transform_1, window_bounds = array<i64: 128, 128>}, {pipeline_mode = #tpu.pipeline_mode<synchronous>, transform_indices = @transform_2, window_bounds = array<i64: 1, 128>}, {pipeline_mode = #tpu.pipeline_mode<synchronous>, transform_indices = @transform_3, window_bounds = array<i64: 1, 128>}, {pipeline_mode = #tpu.pipeline_mode<synchronous>, transform_indices = @transform_4, window_bounds = array<i64: 768, 128>}]} {
    %c0 = arith.constant 0 : index
    %c0_0 = arith.constant 0 : index
    %0 = vector.load %arg1[%c0, %c0_0] : memref<768x128xbf16, #tpu.memory_space<vmem>>, vector<768x128xbf16>
    %c0_1 = arith.constant 0 : index
    %c0_2 = arith.constant 0 : index
    %1 = vector.load %arg2[%c0_1, %c0_2] : memref<128x128xbf16, #tpu.memory_space<vmem>>, vector<128x128xbf16>
    %cst = arith.constant dense<0.000000e+00> : vector<768x128xf32>
    %2 = tpu.matmul %0, %1, %cst {dimension_numbers = #tpu.dot_dimension_numbers<[1], [0], [0], [1], [0, 0, 1, 1], [], []>} : vector<768x128xbf16>, vector<128x128xbf16>, vector<768x128xf32> -> vector<768x128xf32>
    %cst_3 = arith.constant dense<0.000000e+00> : vector<128xf32>
    %3 = vector.multi_reduction <add>, %2, %cst_3 [0] : vector<768x128xf32> to vector<128xf32>
    %4 = vector.shape_cast %3 : vector<128xf32> to vector<1x128xf32>
    %5 = arith.mulf %2, %2 : vector<768x128xf32>
    %cst_4 = arith.constant dense<0.000000e+00> : vector<128xf32>
    %6 = vector.multi_reduction <add>, %5, %cst_4 [0] : vector<768x128xf32> to vector<128xf32>
    %7 = vector.shape_cast %6 : vector<128xf32> to vector<1x128xf32>
    %cst_5 = arith.constant 0.00130208337 : f32
    %8 = vector.broadcast %cst_5 : f32 to vector<1x128xf32>
    %9 = arith.mulf %4, %8 : vector<1x128xf32>
    %cst_6 = arith.constant 0.00130208337 : f32
    %10 = vector.broadcast %cst_6 : f32 to vector<1x128xf32>
    %11 = arith.mulf %7, %10 : vector<1x128xf32>
    %12 = arith.mulf %9, %9 : vector<1x128xf32>
    %13 = arith.subf %11, %12 : vector<1x128xf32>
    %cst_7 = arith.constant 0.000000e+00 : f32
    %14 = vector.broadcast %cst_7 : f32 to vector<1x128xf32>
    %15 = arith.maximumf %13, %14 : vector<1x128xf32>
    %c0_8 = arith.constant 0 : index
    %c0_9 = arith.constant 0 : index
    %16 = vector.load %arg3[%c0_8, %c0_9] : memref<1x128xf32, #tpu.memory_space<vmem>>, vector<1x128xf32>
    %cst_10 = arith.constant 9.99999974E-6 : f32
    %17 = vector.broadcast %cst_10 : f32 to vector<1x128xf32>
    %18 = arith.addf %15, %17 : vector<1x128xf32>
    %19 = math.rsqrt %18 : vector<1x128xf32>
    %20 = arith.mulf %16, %19 : vector<1x128xf32>
    %c0_11 = arith.constant 0 : index
    %c0_12 = arith.constant 0 : index
    %21 = vector.load %arg4[%c0_11, %c0_12] : memref<1x128xf32, #tpu.memory_space<vmem>>, vector<1x128xf32>
    %22 = arith.mulf %9, %20 : vector<1x128xf32>
    %23 = arith.subf %21, %22 : vector<1x128xf32>
    %24 = vector.broadcast %20 : vector<1x128xf32> to vector<768x128xf32>
    %25 = arith.mulf %2, %24 : vector<768x128xf32>
    %26 = vector.broadcast %23 : vector<1x128xf32> to vector<768x128xf32>
    %27 = arith.addf %25, %26 : vector<768x128xf32>
    %cst_13 = arith.constant 1.000000e-01 : f32
    %28 = vector.broadcast %cst_13 : f32 to vector<768x128xf32>
    %29 = arith.mulf %28, %27 : vector<768x128xf32>
    %30 = arith.maximumf %27, %29 : vector<768x128xf32>
    %31 = arith.truncf %30 : vector<768x128xf32> to vector<768x128xbf16>
    %c0_14 = arith.constant 0 : index
    %c0_15 = arith.constant 0 : index
    %32 = vector.load %arg5[%c0_14, %c0_15] : memref<768x128xbf16, #tpu.memory_space<vmem>>, vector<768x128xbf16>
    tpu.vector_store %arg5[%c0_14, %c0_15], %31 {strides = array<i32>} : memref<768x128xbf16, #tpu.memory_space<vmem>>, vector<768x128xbf16>,
    return
  }
  func.func @transform_0(%arg0: i32) -> (i32, i32) {
    %c0_i32 = arith.constant 0 : i32
    %c0_i32_0 = arith.constant 0 : i32
    %c0_i32_1 = arith.constant 0 : i32
    return %c0_i32, %c0_i32_0 : i32, i32
  }
  func.func @transform_1(%arg0: i32) -> (i32, i32) {
    %c0_i32 = arith.constant 0 : i32
    %c0_i32_0 = arith.constant 0 : i32
    %c0_i32_1 = arith.constant 0 : i32
    return %c0_i32, %c0_i32_0 : i32, i32
  }
  func.func @transform_2(%arg0: i32) -> (i32, i32) {
    %c0_i32 = arith.constant 0 : i32
    %c0_i32_0 = arith.constant 0 : i32
    %c0_i32_1 = arith.constant 0 : i32
    return %c0_i32, %c0_i32_0 : i32, i32
  }
  func.func @transform_3(%arg0: i32) -> (i32, i32) {
    %c0_i32 = arith.constant 0 : i32
    %c0_i32_0 = arith.constant 0 : i32
    %c0_i32_1 = arith.constant 0 : i32
    return %c0_i32, %c0_i32_0 : i32, i32
  }
  func.func @transform_4(%arg0: i32) -> (i32, i32) {
    %c0_i32 = arith.constant 0 : i32
    %c0_i32_0 = arith.constant 0 : i32
    %c0_i32_1 = arith.constant 0 : i32
    return %c0_i32, %c0_i32_0 : i32, i32
  }
}

module attributes {stable_mosaic.version = 11 : i64} {
  func.func @_fused_conv_bn_lrelu_kernel(%arg0: i32, %arg1: memref<192x128xbf16, #tpu.memory_space<vmem>>, %arg2: memref<128x128xbf16, #tpu.memory_space<vmem>>, %arg3: memref<1x128xf32, #tpu.memory_space<vmem>>, %arg4: memref<1x128xf32, #tpu.memory_space<vmem>>, %arg5: memref<192x128xbf16, #tpu.memory_space<vmem>>) attributes {dimension_semantics = [#tpu.dimension_semantics<arbitrary>], iteration_bounds = array<i64: 1>, scalar_prefetch = 0 : i64, scratch_operands = 0 : i64, tpu.core_type = #tpu.core_type<tc>, window_params = [{pipeline_mode = #tpu.pipeline_mode<synchronous>, transform_indices = @transform_0, window_bounds = array<i64: 192, 128>}, {pipeline_mode = #tpu.pipeline_mode<synchronous>, transform_indices = @transform_1, window_bounds = array<i64: 128, 128>}, {pipeline_mode = #tpu.pipeline_mode<synchronous>, transform_indices = @transform_2, window_bounds = array<i64: 1, 128>}, {pipeline_mode = #tpu.pipeline_mode<synchronous>, transform_indices = @transform_3, window_bounds = array<i64: 1, 128>}, {pipeline_mode = #tpu.pipeline_mode<synchronous>, transform_indices = @transform_4, window_bounds = array<i64: 192, 128>}]} {
    %c0 = arith.constant 0 : index
    %c0_0 = arith.constant 0 : index
    %0 = vector.load %arg1[%c0, %c0_0] : memref<192x128xbf16, #tpu.memory_space<vmem>>, vector<192x128xbf16>
    %c0_1 = arith.constant 0 : index
    %c0_2 = arith.constant 0 : index
    %1 = vector.load %arg2[%c0_1, %c0_2] : memref<128x128xbf16, #tpu.memory_space<vmem>>, vector<128x128xbf16>
    %cst = arith.constant dense<0.000000e+00> : vector<192x128xf32>
    %2 = tpu.matmul %0, %1, %cst {dimension_numbers = #tpu.dot_dimension_numbers<[1], [0], [0], [1], [0, 0, 1, 1], [], []>} : vector<192x128xbf16>, vector<128x128xbf16>, vector<192x128xf32> -> vector<192x128xf32>
    %cst_3 = arith.constant dense<0.000000e+00> : vector<128xf32>
    %3 = vector.multi_reduction <add>, %2, %cst_3 [0] : vector<192x128xf32> to vector<128xf32>
    %4 = vector.shape_cast %3 : vector<128xf32> to vector<1x128xf32>
    %5 = arith.mulf %2, %2 : vector<192x128xf32>
    %cst_4 = arith.constant dense<0.000000e+00> : vector<128xf32>
    %6 = vector.multi_reduction <add>, %5, %cst_4 [0] : vector<192x128xf32> to vector<128xf32>
    %7 = vector.shape_cast %6 : vector<128xf32> to vector<1x128xf32>
    %cst_5 = arith.constant 0.00520833349 : f32
    %8 = vector.broadcast %cst_5 : f32 to vector<1x128xf32>
    %9 = arith.mulf %4, %8 : vector<1x128xf32>
    %cst_6 = arith.constant 0.00520833349 : f32
    %10 = vector.broadcast %cst_6 : f32 to vector<1x128xf32>
    %11 = arith.mulf %7, %10 : vector<1x128xf32>
    %12 = arith.mulf %9, %9 : vector<1x128xf32>
    %13 = arith.subf %11, %12 : vector<1x128xf32>
    %cst_7 = arith.constant 0.000000e+00 : f32
    %14 = vector.broadcast %cst_7 : f32 to vector<1x128xf32>
    %15 = arith.maximumf %13, %14 : vector<1x128xf32>
    %c0_8 = arith.constant 0 : index
    %c0_9 = arith.constant 0 : index
    %16 = vector.load %arg3[%c0_8, %c0_9] : memref<1x128xf32, #tpu.memory_space<vmem>>, vector<1x128xf32>
    %cst_10 = arith.constant 9.99999974E-6 : f32
    %17 = vector.broadcast %cst_10 : f32 to vector<1x128xf32>
    %18 = arith.addf %15, %17 : vector<1x128xf32>
    %19 = math.rsqrt %18 : vector<1x128xf32>
    %20 = arith.mulf %16, %19 : vector<1x128xf32>
    %c0_11 = arith.constant 0 : index
    %c0_12 = arith.constant 0 : index
    %21 = vector.load %arg4[%c0_11, %c0_12] : memref<1x128xf32, #tpu.memory_space<vmem>>, vector<1x128xf32>
    %22 = arith.mulf %9, %20 : vector<1x128xf32>
    %23 = arith.subf %21, %22 : vector<1x128xf32>
    %24 = vector.broadcast %20 : vector<1x128xf32> to vector<192x128xf32>
    %25 = arith.mulf %2, %24 : vector<192x128xf32>
    %26 = vector.broadcast %23 : vector<1x128xf32> to vector<192x128xf32>
    %27 = arith.addf %25, %26 : vector<192x128xf32>
    %cst_13 = arith.constant 1.000000e-01 : f32
    %28 = vector.broadcast %cst_13 : f32 to vector<192x128xf32>
    %29 = arith.mulf %28, %27 : vector<192x128xf32>
    %30 = arith.maximumf %27, %29 : vector<192x128xf32>
    %31 = arith.truncf %30 : vector<192x128xf32> to vector<192x128xbf16>
    %c0_14 = arith.constant 0 : index
    %c0_15 = arith.constant 0 : index
    %32 = vector.load %arg5[%c0_14, %c0_15] : memref<192x128xbf16, #tpu.memory_space<vmem>>, vector<192x128xbf16>
    tpu.vector_store %arg5[%c0_14, %c0_15], %31 {strides = array<i32>} : memref<192x128xbf16, #tpu.memory_space<vmem>>, vector<192x128xbf16>,
    return
  }
  func.func @transform_0(%arg0: i32) -> (i32, i32) {
    %c0_i32 = arith.constant 0 : i32
    %c0_i32_0 = arith.constant 0 : i32
    %c0_i32_1 = arith.constant 0 : i32
    return %c0_i32, %c0_i32_0 : i32, i32
  }
  func.func @transform_1(%arg0: i32) -> (i32, i32) {
    %c0_i32 = arith.constant 0 : i32
    %c0_i32_0 = arith.constant 0 : i32
    %c0_i32_1 = arith.constant 0 : i32
    return %c0_i32, %c0_i32_0 : i32, i32
  }
  func.func @transform_2(%arg0: i32) -> (i32, i32) {
    %c0_i32 = arith.constant 0 : i32
    %c0_i32_0 = arith.constant 0 : i32
    %c0_i32_1 = arith.constant 0 : i32
    return %c0_i32, %c0_i32_0 : i32, i32
  }
  func.func @transform_3(%arg0: i32) -> (i32, i32) {
    %c0_i32 = arith.constant 0 : i32
    %c0_i32_0 = arith.constant 0 : i32
    %c0_i32_1 = arith.constant 0 : i32
    return %c0_i32, %c0_i32_0 : i32, i32
  }
  func.func @transform_4(%arg0: i32) -> (i32, i32) {
    %c0_i32 = arith.constant 0 : i32
    %c0_i32_0 = arith.constant 0 : i32
    %c0_i32_1 = arith.constant 0 : i32
    return %c0_i32, %c0_i32_0 : i32, i32
  }
}

module attributes {stable_mosaic.version = 11 : i64} {
  func.func @_fused_conv_bn_lrelu_kernel(%arg0: i32, %arg1: memref<48x256xbf16, #tpu.memory_space<vmem>>, %arg2: memref<256x128xbf16, #tpu.memory_space<vmem>>, %arg3: memref<1x128xf32, #tpu.memory_space<vmem>>, %arg4: memref<1x128xf32, #tpu.memory_space<vmem>>, %arg5: memref<48x128xbf16, #tpu.memory_space<vmem>>) attributes {dimension_semantics = [#tpu.dimension_semantics<arbitrary>], iteration_bounds = array<i64: 1>, scalar_prefetch = 0 : i64, scratch_operands = 0 : i64, tpu.core_type = #tpu.core_type<tc>, window_params = [{pipeline_mode = #tpu.pipeline_mode<synchronous>, transform_indices = @transform_0, window_bounds = array<i64: 48, 256>}, {pipeline_mode = #tpu.pipeline_mode<synchronous>, transform_indices = @transform_1, window_bounds = array<i64: 256, 128>}, {pipeline_mode = #tpu.pipeline_mode<synchronous>, transform_indices = @transform_2, window_bounds = array<i64: 1, 128>}, {pipeline_mode = #tpu.pipeline_mode<synchronous>, transform_indices = @transform_3, window_bounds = array<i64: 1, 128>}, {pipeline_mode = #tpu.pipeline_mode<synchronous>, transform_indices = @transform_4, window_bounds = array<i64: 48, 128>}]} {
    %c0 = arith.constant 0 : index
    %c0_0 = arith.constant 0 : index
    %0 = vector.load %arg1[%c0, %c0_0] : memref<48x256xbf16, #tpu.memory_space<vmem>>, vector<48x256xbf16>
    %c0_1 = arith.constant 0 : index
    %c0_2 = arith.constant 0 : index
    %1 = vector.load %arg2[%c0_1, %c0_2] : memref<256x128xbf16, #tpu.memory_space<vmem>>, vector<256x128xbf16>
    %cst = arith.constant dense<0.000000e+00> : vector<48x128xf32>
    %2 = tpu.matmul %0, %1, %cst {dimension_numbers = #tpu.dot_dimension_numbers<[1], [0], [0], [1], [0, 0, 1, 1], [], []>} : vector<48x256xbf16>, vector<256x128xbf16>, vector<48x128xf32> -> vector<48x128xf32>
    %cst_3 = arith.constant dense<0.000000e+00> : vector<128xf32>
    %3 = vector.multi_reduction <add>, %2, %cst_3 [0] : vector<48x128xf32> to vector<128xf32>
    %4 = vector.shape_cast %3 : vector<128xf32> to vector<1x128xf32>
    %5 = arith.mulf %2, %2 : vector<48x128xf32>
    %cst_4 = arith.constant dense<0.000000e+00> : vector<128xf32>
    %6 = vector.multi_reduction <add>, %5, %cst_4 [0] : vector<48x128xf32> to vector<128xf32>
    %7 = vector.shape_cast %6 : vector<128xf32> to vector<1x128xf32>
    %cst_5 = arith.constant 0.020833334 : f32
    %8 = vector.broadcast %cst_5 : f32 to vector<1x128xf32>
    %9 = arith.mulf %4, %8 : vector<1x128xf32>
    %cst_6 = arith.constant 0.020833334 : f32
    %10 = vector.broadcast %cst_6 : f32 to vector<1x128xf32>
    %11 = arith.mulf %7, %10 : vector<1x128xf32>
    %12 = arith.mulf %9, %9 : vector<1x128xf32>
    %13 = arith.subf %11, %12 : vector<1x128xf32>
    %cst_7 = arith.constant 0.000000e+00 : f32
    %14 = vector.broadcast %cst_7 : f32 to vector<1x128xf32>
    %15 = arith.maximumf %13, %14 : vector<1x128xf32>
    %c0_8 = arith.constant 0 : index
    %c0_9 = arith.constant 0 : index
    %16 = vector.load %arg3[%c0_8, %c0_9] : memref<1x128xf32, #tpu.memory_space<vmem>>, vector<1x128xf32>
    %cst_10 = arith.constant 9.99999974E-6 : f32
    %17 = vector.broadcast %cst_10 : f32 to vector<1x128xf32>
    %18 = arith.addf %15, %17 : vector<1x128xf32>
    %19 = math.rsqrt %18 : vector<1x128xf32>
    %20 = arith.mulf %16, %19 : vector<1x128xf32>
    %c0_11 = arith.constant 0 : index
    %c0_12 = arith.constant 0 : index
    %21 = vector.load %arg4[%c0_11, %c0_12] : memref<1x128xf32, #tpu.memory_space<vmem>>, vector<1x128xf32>
    %22 = arith.mulf %9, %20 : vector<1x128xf32>
    %23 = arith.subf %21, %22 : vector<1x128xf32>
    %24 = vector.broadcast %20 : vector<1x128xf32> to vector<48x128xf32>
    %25 = arith.mulf %2, %24 : vector<48x128xf32>
    %26 = vector.broadcast %23 : vector<1x128xf32> to vector<48x128xf32>
    %27 = arith.addf %25, %26 : vector<48x128xf32>
    %cst_13 = arith.constant 1.000000e-01 : f32
    %28 = vector.broadcast %cst_13 : f32 to vector<48x128xf32>
    %29 = arith.mulf %28, %27 : vector<48x128xf32>
    %30 = arith.maximumf %27, %29 : vector<48x128xf32>
    %31 = arith.truncf %30 : vector<48x128xf32> to vector<48x128xbf16>
    %c0_14 = arith.constant 0 : index
    %c0_15 = arith.constant 0 : index
    %32 = vector.load %arg5[%c0_14, %c0_15] : memref<48x128xbf16, #tpu.memory_space<vmem>>, vector<48x128xbf16>
    tpu.vector_store %arg5[%c0_14, %c0_15], %31 {strides = array<i32>} : memref<48x128xbf16, #tpu.memory_space<vmem>>, vector<48x128xbf16>,
    return
  }
  func.func @transform_0(%arg0: i32) -> (i32, i32) {
    %c0_i32 = arith.constant 0 : i32
    %c0_i32_0 = arith.constant 0 : i32
    %c0_i32_1 = arith.constant 0 : i32
    return %c0_i32, %c0_i32_0 : i32, i32
  }
  func.func @transform_1(%arg0: i32) -> (i32, i32) {
    %c0_i32 = arith.constant 0 : i32
    %c0_i32_0 = arith.constant 0 : i32
    %c0_i32_1 = arith.constant 0 : i32
    return %c0_i32, %c0_i32_0 : i32, i32
  }
  func.func @transform_2(%arg0: i32) -> (i32, i32) {
    %c0_i32 = arith.constant 0 : i32
    %c0_i32_0 = arith.constant 0 : i32
    %c0_i32_1 = arith.constant 0 : i32
    return %c0_i32, %c0_i32_0 : i32, i32
  }
  func.func @transform_3(%arg0: i32) -> (i32, i32) {
    %c0_i32 = arith.constant 0 : i32
    %c0_i32_0 = arith.constant 0 : i32
    %c0_i32_1 = arith.constant 0 : i32
    return %c0_i32, %c0_i32_0 : i32, i32
  }
  func.func @transform_4(%arg0: i32) -> (i32, i32) {
    %c0_i32 = arith.constant 0 : i32
    %c0_i32_0 = arith.constant 0 : i32
    %c0_i32_1 = arith.constant 0 : i32
    return %c0_i32, %c0_i32_0 : i32, i32
  }
}

module attributes {stable_mosaic.version = 11 : i64} {
  func.func @_classifier_kernel(%arg0: i32, %arg1: memref<16x256xbf16, #tpu.memory_space<vmem>>, %arg2: memref<256x128xbf16, #tpu.memory_space<vmem>>, %arg3: memref<1x128xf32, #tpu.memory_space<vmem>>, %arg4: memref<128x128xbf16, #tpu.memory_space<vmem>>, %arg5: memref<1x128xf32, #tpu.memory_space<vmem>>, %arg6: memref<16x128xf32, #tpu.memory_space<vmem>>) attributes {dimension_semantics = [#tpu.dimension_semantics<arbitrary>], iteration_bounds = array<i64: 1>, scalar_prefetch = 0 : i64, scratch_operands = 0 : i64, tpu.core_type = #tpu.core_type<tc>, window_params = [{pipeline_mode = #tpu.pipeline_mode<synchronous>, transform_indices = @transform_0, window_bounds = array<i64: 16, 256>}, {pipeline_mode = #tpu.pipeline_mode<synchronous>, transform_indices = @transform_1, window_bounds = array<i64: 256, 128>}, {pipeline_mode = #tpu.pipeline_mode<synchronous>, transform_indices = @transform_2, window_bounds = array<i64: 1, 128>}, {pipeline_mode = #tpu.pipeline_mode<synchronous>, transform_indices = @transform_3, window_bounds = array<i64: 128, 128>}, {pipeline_mode = #tpu.pipeline_mode<synchronous>, transform_indices = @transform_4, window_bounds = array<i64: 1, 128>}, {pipeline_mode = #tpu.pipeline_mode<synchronous>, transform_indices = @transform_5, window_bounds = array<i64: 16, 128>}]} {
    %c0 = arith.constant 0 : index
    %c0_0 = arith.constant 0 : index
    %0 = vector.load %arg1[%c0, %c0_0] : memref<16x256xbf16, #tpu.memory_space<vmem>>, vector<16x256xbf16>
    %c0_1 = arith.constant 0 : index
    %c0_2 = arith.constant 0 : index
    %1 = vector.load %arg2[%c0_1, %c0_2] : memref<256x128xbf16, #tpu.memory_space<vmem>>, vector<256x128xbf16>
    %cst = arith.constant dense<0.000000e+00> : vector<16x128xf32>
    %2 = tpu.matmul %0, %1, %cst {dimension_numbers = #tpu.dot_dimension_numbers<[1], [0], [0], [1], [0, 0, 1, 1], [], []>} : vector<16x256xbf16>, vector<256x128xbf16>, vector<16x128xf32> -> vector<16x128xf32>
    %c0_3 = arith.constant 0 : index
    %c0_4 = arith.constant 0 : index
    %3 = vector.load %arg3[%c0_3, %c0_4] : memref<1x128xf32, #tpu.memory_space<vmem>>, vector<1x128xf32>
    %4 = vector.broadcast %3 : vector<1x128xf32> to vector<16x128xf32>
    %5 = arith.addf %2, %4 : vector<16x128xf32>
    %cst_5 = arith.constant 1.000000e-01 : f32
    %6 = vector.broadcast %cst_5 : f32 to vector<16x128xf32>
    %7 = arith.mulf %6, %5 : vector<16x128xf32>
    %8 = arith.maximumf %5, %7 : vector<16x128xf32>
    %9 = arith.truncf %8 : vector<16x128xf32> to vector<16x128xbf16>
    %c0_6 = arith.constant 0 : index
    %c0_7 = arith.constant 0 : index
    %10 = vector.load %arg4[%c0_6, %c0_7] : memref<128x128xbf16, #tpu.memory_space<vmem>>, vector<128x128xbf16>
    %cst_8 = arith.constant dense<0.000000e+00> : vector<16x128xf32>
    %11 = tpu.matmul %9, %10, %cst_8 {dimension_numbers = #tpu.dot_dimension_numbers<[1], [0], [0], [1], [0, 0, 1, 1], [], []>} : vector<16x128xbf16>, vector<128x128xbf16>, vector<16x128xf32> -> vector<16x128xf32>
    %c0_9 = arith.constant 0 : index
    %c0_10 = arith.constant 0 : index
    %12 = vector.load %arg5[%c0_9, %c0_10] : memref<1x128xf32, #tpu.memory_space<vmem>>, vector<1x128xf32>
    %13 = vector.broadcast %12 : vector<1x128xf32> to vector<16x128xf32>
    %14 = arith.addf %11, %13 : vector<16x128xf32>
    %c0_11 = arith.constant 0 : index
    %c0_12 = arith.constant 0 : index
    %15 = vector.load %arg6[%c0_11, %c0_12] : memref<16x128xf32, #tpu.memory_space<vmem>>, vector<16x128xf32>
    tpu.vector_store %arg6[%c0_11, %c0_12], %14 {strides = array<i32>} : memref<16x128xf32, #tpu.memory_space<vmem>>, vector<16x128xf32>,
    return
  }
  func.func @transform_0(%arg0: i32) -> (i32, i32) {
    %c0_i32 = arith.constant 0 : i32
    %c0_i32_0 = arith.constant 0 : i32
    %c0_i32_1 = arith.constant 0 : i32
    return %c0_i32, %c0_i32_0 : i32, i32
  }
  func.func @transform_1(%arg0: i32) -> (i32, i32) {
    %c0_i32 = arith.constant 0 : i32
    %c0_i32_0 = arith.constant 0 : i32
    %c0_i32_1 = arith.constant 0 : i32
    return %c0_i32, %c0_i32_0 : i32, i32
  }
  func.func @transform_2(%arg0: i32) -> (i32, i32) {
    %c0_i32 = arith.constant 0 : i32
    %c0_i32_0 = arith.constant 0 : i32
    %c0_i32_1 = arith.constant 0 : i32
    return %c0_i32, %c0_i32_0 : i32, i32
  }
  func.func @transform_3(%arg0: i32) -> (i32, i32) {
    %c0_i32 = arith.constant 0 : i32
    %c0_i32_0 = arith.constant 0 : i32
    %c0_i32_1 = arith.constant 0 : i32
    return %c0_i32, %c0_i32_0 : i32, i32
  }
  func.func @transform_4(%arg0: i32) -> (i32, i32) {
    %c0_i32 = arith.constant 0 : i32
    %c0_i32_0 = arith.constant 0 : i32
    %c0_i32_1 = arith.constant 0 : i32
    return %c0_i32, %c0_i32_0 : i32, i32
  }
  func.func @transform_5(%arg0: i32) -> (i32, i32) {
    %c0_i32 = arith.constant 0 : i32
    %c0_i32_0 = arith.constant 0 : i32
    %c0_i32_1 = arith.constant 0 : i32
    return %c0_i32, %c0_i32_0 : i32, i32
  }
}

</mosaic_0001>

<bundles_post_ra>
// kernel: sn_discriminator_forward.5
= control target key start
LH: loop header
LB: loop body
LE: loop exit
PB: predicated region body
PF: predicated region fallthrough
CT: control target
= control target key end

     0   :  { %s4272_s1 = inlined_call_operand.vmem [shape: bf16[128,128], index: 1, kind: input, shape index: {}]   ;;  %s4273_s0 = inlined_call_operand.vmem [shape: bf16[768,128], index: 0, kind: input, shape index: {}]   ;;  %s4274_s2 = inlined_call_operand.vmem [shape: f32[1,128], index: 2, kind: input, shape index: {}]   ;;  %s4275_s3 = inlined_call_operand.vmem [shape: f32[1,128], index: 3, kind: input, shape index: {}]   ;;  %s4276_s4 = inlined_call_operand.vmem [shape: bf16[768,128], index: 4, kind: output, shape index: {}]  }
   0x1   :  { %v1898_v0 = vld [vmem:[%s4272_s1 + $0x38] sm:$0xff]  ;;  %v1897_v1 = vld [vmem:[%s4272_s1 + $0x30] sm:$0xff]  ;;  %v1896_v2 = vld [vmem:[%s4272_s1 + $0x28] sm:$0xff] }
   0x2   :  { %465 = vmatpush.bf16.msra.mxu0 %v1898_v0  ;;  %2186 = vmatpush.bf16.msra.mxu1 %v1898_v0  ;;  %v1895_v3 = vld [vmem:[%s4272_s1 + $0x20] sm:$0xff]  ;;  %v1894_v4 = vld [vmem:[%s4272_s1 + $0x18] sm:$0xff]  ;;  %v1893_v5 = vld [vmem:[%s4272_s1 + $0x10] sm:$0xff] }
   0x3   :  { %2187 = vmatpush.bf16.msra.mxu2 %v1898_v0  ;;  %2188 = vmatpush.bf16.msra.mxu3 %v1898_v0  ;;  %v1892_v6 = vld [vmem:[%s4272_s1 + $0x8] sm:$0xff]  ;;  %v1891_v7 = vld [vmem:[%s4272_s1] sm:$0xff]  ;;  %v1845_v12 = vld [vmem:[%s4273_s0 + $0x10] sm:$0xff] }
   0x4   :  { %v1843_v8 = vld [vmem:[%s4273_s0] sm:$0xff]  ;;  %v1844_v10 = vld [vmem:[%s4273_s0 + $0x8] sm:$0xff]  ;;  %v1857_v13 = vld [vmem:[%s4273_s0 + $0x70] sm:$0xff] }
   0x5   :  { %v1855_v9 = vld [vmem:[%s4273_s0 + $0x60] sm:$0xff]  ;;  %v1856_v11 = vld [vmem:[%s4273_s0 + $0x68] sm:$0xff]  ;;  %v1846_v14 = vld [vmem:[%s4273_s0 + $0x18] sm:$0xff] }
   0x6   :  { %466 = vmatpush.bf16.msra.mxu0 %v1897_v1  ;;  %2189 = vmatpush.bf16.msra.mxu1 %v1897_v1  ;;  %v1867_v15 = vld [vmem:[%s4273_s0 + $0xc0] sm:$0xff]  ;;  %v1858_v16 = vld [vmem:[%s4273_s0 + $0x78] sm:$0xff]  ;;  %v1868_v18 = vld [vmem:[%s4273_s0 + $0xc8] sm:$0xff] }
   0x7   :  { %2190 = vmatpush.bf16.msra.mxu2 %v1897_v1  ;;  %2191 = vmatpush.bf16.msra.mxu3 %v1897_v1  ;;  %v1847_v17 = vld [vmem:[%s4273_s0 + $0x20] sm:$0xff]  ;;  %v1848_v20 = vld [vmem:[%s4273_s0 + $0x28] sm:$0xff]  ;;  %v1869_v21 = vld [vmem:[%s4273_s0 + $0xd0] sm:$0xff] }
   0x8   :  { %v1859_v19 = vld [vmem:[%s4273_s0 + $0x80] sm:$0xff]  ;;  %v1860_v22 = vld [vmem:[%s4273_s0 + $0x88] sm:$0xff]  ;;  %v1849_v23 = vld [vmem:[%s4273_s0 + $0x30] sm:$0xff] }
   0x9   :  { %v1870_v24 = vld [vmem:[%s4273_s0 + $0xd8] sm:$0xff]  ;;  %v1879_v25 = vld [vmem:[%s4273_s0 + $0x120] sm:$0xff]  ;;  %v1861_v26 = vld [vmem:[%s4273_s0 + $0x90] sm:$0xff] }
   0xa   :  { %467 = vmatpush.bf16.msra.mxu0 %v1896_v2  ;;  %2192 = vmatpush.bf16.msra.mxu1 %v1896_v2  ;;  %v1850_v27 = vld [vmem:[%s4273_s0 + $0x38] sm:$0xff]  ;;  %v1871_v28 = vld [vmem:[%s4273_s0 + $0xe0] sm:$0xff]  ;;  %v1880_v29 = vld [vmem:[%s4273_s0 + $0x128] sm:$0xff] }
   0xb   :  { %2193 = vmatpush.bf16.msra.mxu2 %v1896_v2  ;;  %2194 = vmatpush.bf16.msra.mxu3 %v1896_v2  ;;  %v1862_v30 = vld [vmem:[%s4273_s0 + $0x98] sm:$0xff]  ;;  %v1851_v31 = vld [vmem:[%s4273_s0 + $0x40] sm:$0xff]  ;;  %v1872_v33 = vld [vmem:[%s4273_s0 + $0xe8] sm:$0xff] }
   0xc   :  { %v1881_v34 = vld [vmem:[%s4273_s0 + $0x130] sm:$0xff]  ;;  %v1863_v37 = vld [vmem:[%s4273_s0 + $0xa0] sm:$0xff]  ;;  %v1852_v38 = vld [vmem:[%s4273_s0 + $0x48] sm:$0xff] }
   0xd   :  { %v1873_v41 = vld [vmem:[%s4273_s0 + $0xf0] sm:$0xff]  ;;  %v1882_v42 = vld [vmem:[%s4273_s0 + $0x138] sm:$0xff]  ;;  %v1864_v45 = vld [vmem:[%s4273_s0 + $0xa8] sm:$0xff] }
   0xe   :  { %468 = vmatpush.bf16.msra.mxu0 %v1895_v3  ;;  %2195 = vmatpush.bf16.msra.mxu1 %v1895_v3  ;;  %v1853_v46 = vld [vmem:[%s4273_s0 + $0x50] sm:$0xff]  ;;  %v1874_v49 = vld [vmem:[%s4273_s0 + $0xf8] sm:$0xff]  ;;  %v1883_v50 = vld [vmem:[%s4273_s0 + $0x140] sm:$0xff] }
   0xf   :  { %2196 = vmatpush.bf16.msra.mxu2 %v1895_v3  ;;  %2197 = vmatpush.bf16.msra.mxu3 %v1895_v3  ;;  %v1865_v53 = vld [vmem:[%s4273_s0 + $0xb0] sm:$0xff]  ;;  %v1854_v54 = vld [vmem:[%s4273_s0 + $0x58] sm:$0xff]  ;;  %v1875_v57 = vld [vmem:[%s4273_s0 + $0x100] sm:$0xff] }
  0x10   :  { %v1884_v58 = vld [vmem:[%s4273_s0 + $0x148] sm:$0xff]  ;;  %v1866_v61 = vld [vmem:[%s4273_s0 + $0xb8] sm:$0xff]  ;;  %v1885_v2 = vld [vmem:[%s4273_s0 + $0x150] sm:$0xff] }
  0x11   :  { %v1876_v1 = vld [vmem:[%s4273_s0 + $0x108] sm:$0xff] }
  0x12   :  { %469 = vmatpush.bf16.msra.mxu0 %v1894_v4  ;;  %2198 = vmatpush.bf16.msra.mxu1 %v1894_v4 }
  0x13   :  { %2199 = vmatpush.bf16.msra.mxu2 %v1894_v4  ;;  %2200 = vmatpush.bf16.msra.mxu3 %v1894_v4 }
  0x16   :  { %470 = vmatpush.bf16.msra.mxu0 %v1893_v5  ;;  %2201 = vmatpush.bf16.msra.mxu1 %v1893_v5 }
  0x17   :  { %2202 = vmatpush.bf16.msra.mxu2 %v1893_v5  ;;  %2203 = vmatpush.bf16.msra.mxu3 %v1893_v5 }
  0x1a   :  { %471 = vmatpush.bf16.msra.mxu0 %v1892_v6  ;;  %2204 = vmatpush.bf16.msra.mxu1 %v1892_v6 }
  0x1b   :  { %2205 = vmatpush.bf16.msra.mxu2 %v1892_v6  ;;  %2206 = vmatpush.bf16.msra.mxu3 %v1892_v6 }
  0x1e   :  { %472 = vmatpush.bf16.msra.mxu0 %v1891_v7  ;;  %2207 = vmatpush.bf16.msra.mxu1 %v1891_v7 }
  0x1f   :  { %2208 = vmatpush.bf16.msra.mxu2 %v1891_v7  ;;  %2209 = vmatpush.bf16.msra.mxu3 %v1891_v7 }
  0x21   :  { %473 = vmatmul.bf16.vlgmr.msra.gmra.mxu0 %v1843_v8  ;;  %533 = vmatmul.bf16.vlgmr.msra.gmra.mxu1 %v1855_v9  ;;  %v1877_v9 = vld [vmem:[%s4273_s0 + $0x110] sm:$0xff] }
  0x22   :  { %593 = vmatmul.bf16.vlgmr.msra.gmra.mxu2 %v1867_v15  ;;  %653 = vmatmul.bf16.vlgmr.msra.gmra.mxu3 %v1879_v25  ;;  %v1888_v25 = vld [vmem:[%s4273_s0 + $0x168] sm:$0xff] }
  0x31   :  { %478 = vmatmul.bf16.gmra.mxu0 %v1844_v10  ;;  %538 = vmatmul.bf16.gmra.mxu1 %v1856_v11  ;;  %v1886_v10 = vld [vmem:[%s4273_s0 + $0x158] sm:$0xff] }
  0x32   :  { %598 = vmatmul.bf16.gmra.mxu2 %v1868_v18  ;;  %658 = vmatmul.bf16.gmra.mxu3 %v1880_v29 }
  0x41   :  { %483 = vmatmul.bf16.gmra.mxu0 %v1845_v12  ;;  %543 = vmatmul.bf16.gmra.mxu1 %v1857_v13 }
  0x42   :  { %603 = vmatmul.bf16.gmra.mxu2 %v1869_v21  ;;  %663 = vmatmul.bf16.gmra.mxu3 %v1881_v34 }
  0x51   :  { %488 = vmatmul.bf16.gmra.mxu0 %v1846_v14  ;;  %548 = vmatmul.bf16.gmra.mxu1 %v1858_v16  ;;  %v1878_v16 = vld [vmem:[%s4273_s0 + $0x118] sm:$0xff] }
  0x52   :  { %608 = vmatmul.bf16.gmra.mxu2 %v1870_v24  ;;  %668 = vmatmul.bf16.gmra.mxu3 %v1882_v42 }
  0x61   :  { %493 = vmatmul.bf16.gmra.mxu0 %v1847_v17  ;;  %553 = vmatmul.bf16.gmra.mxu1 %v1859_v19  ;;  %v1887_v17 = vld [vmem:[%s4273_s0 + $0x160] sm:$0xff] }
  0x62   :  { %613 = vmatmul.bf16.gmra.mxu2 %v1871_v28  ;;  %673 = vmatmul.bf16.gmra.mxu3 %v1883_v50 }
  0x71   :  { %498 = vmatmul.bf16.gmra.mxu0 %v1848_v20  ;;  %558 = vmatmul.bf16.gmra.mxu1 %v1860_v22 }
  0x72   :  { %618 = vmatmul.bf16.gmra.mxu2 %v1872_v33  ;;  %678 = vmatmul.bf16.gmra.mxu3 %v1884_v58 }
  0x81   :  { %503 = vmatmul.bf16.gmra.mxu0 %v1849_v23  ;;  %563 = vmatmul.bf16.gmra.mxu1 %v1861_v26 }
  0x82   :  { %623 = vmatmul.bf16.gmra.mxu2 %v1873_v41  ;;  %683 = vmatmul.bf16.gmra.mxu3 %v1885_v2 }
  0x91   :  { %508 = vmatmul.bf16.gmra.mxu0 %v1850_v27  ;;  %568 = vmatmul.bf16.gmra.mxu1 %v1862_v30 }
  0x92   :  { %628 = vmatmul.bf16.gmra.mxu2 %v1874_v49  ;;  %688 = vmatmul.bf16.gmra.mxu3 %v1886_v10 }
  0x9e   :  { %v2333_v32 = vpop.f32.mrf.mxu0  ;;  %v2343_v36 = vpop.f32.mrf.mxu1 }
  0x9f   :  { %4412 = vst [vmem:[#allocation2_spill] sm:$0xff] %v2343_v36  ;;  %v815_v49 = vmul.f32 %v2333_v32, %v2333_v32 }
  0xa1   :  { %513 = vmatmul.bf16.gmra.mxu0 %v1851_v31  ;;  %573 = vmatmul.bf16.gmra.mxu1 %v1863_v37  ;;  %v1889_v37 = vld [vmem:[%s4273_s0 + $0x170] sm:$0xff] }
  0xa2   :  { %633 = vmatmul.bf16.gmra.mxu2 %v1875_v57  ;;  %693 = vmatmul.bf16.gmra.mxu3 %v1887_v17 }
  0xa5   :  { %v2403_v60 = vpop.f32.mrf.mxu2  ;;  %v2458_v20 = vpop.f32.mrf.mxu3 }
  0xa6   :  { %v2341_v35 = vpop.f32.mrf.mxu0  ;;  %v2353_v40 = vpop.f32.mrf.mxu1  ;;  %4421 = vst [vmem:[#allocation11_spill] sm:$0xff] %v2403_v60 }
  0xa7   :  { %4413 = vst [vmem:[#allocation3_spill] sm:$0xff] %v2353_v40  ;;  %v714_v50 = vadd.f32 %v2341_v35, %v2333_v32 }
  0xa8   :  { %4431 = vst [vmem:[#allocation21_spill] sm:$0xff] %v2458_v20 }
  0xad   :  { %v2412_v0 = vpop.f32.mrf.mxu2  ;;  %v2466_v24 = vpop.f32.mrf.mxu3 }
  0xae   :  { %v2351_v39 = vpop.f32.mrf.mxu0  ;;  %v2363_v44 = vpop.f32.mrf.mxu1  ;;  %4423 = vst [vmem:[#allocation13_spill] sm:$0xff] %v2412_v0 }
  0xaf   :  { %4435 = vst [vmem:[#allocation25_spill] sm:$0xff] %v2466_v24  ;;  %v715_v57 = vadd.f32 %v714_v50, %v2351_v39 }
  0xb1   :  { %518 = vmatmul.bf16.gmra.mxu0 %v1852_v38  ;;  %578 = vmatmul.bf16.gmra.mxu1 %v1864_v45  ;;  %v816_v45 = vmul.f32 %v2341_v35, %v2341_v35 }
  0xb2   :  { %638 = vmatmul.bf16.gmra.mxu2 %v1876_v1  ;;  %698 = vmatmul.bf16.gmra.mxu3 %v1888_v25 }
  0xb5   :  { %v2424_v5 = vpop.f32.mrf.mxu2  ;;  %v2477_v29 = vpop.f32.mrf.mxu3 }
  0xb6   :  { %v2361_v43 = vpop.f32.mrf.mxu0  ;;  %v2373_v48 = vpop.f32.mrf.mxu1 }
  0xb7   :  { %4414 = vst [vmem:[#allocation4_spill] sm:$0xff] %v2361_v43  ;;  %v818_v58 = vmul.f32 %v2361_v43, %v2361_v43  ;;  %v716_v2 = vadd.f32 %v715_v57, %v2361_v43 }
  0xb8   :  { %4416 = vst [vmem:[#allocation6_spill] sm:$0xff] %v2373_v48 }
  0xbd   :  { %v2430_v8 = vpop.f32.mrf.mxu2  ;;  %v2483_v33 = vpop.f32.mrf.mxu3 }
  0xbe   :  { %v2371_v47 = vpop.f32.mrf.mxu0  ;;  %v2383_v52 = vpop.f32.mrf.mxu1 }
  0xbf   :  { %4415 = vst [vmem:[#allocation5_spill] sm:$0xff] %v2371_v47  ;;  %v717_v17 = vadd.f32 %v716_v2, %v2371_v47 }
  0xc0   :  { %4417 = vst [vmem:[#allocation7_spill] sm:$0xff] %v2383_v52 }
  0xc1   :  { %523 = vmatmul.bf16.gmra.mxu0 %v1853_v46  ;;  %583 = vmatmul.bf16.gmra.mxu1 %v1865_v53  ;;  %v817_v53 = vmul.f32 %v2351_v39, %v2351_v39 }
  0xc2   :  { %643 = vmatmul.bf16.gmra.mxu2 %v1877_v9  ;;  %703 = vmatmul.bf16.gmra.mxu3 %v1889_v37  ;;  %v819_v9 = vmul.f32 %v2371_v47, %v2371_v47  ;;  %v1890_v37 = vld [vmem:[%s4273_s0 + $0x178] sm:$0xff] }
  0xc5   :  { %v2440_v12 = vpop.f32.mrf.mxu2  ;;  %v2492_v41 = vpop.f32.mrf.mxu3 }
  0xc6   :  { %v2381_v51 = vpop.f32.mrf.mxu0  ;;  %v2393_v56 = vpop.f32.mrf.mxu1 }
  0xc7   :  { %4419 = vst [vmem:[#allocation9_spill] sm:$0xff] %v2393_v56  ;;  %v820_v25 = vmul.f32 %v2381_v51, %v2381_v51  ;;  %v718_v50 = vadd.f32 %v717_v17, %v2381_v51 }
  0xcd   :  { %v2446_v15 = vpop.f32.mrf.mxu2  ;;  %v2514_v10 = vpop.f32.mrf.mxu3 }
  0xce   :  { %v2391_v55 = vpop.f32.mrf.mxu0  ;;  %v2408_v62 = vpop.f32.mrf.mxu1  ;;  %4428 = vst [vmem:[#allocation18_spill] sm:$0xff] %v2446_v15 }
  0xcf   :  { %4418 = vst [vmem:[#allocation8_spill] sm:$0xff] %v2391_v55 }
  0xd1   :  { %528 = vmatmul.bf16.gmra.mxu0 %v1854_v54  ;;  %588 = vmatmul.bf16.gmra.mxu1 %v1866_v61  ;;  %v911_v54 = vadd.f32 %v816_v45, %v815_v49 }
  0xd2   :  { %648 = vmatmul.bf16.gmra.mxu2 %v1878_v16  ;;  %708 = vmatmul.bf16.gmra.mxu3 %v1890_v37 }
  0xd3   :  { %v912_v1 = vadd.f32 %v911_v54, %v817_v53  ;;  %v821_v53 = vmul.f32 %v2391_v55, %v2391_v55 }
  0xd5   :  { %v2460_v21 = vpop.f32.mrf.mxu2  ;;  %v913_v16 = vadd.f32 %v912_v1, %v818_v58  ;;  %v719_v58 = vadd.f32 %v718_v50, %v2391_v55 }
  0xd6   :  { %v2401_v59 = vpop.f32.mrf.mxu0  ;;  %v2420_v3 = vpop.f32.mrf.mxu1  ;;  %4432 = vst [vmem:[#allocation22_spill] sm:$0xff] %v2460_v21 }
  0xd7   :  { %4420 = vst [vmem:[#allocation10_spill] sm:$0xff] %v2401_v59  ;;  %v914_v49 = vadd.f32 %v913_v16, %v819_v9  ;;  %v822_v1 = vmul.f32 %v2401_v59, %v2401_v59  ;;  %v720_v43 = vadd.f32 %v719_v58, %v2401_v59 }
  0xd9   :  { %v915_v57 = vadd.f32 %v914_v49, %v820_v25  ;;  %v2540_v25 = vpop.f32.mrf.mxu3 }
  0xda   :  { %4445 = vst [vmem:[#allocation35_spill] sm:$0xff] %v2540_v25 }
  0xdb   :  { %v916_v47 = vadd.f32 %v915_v57, %v821_v53 }
  0xdd   :  { %v2471_v26 = vpop.f32.mrf.mxu2  ;;  %v917_v16 = vadd.f32 %v916_v47, %v822_v1 }
  0xde   :  { %v2410_v63 = vpop.f32.mrf.mxu0  ;;  %v2428_v7 = vpop.f32.mrf.mxu1 }
  0xdf   :  { %4422 = vst [vmem:[#allocation12_spill] sm:$0xff] %v2410_v63  ;;  %v823_v9 = vmul.f32 %v2410_v63, %v2410_v63  ;;  %v721_v17 = vadd.f32 %v720_v43, %v2410_v63 }
  0xe0   :  { %4426 = vst [vmem:[#allocation16_spill] sm:$0xff] %v2428_v7 }
  0xe1   :  { %v918_v49 = vadd.f32 %v917_v16, %v823_v9  ;;  %v2563_v59 = vpop.f32.mrf.mxu3 }
  0xe5   :  { %v2481_v31 = vpop.f32.mrf.mxu2 }
  0xe6   :  { %v2422_v4 = vpop.f32.mrf.mxu0  ;;  %v2442_v13 = vpop.f32.mrf.mxu1 }
  0xe7   :  { %4424 = vst [vmem:[#allocation14_spill] sm:$0xff] %v2422_v4  ;;  %v824_v37 = vmul.f32 %v2422_v4, %v2422_v4  ;;  %v722_v50 = vadd.f32 %v721_v17, %v2422_v4 }
  0xe9   :  { %v919_v57 = vadd.f32 %v918_v49, %v824_v37 }
  0xed   :  { %v2494_v42 = vpop.f32.mrf.mxu2 }
  0xee   :  { %v2426_v6 = vpop.f32.mrf.mxu0  ;;  %v2454_v18 = vpop.f32.mrf.mxu1 }
  0xef   :  { %4425 = vst [vmem:[#allocation15_spill] sm:$0xff] %v2426_v6  ;;  %v825_v55 = vmul.f32 %v2426_v6, %v2426_v6  ;;  %v723_v58 = vadd.f32 %v722_v50, %v2426_v6 }
  0xf0   :  { %4429 = vst [vmem:[#allocation19_spill] sm:$0xff] %v2454_v18 }
  0xf1   :  { %v920_v63 = vadd.f32 %v919_v57, %v825_v55 }
  0xf5   :  { %v2522_v45 = vpop.f32.mrf.mxu2 }
  0xf6   :  { %v2438_v11 = vpop.f32.mrf.mxu0  ;;  %v2462_v22 = vpop.f32.mrf.mxu1  ;;  %4442 = vst [vmem:[#allocation32_spill] sm:$0xff] %v2522_v45 }
  0xf7   :  { %4433 = vst [vmem:[#allocation23_spill] sm:$0xff] %v2462_v22  ;;  %v826_v47 = vmul.f32 %v2438_v11, %v2438_v11  ;;  %v724_v9 = vadd.f32 %v723_v58, %v2438_v11 }
  0xf9   :  { %v921_v17 = vadd.f32 %v920_v63, %v826_v47 }
  0xfd   :  { %v2545_v53 = vpop.f32.mrf.mxu2 }
  0xfe   :  { %v2444_v14 = vpop.f32.mrf.mxu0  ;;  %v2475_v28 = vpop.f32.mrf.mxu1  ;;  %4446 = vst [vmem:[#allocation36_spill] sm:$0xff] %v2545_v53 }
  0xff   :  { %4427 = vst [vmem:[#allocation17_spill] sm:$0xff] %v2444_v14  ;;  %v827_v16 = vmul.f32 %v2444_v14, %v2444_v14  ;;  %v725_v4 = vadd.f32 %v724_v9, %v2444_v14 }
 0x101   :  { %v922_v49 = vadd.f32 %v921_v17, %v827_v16 }
 0x105   :  { %v2570_v47 = vpop.f32.mrf.mxu2 }
 0x106   :  { %v2456_v19 = vpop.f32.mrf.mxu0  ;;  %v2485_v34 = vpop.f32.mrf.mxu1 }
 0x107   :  { %4430 = vst [vmem:[#allocation20_spill] sm:$0xff] %v2456_v19  ;;  %v828_v37 = vmul.f32 %v2456_v19, %v2456_v19  ;;  %v726_v50 = vadd.f32 %v725_v4, %v2456_v19 }
 0x108   :  { %4438 = vst [vmem:[#allocation28_spill] sm:$0xff] %v2485_v34 }
 0x109   :  { %v923_v55 = vadd.f32 %v922_v49, %v828_v37 }
 0x10e   :  { %v2464_v23 = vpop.f32.mrf.mxu0  ;;  %v2498_v46 = vpop.f32.mrf.mxu1 }
 0x10f   :  { %4434 = vst [vmem:[#allocation24_spill] sm:$0xff] %v2464_v23  ;;  %v829_v6 = vmul.f32 %v2464_v23, %v2464_v23  ;;  %v727_v57 = vadd.f32 %v726_v50, %v2464_v23 }
 0x110   :  { %4440 = vst [vmem:[#allocation30_spill] sm:$0xff] %v2498_v46 }
 0x111   :  { %v924_v9 = vadd.f32 %v923_v55, %v829_v6 }
 0x116   :  { %v2473_v27 = vpop.f32.mrf.mxu0  ;;  %v2527_v54 = vpop.f32.mrf.mxu1 }
 0x117   :  { %4436 = vst [vmem:[#allocation26_spill] sm:$0xff] %v2473_v27  ;;  %v830_v58 = vmul.f32 %v2473_v27, %v2473_v27  ;;  %v728_v16 = vadd.f32 %v727_v57, %v2473_v27 }
 0x118   :  { %4443 = vst [vmem:[#allocation33_spill] sm:$0xff] %v2527_v54 }
 0x119   :  { %v925_v19 = vadd.f32 %v924_v9, %v830_v58  ;;  %v2588_v58 = vpop.f32.mrf.mxu3 }
 0x11e   :  { %v2479_v30 = vpop.f32.mrf.mxu0  ;;  %v2552_v1 = vpop.f32.mrf.mxu1 }
 0x11f   :  { %4437 = vst [vmem:[#allocation27_spill] sm:$0xff] %v2479_v30  ;;  %v831_v4 = vmul.f32 %v2479_v30, %v2479_v30  ;;  %v729_v37 = vadd.f32 %v728_v16, %v2479_v30 }
 0x120   :  { %4447 = vst [vmem:[#allocation37_spill] sm:$0xff] %v2552_v1 }
 0x121   :  { %v926_v50 = vadd.f32 %v925_v19, %v831_v4  ;;  %v2593_v4 = vpop.f32.mrf.mxu2 }
 0x126   :  { %v2490_v38 = vpop.f32.mrf.mxu0  ;;  %v2575_v17 = vpop.f32.mrf.mxu1 }
 0x127   :  { %4439 = vst [vmem:[#allocation29_spill] sm:$0xff] %v2490_v38  ;;  %v832_v49 = vmul.f32 %v2490_v38, %v2490_v38  ;;  %v730_v23 = vadd.f32 %v729_v37, %v2490_v38 }
 0x129   :  { %v927_v6 = vadd.f32 %v926_v50, %v832_v49 }
 0x12e   :  { %v2509_v61 = vpop.f32.mrf.mxu0  ;;  %v2598_v50 = vpop.f32.mrf.mxu1 }
 0x12f   :  { %4441 = vst [vmem:[#allocation31_spill] sm:$0xff] %v2509_v61  ;;  %v833_v14 = vmul.f32 %v2509_v61, %v2509_v61  ;;  %v731_v55 = vadd.f32 %v730_v23, %v2509_v61 }
 0x131   :  { %v928_v9 = vadd.f32 %v927_v6, %v833_v14 }
 0x136   :  { %v2532_v2 = vpop.f32.mrf.mxu0 }
 0x137   :  { %4444 = vst [vmem:[#allocation34_spill] sm:$0xff] %v2532_v2  ;;  %v834_v57 = vmul.f32 %v2532_v2, %v2532_v2  ;;  %v732_v16 = vadd.f32 %v731_v55, %v2532_v2 }
 0x139   :  { %v929_v37 = vadd.f32 %v928_v9, %v834_v57 }
 0x13e   :  { %v2550_v43 = vpop.f32.mrf.mxu0 }
 0x13f   :  { %v835_v19 = vmul.f32 %v2550_v43, %v2550_v43  ;;  %v733_v49 = vadd.f32 %v732_v16, %v2550_v43  ;;  %v2609_v16 = vpop.f32.mrf.mxu3 }
 0x141   :  { %v930_v61 = vadd.f32 %v929_v37, %v835_v19  ;;  %v839_v19 = vmul.f32 %v2343_v36, %v2343_v36 }
 0x146   :  { %v2568_v63 = vpop.f32.mrf.mxu0 }
 0x147   :  { %4448 = vst [vmem:[#allocation38_spill] sm:$0xff] %v2568_v63  ;;  %v836_v23 = vmul.f32 %v2568_v63, %v2568_v63  ;;  %v734_v38 = vadd.f32 %v733_v49, %v2568_v63  ;;  %v2614_v63 = vpop.f32.mrf.mxu2 }
 0x149   :  { %v931_v6 = vadd.f32 %v930_v61, %v836_v23 }
 0x14e   :  { %v2586_v27 = vpop.f32.mrf.mxu0 }
 0x14f   :  { %v837_v14 = vmul.f32 %v2586_v27, %v2586_v27  ;;  %v735_v55 = vadd.f32 %v734_v38, %v2586_v27  ;;  %v840_v38 = vmul.f32 %v2353_v40, %v2353_v40 }
 0x151   :  { %v932_v30 = vadd.f32 %v931_v6, %v837_v14  ;;  %v2619_v14 = vpop.f32.mrf.mxu1  ;;  %v841_v6 = vmul.f32 %v2363_v44, %v2363_v44 }
 0x156   :  { %v2604_v2 = vpop.f32.mrf.mxu0 }
 0x157   :  { %4449 = vst [vmem:[#allocation39_spill] sm:$0xff] %v2604_v2  ;;  %v736_v57 = vadd.f32 %v735_v55, %v2604_v2  ;;  %v838_v9 = vmul.f32 %v2604_v2, %v2604_v2 }
 0x159   :  { %v737_v37 = vadd.f32 %v736_v57, %v2343_v36  ;;  %v933_v49 = vadd.f32 %v932_v30, %v838_v9  ;;  %v842_v57 = vmul.f32 %v2373_v48, %v2373_v48  ;;  %v843_v36 = vmul.f32 %v2383_v52, %v2383_v52 }
 0x15b   :  { %v738_v61 = vadd.f32 %v737_v37, %v2353_v40  ;;  %v934_v23 = vadd.f32 %v933_v49, %v839_v19  ;;  %v2630_v49 = vpop.f32.mrf.mxu3  ;;  %v844_v40 = vmul.f32 %v2393_v56, %v2393_v56 }
 0x15d   :  { %v739_v55 = vadd.f32 %v738_v61, %v2363_v44  ;;  %v935_v2 = vadd.f32 %v934_v23, %v840_v38  ;;  %v2635_v23 = vpop.f32.mrf.mxu2 }
 0x15e   :  { %4450 = vst [vmem:[#allocation40_spill] sm:$0xff] %v2635_v23 }
 0x15f   :  { %v740_v30 = vadd.f32 %v739_v55, %v2373_v48  ;;  %v936_v9 = vadd.f32 %v935_v2, %v841_v6  ;;  %v845_v55 = vmul.f32 %v2408_v62, %v2408_v62  ;;  %v2640_v48 = vpop.f32.mrf.mxu1 }
 0x161   :  { %v741_v37 = vadd.f32 %v740_v30, %v2383_v52  ;;  %v937_v19 = vadd.f32 %v936_v9, %v842_v57  ;;  %v846_v57 = vmul.f32 %v2420_v3, %v2420_v3 }
 0x163   :  { %v742_v61 = vadd.f32 %v741_v37, %v2393_v56  ;;  %v938_v38 = vadd.f32 %v937_v19, %v843_v36  ;;  %v847_v37 = vmul.f32 %v2428_v7, %v2428_v7  ;;  %v848_v56 = vmul.f32 %v2442_v13, %v2442_v13 }
 0x165   :  { %v743_v2 = vadd.f32 %v742_v61, %v2408_v62  ;;  %v939_v6 = vadd.f32 %v938_v38, %v844_v40  ;;  %v2651_v61 = vpop.f32.mrf.mxu3  ;;  %v849_v38 = vmul.f32 %v2454_v18, %v2454_v18 }
 0x166   :  { %4451 = vst [vmem:[#allocation41_spill] sm:$0xff] %v2651_v61 }
 0x167   :  { %v744_v30 = vadd.f32 %v743_v2, %v2420_v3  ;;  %v940_v9 = vadd.f32 %v939_v6, %v845_v55  ;;  %v2656_v6 = vpop.f32.mrf.mxu2 }
 0x169   :  { %v745_v36 = vadd.f32 %v744_v30, %v2428_v7  ;;  %v941_v19 = vadd.f32 %v940_v9, %v846_v57  ;;  %v850_v30 = vmul.f32 %v2462_v22, %v2462_v22  ;;  %v2661_v7 = vpop.f32.mrf.mxu1 }
 0x16a   :  { %4452 = vst [vmem:[#allocation42_spill] sm:$0xff] %v2661_v7 }
 0x16b   :  { %v942_v52 = vadd.f32 %v941_v19, %v847_v37  ;;  %v746_v40 = vadd.f32 %v745_v36, %v2442_v13  ;;  %v851_v37 = vmul.f32 %v2475_v28, %v2475_v28 }
 0x16d   :  { %v747_v2 = vadd.f32 %v746_v40, %v2454_v18  ;;  %v943_v55 = vadd.f32 %v942_v52, %v848_v56  ;;  %v852_v40 = vmul.f32 %v2485_v34, %v2485_v34  ;;  %v853_v18 = vmul.f32 %v2498_v46, %v2498_v46 }
 0x16f   :  { %v748_v57 = vadd.f32 %v747_v2, %v2462_v22  ;;  %v944_v9 = vadd.f32 %v943_v55, %v849_v38  ;;  %v2672_v55 = vpop.f32.mrf.mxu3  ;;  %v854_v22 = vmul.f32 %v2527_v54, %v2527_v54 }
 0x171   :  { %v749_v36 = vadd.f32 %v748_v57, %v2475_v28  ;;  %v945_v19 = vadd.f32 %v944_v9, %v850_v30  ;;  %v2677_v9 = vpop.f32.mrf.mxu2 }
 0x172   :  { %4453 = vst [vmem:[#allocation43_spill] sm:$0xff] %v2677_v9 }
 0x173   :  { %v750_v52 = vadd.f32 %v749_v36, %v2485_v34  ;;  %v946_v56 = vadd.f32 %v945_v19, %v851_v37  ;;  %v855_v36 = vmul.f32 %v2552_v1, %v2552_v1  ;;  %v2682_v34 = vpop.f32.mrf.mxu1 }
 0x174   :  { %4454 = vst [vmem:[#allocation44_spill] sm:$0xff] %v2682_v34 }
 0x175   :  { %v751_v2 = vadd.f32 %v750_v52, %v2498_v46  ;;  %v947_v38 = vadd.f32 %v946_v56, %v852_v40  ;;  %v856_v40 = vmul.f32 %v2575_v17, %v2575_v17 }
 0x177   :  { %v752_v57 = vadd.f32 %v751_v2, %v2527_v54  ;;  %v948_v30 = vadd.f32 %v947_v38, %v853_v18  ;;  %v857_v18 = vmul.f32 %v2598_v50, %v2598_v50 }
 0x179   :  { %v753_v37 = vadd.f32 %v752_v57, %v2552_v1  ;;  %v949_v19 = vadd.f32 %v948_v30, %v854_v22  ;;  %v858_v22 = vmul.f32 %v2619_v14, %v2619_v14  ;;  %v2693_v57 = vpop.f32.mrf.mxu3 }
 0x17b   :  { %v754_v52 = vadd.f32 %v753_v37, %v2575_v17  ;;  %v950_v56 = vadd.f32 %v949_v19, %v855_v36  ;;  %v859_v36 = vmul.f32 %v2640_v48, %v2640_v48  ;;  %v2698_v37 = vpop.f32.mrf.mxu2 }
 0x17d   :  { %v755_v46 = vadd.f32 %v754_v52, %v2598_v50  ;;  %v951_v2 = vadd.f32 %v950_v56, %v856_v40  ;;  %v860_v40 = vmul.f32 %v2661_v7, %v2661_v7 }
 0x17f   :  { %v952_v38 = vadd.f32 %v951_v2, %v857_v18  ;;  %v756_v54 = vadd.f32 %v755_v46, %v2619_v14  ;;  %v2703_v46 = vpop.f32.mrf.mxu1  ;;  %v861_v2 = vmul.f32 %v2682_v34, %v2682_v34 }
 0x180   :  { %4455 = vst [vmem:[#allocation45_spill] sm:$0xff] %v2703_v46 }
 0x181   :  { %v953_v30 = vadd.f32 %v952_v38, %v858_v22  ;;  %v757_v1 = vadd.f32 %v756_v54, %v2640_v48  ;;  %v862_v22 = vmul.f32 %v2703_v46, %v2703_v46 }
 0x183   :  { %v954_v19 = vadd.f32 %v953_v30, %v859_v36  ;;  %v758_v52 = vadd.f32 %v757_v1, %v2661_v7  ;;  %v863_v1 = vmul.f32 %v2403_v60, %v2403_v60  ;;  %v2714_v7 = vpop.f32.mrf.mxu3 }
 0x184   :  { %4456 = vst [vmem:[#allocation46_spill] sm:$0xff] %v2714_v7 }
 0x185   :  { %v955_v56 = vadd.f32 %v954_v19, %v860_v40  ;;  %v759_v18 = vadd.f32 %v758_v52, %v2682_v34  ;;  %v864_v19 = vmul.f32 %v2412_v0, %v2412_v0 }
 0x187   :  { %v956_v54 = vadd.f32 %v955_v56, %v861_v2  ;;  %v760_v38 = vadd.f32 %v759_v18, %v2703_v46  ;;  %v2719_v56 = vpop.f32.mrf.mxu2  ;;  %v865_v18 = vmul.f32 %v2424_v5, %v2424_v5 }
 0x189   :  { %v761_v30 = vadd.f32 %v760_v38, %v2403_v60  ;;  %v957_v36 = vadd.f32 %v956_v54, %v862_v22  ;;  %v866_v38 = vmul.f32 %v2430_v8, %v2430_v8  ;;  %v867_v60 = vmul.f32 %v2440_v12, %v2440_v12 }
 0x18b   :  { %v762_v52 = vadd.f32 %v761_v30, %v2412_v0  ;;  %v958_v40 = vadd.f32 %v957_v36, %v863_v1  ;;  %v868_v36 = vmul.f32 %v2446_v15, %v2446_v15 }
 0x18d   :  { %v763_v2 = vadd.f32 %v762_v52, %v2424_v5  ;;  %v959_v46 = vadd.f32 %v958_v40, %v864_v19  ;;  %v2733_v52 = vpop.f32.mrf.mxu3  ;;  %v869_v19 = vmul.f32 %v2460_v21, %v2460_v21 }
 0x18e   :  { %4457 = vst [vmem:[#allocation47_spill] sm:$0xff] %v2733_v52 }
 0x18f   :  { %v764_v54 = vadd.f32 %v763_v2, %v2430_v8  ;;  %v960_v22 = vadd.f32 %v959_v46, %v865_v18  ;;  %v2738_v18 = vpop.f32.mrf.mxu2  ;;  %v870_v2 = vmul.f32 %v2471_v26, %v2471_v26 }
 0x191   :  { %v765_v30 = vadd.f32 %v764_v54, %v2440_v12  ;;  %v961_v1 = vadd.f32 %v960_v22, %v866_v38  ;;  %v871_v22 = vmul.f32 %v2481_v31, %v2481_v31 }
 0x193   :  { %v766_v0 = vadd.f32 %v765_v30, %v2446_v15  ;;  %v962_v34 = vadd.f32 %v961_v1, %v867_v60  ;;  %v872_v1 = vmul.f32 %v2494_v42, %v2494_v42 }
 0x195   :  { %v767_v40 = vadd.f32 %v766_v0, %v2460_v21  ;;  %v963_v46 = vadd.f32 %v962_v34, %v868_v36  ;;  %v873_v34 = vmul.f32 %v2522_v45, %v2522_v45 }
 0x197   :  { %v768_v38 = vadd.f32 %v767_v40, %v2471_v26  ;;  %v964_v54 = vadd.f32 %v963_v46, %v869_v19  ;;  %v2752_v40 = vpop.f32.mrf.mxu3  ;;  %v874_v19 = vmul.f32 %v2545_v53, %v2545_v53 }
 0x198   :  { %4458 = vst [vmem:[#allocation48_spill] sm:$0xff] %v2752_v40 }
 0x199   :  { %v769_v60 = vadd.f32 %v768_v38, %v2481_v31  ;;  %v965_v30 = vadd.f32 %v964_v54, %v870_v2  ;;  %v2757_v38 = vpop.f32.mrf.mxu2  ;;  %v875_v54 = vmul.f32 %v2570_v47, %v2570_v47 }
 0x19b   :  { %v966_v15 = vadd.f32 %v965_v30, %v871_v22  ;;  %v770_v0 = vadd.f32 %v769_v60, %v2494_v42  ;;  %v876_v30 = vmul.f32 %v2593_v4, %v2593_v4 }
 0x19d   :  { %v771_v36 = vadd.f32 %v770_v0, %v2522_v45  ;;  %v967_v21 = vadd.f32 %v966_v15, %v872_v1  ;;  %v877_v0 = vmul.f32 %v2614_v63, %v2614_v63 }
 0x19f   :  { %v772_v46 = vadd.f32 %v771_v36, %v2545_v53  ;;  %v968_v2 = vadd.f32 %v967_v21, %v873_v34  ;;  %v878_v34 = vmul.f32 %v2635_v23, %v2635_v23 }
 0x1a1   :  { %v773_v22 = vadd.f32 %v772_v46, %v2570_v47  ;;  %v969_v60 = vadd.f32 %v968_v2, %v874_v19  ;;  %v2771_v46 = vpop.f32.mrf.mxu3  ;;  %v879_v19 = vmul.f32 %v2656_v6, %v2656_v6 }
 0x1a2   :  { %4459 = vst [vmem:[#allocation49_spill] sm:$0xff] %v2771_v46 }
 0x1a3   :  { %v774_v15 = vadd.f32 %v773_v22, %v2593_v4  ;;  %v970_v1 = vadd.f32 %v969_v60, %v875_v54  ;;  %v2776_v22 = vpop.f32.mrf.mxu2 }
 0x1a5   :  { %v775_v36 = vadd.f32 %v774_v15, %v2614_v63  ;;  %v971_v21 = vadd.f32 %v970_v1, %v876_v30  ;;  %v880_v30 = vmul.f32 %v2677_v9, %v2677_v9 }
 0x1a7   :  { %v776_v53 = vadd.f32 %v775_v36, %v2635_v23  ;;  %v972_v45 = vadd.f32 %v971_v21, %v877_v0  ;;  %v881_v0 = vmul.f32 %v2698_v37, %v2698_v37 }
 0x1a9   :  { %v777_v2 = vadd.f32 %v776_v53, %v2656_v6  ;;  %v973_v54 = vadd.f32 %v972_v45, %v878_v34  ;;  %v882_v45 = vmul.f32 %v2719_v56, %v2719_v56 }
 0x1ab   :  { %v778_v60 = vadd.f32 %v777_v2, %v2677_v9  ;;  %v974_v15 = vadd.f32 %v973_v54, %v879_v19  ;;  %v883_v2 = vmul.f32 %v2738_v18, %v2738_v18  ;;  %v2790_v9 = vpop.f32.mrf.mxu3 }
 0x1ac   :  { %4460 = vst [vmem:[#allocation50_spill] sm:$0xff] %v2790_v9 }
 0x1ad   :  { %v975_v1 = vadd.f32 %v974_v15, %v880_v30  ;;  %v779_v36 = vadd.f32 %v778_v60, %v2698_v37  ;;  %v884_v60 = vmul.f32 %v2757_v38, %v2757_v38  ;;  %v2795_v30 = vpop.f32.mrf.mxu2 }
 0x1ae   :  { %4461 = vst [vmem:[#allocation51_spill] sm:$0xff] %v2795_v30 }
 0x1af   :  { %v976_v21 = vadd.f32 %v975_v1, %v881_v0  ;;  %v780_v23 = vadd.f32 %v779_v36, %v2719_v56  ;;  %v885_v36 = vmul.f32 %v2776_v22, %v2776_v22 }
 0x1b1   :  { %v977_v53 = vadd.f32 %v976_v21, %v882_v45  ;;  %v781_v34 = vadd.f32 %v780_v23, %v2738_v18  ;;  %v886_v21 = vmul.f32 %v2795_v30, %v2795_v30  ;;  %v887_v45 = vmul.f32 %v2458_v20, %v2458_v20 }
 0x1b3   :  { %v978_v19 = vadd.f32 %v977_v53, %v883_v2  ;;  %v782_v54 = vadd.f32 %v781_v34, %v2757_v38  ;;  %v888_v2 = vmul.f32 %v2466_v24, %v2466_v24 }
 0x1b5   :  { %v979_v15 = vadd.f32 %v978_v19, %v884_v60  ;;  %v783_v1 = vadd.f32 %v782_v54, %v2776_v22  ;;  %v2809_v60 = vpop.f32.mrf.mxu3 }
 0x1b6   :  { %4462 = vst [vmem:[#allocation52_spill] sm:$0xff] %v2809_v60 }
 0x1b7   :  { %v980_v23 = vadd.f32 %v979_v15, %v885_v36  ;;  %v784_v0 = vadd.f32 %v783_v1, %v2795_v30  ;;  %v889_v15 = vmul.f32 %v2477_v29, %v2477_v29  ;;  %v890_v30 = vmul.f32 %v2483_v33, %v2483_v33 }
 0x1b9   :  { %v785_v53 = vadd.f32 %v784_v0, %v2458_v20  ;;  %v981_v34 = vadd.f32 %v980_v23, %v886_v21  ;;  %v891_v21 = vmul.f32 %v2492_v41, %v2492_v41 }
 0x1bb   :  { %v786_v19 = vadd.f32 %v785_v53, %v2466_v24  ;;  %v982_v54 = vadd.f32 %v981_v34, %v887_v45  ;;  %v892_v34 = vmul.f32 %v2514_v10, %v2514_v10 }
 0x1bd   :  { %v787_v1 = vadd.f32 %v786_v19, %v2477_v29  ;;  %v983_v36 = vadd.f32 %v982_v54, %v888_v2  ;;  %v893_v2 = vmul.f32 %v2540_v25, %v2540_v25 }
 0x1bf   :  { %v788_v0 = vadd.f32 %v787_v1, %v2483_v33  ;;  %v984_v23 = vadd.f32 %v983_v36, %v889_v15  ;;  %v2826_v1 = vpop.f32.mrf.mxu3  ;;  %v894_v15 = vmul.f32 %v2563_v59, %v2563_v59 }
 0x1c0   :  { %4463 = vst [vmem:[#allocation53_spill] sm:$0xff] %v2826_v1 }
 0x1c1   :  { %v789_v53 = vadd.f32 %v788_v0, %v2492_v41  ;;  %v985_v45 = vadd.f32 %v984_v23, %v890_v30  ;;  %v895_v0 = vmul.f32 %v2588_v58, %v2588_v58 }
 0x1c3   :  { %v790_v24 = vadd.f32 %v789_v53, %v2514_v10  ;;  %v986_v20 = vadd.f32 %v985_v45, %v891_v21  ;;  %v896_v53 = vmul.f32 %v2609_v16, %v2609_v16 }
 0x1c5   :  { %v791_v19 = vadd.f32 %v790_v24, %v2540_v25  ;;  %v987_v54 = vadd.f32 %v986_v20, %v892_v34  ;;  %v897_v24 = vmul.f32 %v2630_v49, %v2630_v49 }
 0x1c7   :  { %v792_v36 = vadd.f32 %v791_v19, %v2563_v59  ;;  %v988_v30 = vadd.f32 %v987_v54, %v893_v2  ;;  %v898_v2 = vmul.f32 %v2651_v61, %v2651_v61 }
 0x1c9   :  { %v793_v23 = vadd.f32 %v792_v36, %v2588_v58  ;;  %v989_v21 = vadd.f32 %v988_v30, %v894_v15  ;;  %v2843_v36 = vpop.f32.mrf.mxu3  ;;  %v899_v15 = vmul.f32 %v2672_v55, %v2672_v55 }
 0x1ca   :  { %4464 = vst [vmem:[#allocation54_spill] sm:$0xff] %v2843_v36 }
 0x1cb   :  { %v990_v45 = vadd.f32 %v989_v21, %v895_v0  ;;  %v794_v20 = vadd.f32 %v793_v23, %v2609_v16  ;;  %v900_v23 = vmul.f32 %v2693_v57, %v2693_v57 }
 0x1cd   :  { %v795_v34 = vadd.f32 %v794_v20, %v2630_v49  ;;  %v991_v25 = vadd.f32 %v990_v45, %v896_v53  ;;  %v901_v45 = vmul.f32 %v2714_v7, %v2714_v7 }
 0x1cf   :  { %v796_v19 = vadd.f32 %v795_v34, %v2651_v61  ;;  %v992_v54 = vadd.f32 %v991_v25, %v897_v24  ;;  %v902_v24 = vmul.f32 %v2733_v52, %v2733_v52 }
 0x1d1   :  { %v797_v30 = vadd.f32 %v796_v19, %v2672_v55  ;;  %v993_v0 = vadd.f32 %v992_v54, %v898_v2  ;;  %v903_v2 = vmul.f32 %v2752_v40, %v2752_v40 }
 0x1d3   :  { %v798_v21 = vadd.f32 %v797_v30, %v2693_v57  ;;  %v994_v53 = vadd.f32 %v993_v0, %v899_v15  ;;  %v2860_v30 = vpop.f32.mrf.mxu3  ;;  %v904_v0 = vmul.f32 %v2771_v46, %v2771_v46 }
 0x1d4   :  { %4465 = vst [vmem:[#allocation55_spill] sm:$0xff] %v2860_v30 }
 0x1d5   :  { %v799_v20 = vadd.f32 %v798_v21, %v2714_v7  ;;  %v995_v25 = vadd.f32 %v994_v53, %v900_v23 }
 0x1d7   :  { %v800_v34 = vadd.f32 %v799_v20, %v2733_v52  ;;  %v996_v61 = vadd.f32 %v995_v25, %v901_v45  ;;  %v905_v45 = vmul.f32 %v2790_v9, %v2790_v9 }
 0x1d9   :  { %v801_v19 = vadd.f32 %v800_v34, %v2752_v40  ;;  %v997_v54 = vadd.f32 %v996_v61, %v902_v24  ;;  %v906_v61 = vmul.f32 %v2809_v60, %v2809_v60 }
 0x1db   :  { %v802_v15 = vadd.f32 %v801_v19, %v2771_v46  ;;  %v998_v23 = vadd.f32 %v997_v54, %v903_v2  ;;  %v907_v19 = vmul.f32 %v2826_v1, %v2826_v1  ;;  %v908_v54 = vmul.f32 %v2843_v36, %v2843_v36 }
 0x1dd   :  { %v999_v21 = vadd.f32 %v998_v23, %v904_v0  ;;  %v803_v53 = vadd.f32 %v802_v15, %v2790_v9  ;;  %v2877_v15 = vpop.f32.mrf.mxu3 }
 0x1de   :  { %4466 = vst [vmem:[#allocation56_spill] sm:$0xff] %v2877_v15 }
 0x1df   :  { %v1000_v20 = vadd.f32 %v999_v21, %v905_v45  ;;  %v804_v25 = vadd.f32 %v803_v53, %v2809_v60  ;;  %v909_v21 = vmul.f32 %v2860_v30, %v2860_v30 }
 0x1e1   :  { %v1001_v24 = vadd.f32 %v1000_v20, %v906_v61  ;;  %v805_v34 = vadd.f32 %v804_v25, %v2826_v1  ;;  %v910_v20 = vmul.f32 %v2877_v15, %v2877_v15 }
 0x1e3   :  { %v1002_v46 = vadd.f32 %v1001_v24, %v907_v19  ;;  %v806_v2 = vadd.f32 %v805_v34, %v2843_v36 }
 0x1e5   :  { %v1003_v0 = vadd.f32 %v1002_v46, %v908_v54  ;;  %v807_v23 = vadd.f32 %v806_v2, %v2860_v30 }
 0x1e7   :  { %v1004_v53 = vadd.f32 %v1003_v0, %v909_v21  ;;  %v808_v45 = vadd.f32 %v807_v23, %v2877_v15 }
 0x1e9   :  { %v809_v25 = vrot.slane %v808_v45, 4  ;;  %v1005_v61 = vadd.f32 %v1004_v53, %v910_v20 }
 0x1eb   :  { %v810_v24 = vadd.f32 %v809_v25, %v808_v45  ;;  %v1006_v34 = vrot.slane %v1005_v61, 4 }
 0x1ed   :  { %v811_v19 = vrot.slane %v810_v24, 2  ;;  %v1007_v36 = vadd.f32 %v1006_v34, %v1005_v61  ;;  %v4467_v34 = vld [vmem:[#allocation4_spill] sm:$0xff] }
 0x1ef   :  { %v812_v1 = vadd.f32 %v811_v19, %v810_v24  ;;  %v1008_v60 = vrot.slane %v1007_v36, 2  ;;  %v4484_v24 = vld [vmem:[#allocation34_spill] sm:$0xff] }
 0x1f1   :  { %v813_v46 = vrot.slane %v812_v1, 1  ;;  %v1009_v54 = vadd.f32 %v1008_v60, %v1007_v36 }
 0x1f3   :  { %v814_v2 = vadd.f32 %v813_v46, %v812_v1  ;;  %v1010_v9 = vrot.slane %v1009_v54, 1  ;;  %v4468_v46 = vld [vmem:[#allocation5_spill] sm:$0xff] }
 0x1f5   :  { %v1011_v40 = vadd.f32 %v1010_v9, %v1009_v54  ;;  %v1012_v30 = vmul.f32 0.0013020834, %v814_v2  ;;  %v1017_v9 = vld [vmem:[%s4274_s2] sm:$0x1]  ;;  %v4469_v2 = vld [vmem:[#allocation8_spill] sm:$0xff] }
 0x1f7   :  { %v1013_v0 = vmul.f32 0.0013020834, %v1011_v40  ;;  %v1014_v21 = vmul.f32 %v1012_v30, %v1012_v30 }
 0x1f9   :  { %v1015_v23 = vsub.f32 %v1013_v0, %v1014_v21  ;;  %v4470_v0 = vld [vmem:[#allocation10_spill] sm:$0xff]  ;;  %v4471_v21 = vld [vmem:[#allocation12_spill] sm:$0xff] }
 0x1fb   :  { %v1016_v52 = vmax.f32 %v1015_v23, 0.0 }
 0x1fd   :  { %v1018_v7 = vadd.f32 1e-05, %v1016_v52  ;;  %v2895_v52 = vld [vmem:[%s4275_s3] sm:$0x1] }
 0x1ff   :  { %2210 = vrsqrt.f32 %v1018_v7  ;;  %vm1025_vm1 = vweird.f32 %v1018_v7 }
 0x205   :  { %v2211_v15 = vpop.eup %2210 }
 0x206   :  { %v1020_v53 = vmul.f32 %v2211_v15, %v1018_v7  ;;  %vm1026_vm0 = vweird.f32 %v2211_v15 }
 0x207   :  { %vm1027_vm2 = vmor %vm1025_vm1, %vm1026_vm0 }
 0x208   :  { %v1021_v45 = vmul.f32 %v2211_v15, %v1020_v53  ;;  %v4472_v53 = vld [vmem:[#allocation14_spill] sm:$0xff] }
 0x20a   :  { %v1022_v20 = vmul.f32 0.5, %v1021_v45 }
 0x20c   :  { %v1023_v25 = vsub.f32 1.5, %v1022_v20  ;;  %v4473_v20 = vld [vmem:[#allocation15_spill] sm:$0xff] }
 0x20e   :  { %v1024_v61 = vmul.f32 %v2211_v15, %v1023_v25 }
 0x210   :  { %v1028_v60 = vsel %vm1027_vm2, %v2211_v15, %v1024_v61  ;;  %v4474_v61 = vld [vmem:[#allocation17_spill] sm:$0xff] }
 0x211   :  { %v1029_v40 = vmul.f32 %v1028_v60, %v1017_v9  ;;  %v4475_v60 = vld [vmem:[#allocation20_spill] sm:$0xff] }
 0x213   :  { %v2888_v1 = vmul.f32 %v1029_v40, %v1012_v30  ;;  %v2890_v36 = vperm.slane %v1029_v40, 0 }
 0x215   :  { %v2901_v7 = vmul.f32 %v2890_v36, %v2333_v32  ;;  %v2905_v15 = vmul.f32 %v2890_v36, %v2341_v35  ;;  %v2909_v30 = vmul.f32 %v2890_v36, %v2351_v39  ;;  %v2913_v19 = vmul.f32 %v2890_v36, %v4467_v34  ;;  %v4476_v34 = vld [vmem:[#allocation24_spill] sm:$0xff] }
 0x216   :  { %v2917_v54 = vmul.f32 %v2890_v36, %v4468_v46  ;;  %v2921_v32 = vmul.f32 %v2890_v36, %v2381_v51  ;;  %v2925_v35 = vmul.f32 %v2890_v36, %v4469_v2  ;;  %v2929_v39 = vmul.f32 %v2890_v36, %v4470_v0  ;;  %v4477_v2 = vld [vmem:[#allocation26_spill] sm:$0xff] }
 0x217   :  { %v2933_v23 = vmul.f32 %v2890_v36, %v4471_v21  ;;  %v2937_v45 = vmul.f32 %v2890_v36, %v4472_v53  ;;  %v2941_v51 = vmul.f32 %v2890_v36, %v4473_v20  ;;  %v2945_v25 = vmul.f32 %v2890_v36, %v2438_v11  ;;  %v4479_v21 = vld [vmem:[#allocation27_spill] sm:$0xff]  ;;  %v4480_v53 = vld [vmem:[#allocation29_spill] sm:$0xff] }
 0x218   :  { %v2949_v9 = vmul.f32 %v2890_v36, %v4474_v61  ;;  %v2953_v40 = vmul.f32 %v2890_v36, %v4475_v60  ;;  %v2957_v46 = vmul.f32 %v2890_v36, %v4476_v34  ;;  %v2961_v0 = vmul.f32 %v2890_v36, %v4477_v2  ;;  %v4482_v61 = vld [vmem:[#allocation31_spill] sm:$0xff] }
 0x219   :  { %v2965_v11 = vmul.f32 %v2890_v36, %v4479_v21  ;;  %v2969_v20 = vmul.f32 %v2890_v36, %v4480_v53  ;;  %v2973_v60 = vmul.f32 %v2890_v36, %v4482_v61  ;;  %v2977_v34 = vmul.f32 %v2890_v36, %v4484_v24 }
 0x21a   :  { %4478 = vst [vmem:[#allocation4_spill] sm:$0xff] %v2961_v0  ;;  %v2981_v2 = vmul.f32 %v2890_v36, %v2550_v43  ;;  %v4486_v0 = vld [vmem:[#allocation38_spill] sm:$0xff]  ;;  %v2989_v53 = vmul.f32 %v2890_v36, %v2586_v27 }
 0x21b   :  { %4481 = vst [vmem:[#allocation5_spill] sm:$0xff] %v2969_v20  ;;  %v2985_v21 = vmul.f32 %v2890_v36, %v4486_v0  ;;  %v4489_v20 = vld [vmem:[#allocation39_spill] sm:$0xff]  ;;  %v3005_v0 = vmul.f32 %v2890_v36, %v2363_v44  ;;  %v3025_v44 = vmul.f32 %v2890_v36, %v2420_v3  ;;  %v3045_v3 = vmul.f32 %v2890_v36, %v2475_v28 }
 0x21c   :  { %4483 = vst [vmem:[#allocation8_spill] sm:$0xff] %v2973_v60  ;;  %v2993_v61 = vmul.f32 %v2890_v36, %v4489_v20  ;;  %v4491_v60 = vld [vmem:[#allocation2_spill] sm:$0xff]  ;;  %v3065_v28 = vmul.f32 %v2890_v36, %v2575_v17 }
 0x21d   :  { %4485 = vst [vmem:[#allocation10_spill] sm:$0xff] %v2977_v34  ;;  %v2997_v24 = vmul.f32 %v2890_v36, %v4491_v60  ;;  %v4492_v34 = vld [vmem:[#allocation3_spill] sm:$0xff] }
 0x21e   :  { %4487 = vst [vmem:[#allocation12_spill] sm:$0xff] %v2985_v21  ;;  %v3001_v43 = vmul.f32 %v2890_v36, %v4492_v34  ;;  %v4494_v21 = vld [vmem:[#allocation6_spill] sm:$0xff]  ;;  %v3021_v34 = vmul.f32 %v2890_v36, %v2408_v62 }
 0x21f   :  { %4488 = vst [vmem:[#allocation14_spill] sm:$0xff] %v2989_v53  ;;  %v3009_v27 = vmul.f32 %v2890_v36, %v4494_v21  ;;  %v4495_v53 = vld [vmem:[#allocation7_spill] sm:$0xff] }
 0x220   :  { %4490 = vst [vmem:[#allocation15_spill] sm:$0xff] %v2993_v61  ;;  %v3013_v20 = vmul.f32 %v2890_v36, %v4495_v53  ;;  %v4497_v61 = vld [vmem:[#allocation9_spill] sm:$0xff]  ;;  %v3033_v53 = vmul.f32 %v2890_v36, %v2442_v13 }
 0x221   :  { %4493 = vst [vmem:[#allocation17_spill] sm:$0xff] %v3005_v0  ;;  %v3017_v60 = vmul.f32 %v2890_v36, %v4497_v61  ;;  %v4500_v0 = vld [vmem:[#allocation16_spill] sm:$0xff] }
 0x222   :  { %4496 = vst [vmem:[#allocation20_spill] sm:$0xff] %v3013_v20  ;;  %v3029_v21 = vmul.f32 %v2890_v36, %v4500_v0  ;;  %v4503_v20 = vld [vmem:[#allocation19_spill] sm:$0xff] }
 0x223   :  { %4498 = vst [vmem:[#allocation24_spill] sm:$0xff] %v3017_v60  ;;  %v3037_v61 = vmul.f32 %v2890_v36, %v4503_v20  ;;  %v4505_v60 = vld [vmem:[#allocation23_spill] sm:$0xff] }
 0x224   :  { %4499 = vst [vmem:[#allocation26_spill] sm:$0xff] %v3025_v44  ;;  %v3041_v62 = vmul.f32 %v2890_v36, %v4505_v60  ;;  %v4506_v44 = vld [vmem:[#allocation28_spill] sm:$0xff] }
 0x225   :  { %4501 = vst [vmem:[#allocation27_spill] sm:$0xff] %v3029_v21  ;;  %v3049_v0 = vmul.f32 %v2890_v36, %v4506_v44  ;;  %v4507_v21 = vld [vmem:[#allocation30_spill] sm:$0xff]  ;;  %v3069_v44 = vmul.f32 %v2890_v36, %v2598_v50 }
 0x226   :  { %4502 = vst [vmem:[#allocation29_spill] sm:$0xff] %v3033_v53  ;;  %v3053_v13 = vmul.f32 %v2890_v36, %v4507_v21  ;;  %v4508_v53 = vld [vmem:[#allocation33_spill] sm:$0xff]  ;;  %v3073_v21 = vmul.f32 %v2890_v36, %v2619_v14 }
 0x227   :  { %4504 = vst [vmem:[#allocation31_spill] sm:$0xff] %v3037_v61  ;;  %v3057_v20 = vmul.f32 %v2890_v36, %v4508_v53  ;;  %v4510_v61 = vld [vmem:[#allocation37_spill] sm:$0xff]  ;;  %v3077_v53 = vmul.f32 %v2890_v36, %v2640_v48 }
 0x228   :  { %v3061_v60 = vmul.f32 %v2890_v36, %v4510_v61  ;;  %4512 = vst [vmem:[#allocation39_spill] sm:$0xff] %v3065_v28  ;;  %v4517_v28 = vld [vmem:[#allocation45_spill] sm:$0xff] }
 0x229   :  { %4509 = vst [vmem:[#allocation34_spill] sm:$0xff] %v3057_v20  ;;  %v4515_v20 = vld [vmem:[#allocation42_spill] sm:$0xff]  ;;  %v3089_v50 = vmul.f32 %v2890_v36, %v4517_v28  ;;  %v3109_v28 = vmul.f32 %v2890_v36, %v2440_v12  ;;  %v3129_v12 = vmul.f32 %v2890_v36, %v2494_v42  ;;  %v3149_v42 = vmul.f32 %v2890_v36, %v2614_v63 }
 0x22a   :  { %4511 = vst [vmem:[#allocation38_spill] sm:$0xff] %v3061_v60  ;;  %v3081_v61 = vmul.f32 %v2890_v36, %v4515_v20  ;;  %v4516_v60 = vld [vmem:[#allocation44_spill] sm:$0xff]  ;;  %v3101_v20 = vmul.f32 %v2890_v36, %v2424_v5  ;;  %v3121_v5 = vmul.f32 %v2890_v36, %v2471_v26  ;;  %v3141_v26 = vmul.f32 %v2890_v36, %v2570_v47 }
 0x22b   :  { %4513 = vst [vmem:[#allocation2_spill] sm:$0xff] %v3069_v44  ;;  %v3085_v17 = vmul.f32 %v2890_v36, %v4516_v60  ;;  %v4519_v44 = vld [vmem:[#allocation11_spill] sm:$0xff]  ;;  %v3105_v60 = vmul.f32 %v2890_v36, %v2430_v8  ;;  %v3125_v8 = vmul.f32 %v2890_v36, %v2481_v31  ;;  %v3145_v31 = vmul.f32 %v2890_v36, %v2593_v4 }
 0x22c   :  { %4514 = vst [vmem:[#allocation3_spill] sm:$0xff] %v3073_v21  ;;  %v3093_v14 = vmul.f32 %v2890_v36, %v4519_v44  ;;  %v4521_v21 = vld [vmem:[#allocation13_spill] sm:$0xff]  ;;  %v3165_v4 = vmul.f32 %v2890_v36, %v2698_v37  ;;  %v3169_v63 = vmul.f32 %v2890_v36, %v2719_v56 }
 0x22d   :  { %4518 = vst [vmem:[#allocation6_spill] sm:$0xff] %v3089_v50  ;;  %v3097_v48 = vmul.f32 %v2890_v36, %v4521_v21  ;;  %v4523_v50 = vld [vmem:[#allocation18_spill] sm:$0xff] }
 0x22e   :  { %4520 = vst [vmem:[#allocation7_spill] sm:$0xff] %v3093_v14  ;;  %v3113_v44 = vmul.f32 %v2890_v36, %v4523_v50  ;;  %v4525_v14 = vld [vmem:[#allocation22_spill] sm:$0xff] }
 0x22f   :  { %4522 = vst [vmem:[#allocation9_spill] sm:$0xff] %v3109_v28  ;;  %v3117_v21 = vmul.f32 %v2890_v36, %v4525_v14  ;;  %v4527_v28 = vld [vmem:[#allocation32_spill] sm:$0xff] }
 0x230   :  { %4524 = vst [vmem:[#allocation16_spill] sm:$0xff] %v3113_v44  ;;  %v3133_v50 = vmul.f32 %v2890_v36, %v4527_v28  ;;  %v4528_v44 = vld [vmem:[#allocation36_spill] sm:$0xff] }
 0x231   :  { %4526 = vst [vmem:[#allocation19_spill] sm:$0xff] %v3129_v12  ;;  %v3137_v14 = vmul.f32 %v2890_v36, %v4528_v44  ;;  %v4530_v12 = vld [vmem:[#allocation40_spill] sm:$0xff]  ;;  %v3157_v44 = vmul.f32 %v2890_v36, %v2656_v6  ;;  %v3177_v6 = vmul.f32 %v2890_v36, %v2757_v38  ;;  %v3197_v38 = vmul.f32 %v2890_v36, %v2477_v29 }
 0x232   :  { %v3153_v28 = vmul.f32 %v2890_v36, %v4530_v12  ;;  %4533 = vst [vmem:[#allocation30_spill] sm:$0xff] %v3165_v4  ;;  %v3173_v12 = vmul.f32 %v2890_v36, %v2738_v18  ;;  %v4536_v4 = vld [vmem:[#allocation21_spill] sm:$0xff]  ;;  %v3217_v29 = vmul.f32 %v2890_v36, %v2563_v59  ;;  %v4546_v59 = vsub.f32 %v2895_v52, %v2888_v1 }
 0x233   :  { %4529 = vst [vmem:[#allocation23_spill] sm:$0xff] %v3137_v14  ;;  %v4531_v14 = vld [vmem:[#allocation43_spill] sm:$0xff]  ;;  %v3189_v56 = vmul.f32 %v2890_v36, %v4536_v4  ;;  %v3209_v4 = vmul.f32 %v2890_v36, %v2514_v10  ;;  %v3229_v10 = vmul.f32 %v2890_v36, %v2630_v49  ;;  %v4554_v52 = vld [vmem:[#allocation49_spill] sm:$0xff] }
 0x234   :  { %v3161_v47 = vmul.f32 %v2890_v36, %v4531_v14  ;;  %4534 = vst [vmem:[#allocation33_spill] sm:$0xff] %v3169_v63  ;;  %v3181_v14 = vmul.f32 %v2890_v36, %v2776_v22  ;;  %v4538_v63 = vld [vmem:[#allocation25_spill] sm:$0xff]  ;;  %v3201_v22 = vmul.f32 %v2890_v36, %v2483_v33  ;;  %v3221_v33 = vmul.f32 %v2890_v36, %v2588_v58 }
 0x235   :  { %4537 = vst [vmem:[#allocation37_spill] sm:$0xff] %v3189_v56  ;;  %v3193_v18 = vmul.f32 %v2890_v36, %v4538_v63  ;;  %v4540_v56 = vld [vmem:[#allocation35_spill] sm:$0xff]  ;;  %v3242_v58 = vmul.f32 %v2890_v36, %v2672_v55  ;;  %v3262_v55 = vmul.f32 %v2890_v36, %v4554_v52 }
 0x236   :  { %4532 = vst [vmem:[#allocation28_spill] sm:$0xff] %v3161_v47  ;;  %v4535_v47 = vld [vmem:[#allocation51_spill] sm:$0xff]  ;;  %v3213_v63 = vmul.f32 %v2890_v36, %v4540_v56 }
 0x237   :  { %v3185_v37 = vmul.f32 %v2890_v36, %v4535_v47  ;;  %v3205_v47 = vmul.f32 %v2890_v36, %v2492_v41  ;;  %4539 = vst [vmem:[#allocation42_spill] sm:$0xff] %v3209_v4  ;;  %v3225_v41 = vmul.f32 %v2890_v36, %v2609_v16  ;;  %v4544_v4 = vld [vmem:[#allocation41_spill] sm:$0xff]  ;;  %v3246_v16 = vmul.f32 %v2890_v36, %v2693_v57 }
 0x238   :  { %4541 = vst [vmem:[#allocation44_spill] sm:$0xff] %v3217_v29  ;;  %v3233_v56 = vmul.f32 %v2890_v36, %v4544_v4  ;;  %v3238_v29 = vperm.slane %v4546_v59, 0  ;;  %v4556_v59 = vld [vmem:[#allocation50_spill] sm:$0xff] }
 0x239   :  { %4542 = vst [vmem:[#allocation45_spill] sm:$0xff] %v3225_v41  ;;  %v4548_v41 = vld [vmem:[#allocation46_spill] sm:$0xff]  ;;  %v3266_v57 = vmul.f32 %v2890_v36, %v4556_v59 }
 0x23a   :  { %4543 = vst [vmem:[#allocation11_spill] sm:$0xff] %v3229_v10  ;;  %v3250_v49 = vmul.f32 %v2890_v36, %v4548_v41  ;;  %v4550_v10 = vld [vmem:[#allocation47_spill] sm:$0xff] }
 0x23b   :  { %4545 = vst [vmem:[#allocation13_spill] sm:$0xff] %v3233_v56  ;;  %v3254_v4 = vmul.f32 %v2890_v36, %v4550_v10  ;;  %v4552_v56 = vld [vmem:[#allocation48_spill] sm:$0xff] }
 0x23c   :  { %4547 = vst [vmem:[#allocation18_spill] sm:$0xff] %v3246_v16  ;;  %v3258_v1 = vmul.f32 %v2890_v36, %v4552_v56  ;;  %v4557_v16 = vld [vmem:[#allocation52_spill] sm:$0xff] }
 0x23d   :  { %4549 = vst [vmem:[#allocation22_spill] sm:$0xff] %v3250_v49  ;;  %v3270_v41 = vmul.f32 %v2890_v36, %v4557_v16  ;;  %v4558_v49 = vld [vmem:[#allocation53_spill] sm:$0xff]  ;;  %v3290_v16 = vadd.f32 %v3238_v29, %v2901_v7  ;;  %v3310_v7 = vadd.f32 %v3238_v29, %v2921_v32  ;;  %v3330_v32 = vadd.f32 %v3238_v29, %v2941_v51 }
 0x23e   :  { %4551 = vst [vmem:[#allocation32_spill] sm:$0xff] %v3254_v4  ;;  %v3274_v10 = vmul.f32 %v2890_v36, %v4558_v49  ;;  %v4559_v4 = vld [vmem:[#allocation54_spill] sm:$0xff]  ;;  %v3294_v49 = vadd.f32 %v3238_v29, %v2905_v15  ;;  %v3314_v15 = vadd.f32 %v3238_v29, %v2925_v35  ;;  %v3334_v35 = vadd.f32 %v3238_v29, %v2945_v25 }
 0x23f   :  { %4553 = vst [vmem:[#allocation36_spill] sm:$0xff] %v3258_v1  ;;  %v3278_v56 = vmul.f32 %v2890_v36, %v4559_v4  ;;  %v4560_v1 = vld [vmem:[#allocation55_spill] sm:$0xff]  ;;  %v3298_v4 = vadd.f32 %v3238_v29, %v2909_v30  ;;  %v3318_v30 = vadd.f32 %v3238_v29, %v2929_v39  ;;  %v3338_v39 = vadd.f32 %v3238_v29, %v2949_v9 }
 0x240   :  { %4555 = vst [vmem:[#allocation40_spill] sm:$0xff] %v3262_v55  ;;  %v3282_v52 = vmul.f32 %v2890_v36, %v4560_v1  ;;  %v4561_v55 = vld [vmem:[#allocation56_spill] sm:$0xff]  ;;  %v3302_v1 = vadd.f32 %v3238_v29, %v2913_v19  ;;  %v3322_v19 = vadd.f32 %v3238_v29, %v2933_v23  ;;  %v3342_v23 = vadd.f32 %v3238_v29, %v2953_v40 }
 0x241   :  { %v3286_v59 = vmul.f32 %v2890_v36, %v4561_v55  ;;  %v3306_v36 = vadd.f32 %v3238_v29, %v2917_v54  ;;  %v3326_v54 = vadd.f32 %v3238_v29, %v2937_v45  ;;  %4562 = vst [vmem:[#allocation43_spill] sm:$0xff] %v3334_v35  ;;  %v3346_v45 = vadd.f32 %v3238_v29, %v2957_v46  ;;  %v4565_v55 = vld [vmem:[#allocation4_spill] sm:$0xff]  ;;  %v4568_v35 = vld [vmem:[#allocation5_spill] sm:$0xff] }
 0x242   :  { %4563 = vst [vmem:[#allocation51_spill] sm:$0xff] %v3338_v39  ;;  %v3350_v51 = vadd.f32 %v3238_v29, %v4565_v55  ;;  %v3354_v25 = vadd.f32 %v3238_v29, %v2965_v11  ;;  %v3358_v9 = vadd.f32 %v3238_v29, %v4568_v35  ;;  %v4570_v39 = vld [vmem:[#allocation8_spill] sm:$0xff]  ;;  %v3370_v55 = vadd.f32 %v3238_v29, %v2981_v2 }
 0x243   :  { %4564 = vst [vmem:[#allocation21_spill] sm:$0xff] %v3342_v23  ;;  %v3362_v40 = vadd.f32 %v3238_v29, %v4570_v39  ;;  %v4572_v23 = vld [vmem:[#allocation10_spill] sm:$0xff]  ;;  %v3390_v2 = vadd.f32 %v3238_v29, %v3001_v43  ;;  %v3410_v43 = vadd.f32 %v3238_v29, %v3021_v34  ;;  %v3430_v34 = vadd.f32 %v3238_v29, %v3041_v62 }
 0x244   :  { %4566 = vst [vmem:[#allocation25_spill] sm:$0xff] %v3350_v51  ;;  %v3366_v46 = vadd.f32 %v3238_v29, %v4572_v23  ;;  %v4575_v51 = vld [vmem:[#allocation12_spill] sm:$0xff]  ;;  %v3386_v23 = vadd.f32 %v3238_v29, %v2997_v24 }
 0x245   :  { %4567 = vst [vmem:[#allocation35_spill] sm:$0xff] %v3354_v25  ;;  %v3374_v11 = vadd.f32 %v3238_v29, %v4575_v51  ;;  %v4577_v25 = vld [vmem:[#allocation14_spill] sm:$0xff] }
 0x246   :  { %4569 = vst [vmem:[#allocation41_spill] sm:$0xff] %v3358_v9  ;;  %v3378_v35 = vadd.f32 %v3238_v29, %v4577_v25  ;;  %v4579_v9 = vld [vmem:[#allocation15_spill] sm:$0xff]  ;;  %v3398_v25 = vadd.f32 %v3238_v29, %v3009_v27 }
 0x247   :  { %4571 = vst [vmem:[#allocation46_spill] sm:$0xff] %v3362_v40  ;;  %v3382_v39 = vadd.f32 %v3238_v29, %v4579_v9 }
 0x248   :  { %4573 = vst [vmem:[#allocation47_spill] sm:$0xff] %v3366_v46 }
 0x249   :  { %4574 = vst [vmem:[#allocation48_spill] sm:$0xff] %v3370_v55  ;;  %v4583_v55 = vld [vmem:[#allocation17_spill] sm:$0xff] }
 0x24a   :  { %4576 = vst [vmem:[#allocation49_spill] sm:$0xff] %v3374_v11  ;;  %v3394_v51 = vadd.f32 %v3238_v29, %v4583_v55 }
 0x24b   :  { %4578 = vst [vmem:[#allocation50_spill] sm:$0xff] %v3378_v35  ;;  %v4586_v35 = vld [vmem:[#allocation20_spill] sm:$0xff] }
 0x24c   :  { %4580 = vst [vmem:[#allocation52_spill] sm:$0xff] %v3382_v39  ;;  %v3402_v9 = vadd.f32 %v3238_v29, %v4586_v35  ;;  %v4588_v39 = vld [vmem:[#allocation24_spill] sm:$0xff] }
 0x24d   :  { %4581 = vst [vmem:[#allocation53_spill] sm:$0xff] %v3386_v23  ;;  %v3406_v24 = vadd.f32 %v3238_v29, %v4588_v39 }
 0x24e   :  { %4582 = vst [vmem:[#allocation54_spill] sm:$0xff] %v3390_v2  ;;  %v4591_v2 = vld [vmem:[#allocation26_spill] sm:$0xff] }
 0x24f   :  { %4584 = vst [vmem:[#allocation55_spill] sm:$0xff] %v3394_v51  ;;  %v3414_v55 = vadd.f32 %v3238_v29, %v4591_v2  ;;  %v4593_v51 = vld [vmem:[#allocation27_spill] sm:$0xff]  ;;  %v3434_v2 = vadd.f32 %v3238_v29, %v3045_v3 }
 0x250   :  { %4585 = vst [vmem:[#allocation56_spill] sm:$0xff] %v3398_v25  ;;  %v3418_v27 = vadd.f32 %v3238_v29, %v4593_v51  ;;  %v4594_v25 = vld [vmem:[#allocation29_spill] sm:$0xff]  ;;  %v3438_v51 = vadd.f32 %v3238_v29, %v3049_v0 }
 0x251   :  { %4587 = vst [vmem:[#allocation4_spill] sm:$0xff] %v3402_v9  ;;  %v3422_v35 = vadd.f32 %v3238_v29, %v4594_v25  ;;  %v4596_v9 = vld [vmem:[#allocation31_spill] sm:$0xff]  ;;  %v3442_v25 = vadd.f32 %v3238_v29, %v3053_v13 }
 0x252   :  { %4589 = vst [vmem:[#allocation5_spill] sm:$0xff] %v3406_v24  ;;  %v3426_v39 = vadd.f32 %v3238_v29, %v4596_v9 }
 0x253   :  { %4590 = vst [vmem:[#allocation8_spill] sm:$0xff] %v3410_v43 }
 0x254   :  { %4592 = vst [vmem:[#allocation10_spill] sm:$0xff] %v3414_v55 }
 0x255   :  { %4595 = vst [vmem:[#allocation12_spill] sm:$0xff] %v3422_v35  ;;  %v4601_v35 = vld [vmem:[#allocation34_spill] sm:$0xff] }
 0x256   :  { %4597 = vst [vmem:[#allocation14_spill] sm:$0xff] %v3426_v39  ;;  %v3446_v9 = vadd.f32 %v3238_v29, %v4601_v35  ;;  %v4603_v39 = vld [vmem:[#allocation38_spill] sm:$0xff]  ;;  %v3466_v35 = vadd.f32 %v3238_v29, %v3077_v53  ;;  %v3486_v53 = vadd.f32 %v3238_v29, %v3097_v48  ;;  %v3506_v48 = vadd.f32 %v3238_v29, %v3117_v21 }
 0x257   :  { %4598 = vst [vmem:[#allocation15_spill] sm:$0xff] %v3430_v34  ;;  %v3450_v62 = vadd.f32 %v3238_v29, %v4603_v39  ;;  %v4605_v34 = vld [vmem:[#allocation39_spill] sm:$0xff]  ;;  %v3470_v39 = vadd.f32 %v3238_v29, %v3081_v61  ;;  %v3490_v61 = vadd.f32 %v3238_v29, %v3101_v20  ;;  %v3510_v20 = vadd.f32 %v3238_v29, %v3121_v5 }
 0x258   :  { %4599 = vst [vmem:[#allocation17_spill] sm:$0xff] %v3434_v2  ;;  %v3454_v3 = vadd.f32 %v3238_v29, %v4605_v34  ;;  %v4607_v2 = vld [vmem:[#allocation2_spill] sm:$0xff]  ;;  %v3474_v34 = vadd.f32 %v3238_v29, %v3085_v17  ;;  %v3494_v17 = vadd.f32 %v3238_v29, %v3105_v60  ;;  %v3514_v60 = vadd.f32 %v3238_v29, %v3125_v8 }
 0x259   :  { %4600 = vst [vmem:[#allocation20_spill] sm:$0xff] %v3438_v51  ;;  %v3458_v0 = vadd.f32 %v3238_v29, %v4607_v2  ;;  %v4609_v51 = vld [vmem:[#allocation3_spill] sm:$0xff]  ;;  %v3530_v5 = vadd.f32 %v3238_v29, %v3141_v26  ;;  %v3534_v8 = vadd.f32 %v3238_v29, %v3145_v31 }
 0x25a   :  { %4602 = vst [vmem:[#allocation24_spill] sm:$0xff] %v3446_v9  ;;  %v3462_v13 = vadd.f32 %v3238_v29, %v4609_v51 }
 0x25b   :  { %4604 = vst [vmem:[#allocation26_spill] sm:$0xff] %v3450_v62 }
 0x25c   :  { %4606 = vst [vmem:[#allocation27_spill] sm:$0xff] %v3454_v3  ;;  %v4613_v3 = vld [vmem:[#allocation6_spill] sm:$0xff] }
 0x25d   :  { %4608 = vst [vmem:[#allocation29_spill] sm:$0xff] %v3458_v0  ;;  %v3478_v2 = vadd.f32 %v3238_v29, %v4613_v3  ;;  %v4615_v0 = vld [vmem:[#allocation7_spill] sm:$0xff] }
 0x25e   :  { %4610 = vst [vmem:[#allocation31_spill] sm:$0xff] %v3462_v13  ;;  %v3482_v51 = vadd.f32 %v3238_v29, %v4615_v0 }
 0x25f   :  { %4611 = vst [vmem:[#allocation34_spill] sm:$0xff] %v3470_v39 }
 0x260   :  { %4612 = vst [vmem:[#allocation38_spill] sm:$0xff] %v3474_v34  ;;  %v4619_v34 = vld [vmem:[#allocation9_spill] sm:$0xff] }
 0x261   :  { %4614 = vst [vmem:[#allocation39_spill] sm:$0xff] %v3478_v2  ;;  %v3498_v3 = vadd.f32 %v3238_v29, %v4619_v34  ;;  %v4621_v2 = vld [vmem:[#allocation16_spill] sm:$0xff] }
 0x262   :  { %4616 = vst [vmem:[#allocation2_spill] sm:$0xff] %v3482_v51  ;;  %v3502_v0 = vadd.f32 %v3238_v29, %v4621_v2  ;;  %v3522_v2 = vadd.f32 %v3238_v29, %v3133_v50  ;;  %v3542_v50 = vadd.f32 %v3238_v29, %v3153_v28  ;;  %v3562_v28 = vadd.f32 %v3238_v29, %v3173_v12 }
 0x263   :  { %4617 = vst [vmem:[#allocation3_spill] sm:$0xff] %v3486_v53  ;;  %v3582_v12 = vadd.f32 %v3238_v29, %v3193_v18  ;;  %v3602_v18 = vadd.f32 %v3238_v29, %v3213_v63 }
 0x264   :  { %4618 = vst [vmem:[#allocation6_spill] sm:$0xff] %v3494_v17  ;;  %v4626_v17 = vld [vmem:[#allocation19_spill] sm:$0xff] }
 0x265   :  { %4620 = vst [vmem:[#allocation7_spill] sm:$0xff] %v3498_v3  ;;  %v3518_v34 = vadd.f32 %v3238_v29, %v4626_v17  ;;  %v3538_v17 = vadd.f32 %v3238_v29, %v3149_v42 }
 0x266   :  { %4622 = vst [vmem:[#allocation9_spill] sm:$0xff] %v3502_v0  ;;  %v4629_v0 = vld [vmem:[#allocation23_spill] sm:$0xff] }
 0x267   :  { %4623 = vst [vmem:[#allocation16_spill] sm:$0xff] %v3506_v48  ;;  %v3526_v21 = vadd.f32 %v3238_v29, %v4629_v0  ;;  %v3546_v0 = vadd.f32 %v3238_v29, %v3157_v44  ;;  %v3566_v44 = vadd.f32 %v3238_v29, %v3177_v6  ;;  %v3586_v6 = vadd.f32 %v3238_v29, %v3197_v38 }
 0x268   :  { %4624 = vst [vmem:[#allocation57_spill] sm:$0xff] %v3510_v20 }
 0x269   :  { %4625 = vst [vmem:[#allocation58_spill] sm:$0xff] %v3514_v60 }
 0x26a   :  { %4627 = vst [vmem:[#allocation19_spill] sm:$0xff] %v3518_v34  ;;  %v4691_v34 = vld [vmem:[#allocation50_spill] sm:$0xff] }
 0x26b   :  { %4628 = vst [vmem:[#allocation59_spill] sm:$0xff] %v3522_v2  ;;  %v3744_v2 = vmul.f32 0.1, %v3374_v11  ;;  %v4695_v11 = vld [vmem:[#allocation55_spill] sm:$0xff] }
 0x26c   :  { %4630 = vst [vmem:[#allocation23_spill] sm:$0xff] %v3526_v21  ;;  %v4636_v21 = vld [vmem:[#allocation28_spill] sm:$0xff] }
 0x26d   :  { %4631 = vst [vmem:[#allocation60_spill] sm:$0xff] %v3530_v5  ;;  %v3550_v26 = vadd.f32 %v3238_v29, %v4636_v21  ;;  %v4638_v5 = vld [vmem:[#allocation30_spill] sm:$0xff]  ;;  %v3570_v21 = vadd.f32 %v3238_v29, %v3181_v14  ;;  %v3590_v14 = vadd.f32 %v3238_v29, %v3201_v22  ;;  %v3610_v22 = vadd.f32 %v3238_v29, %v3221_v33 }
 0x26e   :  { %4632 = vst [vmem:[#allocation61_spill] sm:$0xff] %v3534_v8  ;;  %v3554_v31 = vadd.f32 %v3238_v29, %v4638_v5  ;;  %v4640_v8 = vld [vmem:[#allocation33_spill] sm:$0xff]  ;;  %v3574_v5 = vadd.f32 %v3238_v29, %v3185_v37  ;;  %v3594_v37 = vadd.f32 %v3238_v29, %v3205_v47 }
 0x26f   :  { %4633 = vst [vmem:[#allocation62_spill] sm:$0xff] %v3538_v17  ;;  %v3558_v42 = vadd.f32 %v3238_v29, %v4640_v8 }
 0x270   :  { %4634 = vst [vmem:[#allocation63_spill] sm:$0xff] %v3542_v50  ;;  %v4689_v50 = vld [vmem:[#allocation48_spill] sm:$0xff] }
 0x271   :  { %4635 = vst [vmem:[#allocation64_spill] sm:$0xff] %v3546_v0  ;;  %v3733_v0 = vmul.f32 0.1, %v3362_v40  ;;  %v3741_v17 = vmul.f32 0.1, %v4689_v50  ;;  %v4693_v40 = vld [vmem:[#allocation52_spill] sm:$0xff] }
 0x272   :  { %4637 = vst [vmem:[#allocation28_spill] sm:$0xff] %v3550_v26  ;;  %v4698_v50 = vld [vmem:[#allocation4_spill] sm:$0xff] }
 0x273   :  { %4639 = vst [vmem:[#allocation30_spill] sm:$0xff] %v3554_v31  ;;  %v4646_v31 = vld [vmem:[#allocation37_spill] sm:$0xff] }
 0x274   :  { %4641 = vst [vmem:[#allocation33_spill] sm:$0xff] %v3558_v42  ;;  %v3578_v8 = vadd.f32 %v3238_v29, %v4646_v31  ;;  %v4686_v42 = vld [vmem:[#allocation41_spill] sm:$0xff] }
 0x275   :  { %4642 = vst [vmem:[#allocation65_spill] sm:$0xff] %v3562_v28  ;;  %v3730_v26 = vmul.f32 0.1, %v4686_v42 }
 0x276   :  { %4643 = vst [vmem:[#allocation66_spill] sm:$0xff] %v3566_v44  ;;  %v4685_v44 = vld [vmem:[#allocation35_spill] sm:$0xff] }
 0x277   :  { %4644 = vst [vmem:[#allocation67_spill] sm:$0xff] %v3570_v21 }
 0x278   :  { %4645 = vst [vmem:[#allocation68_spill] sm:$0xff] %v3574_v5  ;;  %v4652_v5 = vld [vmem:[#allocation42_spill] sm:$0xff] }
 0x279   :  { %4647 = vst [vmem:[#allocation37_spill] sm:$0xff] %v3578_v8  ;;  %v3598_v31 = vadd.f32 %v3238_v29, %v4652_v5  ;;  %v4684_v8 = vld [vmem:[#allocation25_spill] sm:$0xff] }
 0x27a   :  { %4648 = vst [vmem:[#allocation69_spill] sm:$0xff] %v3582_v12  ;;  %v4655_v12 = vld [vmem:[#allocation44_spill] sm:$0xff]  ;;  %v3722_v21 = vmul.f32 0.1, %v4684_v8 }
 0x27b   :  { %4649 = vst [vmem:[#allocation70_spill] sm:$0xff] %v3586_v6  ;;  %v3606_v38 = vadd.f32 %v3238_v29, %v4655_v12  ;;  %v3626_v12 = vadd.f32 %v3238_v29, %v3242_v58  ;;  %v3719_v6 = vmul.f32 0.1, %v3346_v45 }
 0x27c   :  { %4650 = vst [vmem:[#allocation71_spill] sm:$0xff] %v3590_v14  ;;  %v4658_v14 = vld [vmem:[#allocation45_spill] sm:$0xff] }
 0x27d   :  { %4651 = vst [vmem:[#allocation72_spill] sm:$0xff] %v3594_v37  ;;  %v3614_v47 = vadd.f32 %v3238_v29, %v4658_v14  ;;  %v4660_v37 = vld [vmem:[#allocation11_spill] sm:$0xff] }
 0x27e   :  { %4653 = vst [vmem:[#allocation42_spill] sm:$0xff] %v3598_v31  ;;  %v3618_v5 = vadd.f32 %v3238_v29, %v4660_v37  ;;  %v4662_v31 = vld [vmem:[#allocation13_spill] sm:$0xff] }
 0x27f   :  { %4654 = vst [vmem:[#allocation73_spill] sm:$0xff] %v3602_v18  ;;  %v3622_v63 = vadd.f32 %v3238_v29, %v4662_v31 }
 0x280   :  { %4656 = vst [vmem:[#allocation44_spill] sm:$0xff] %v3606_v38  ;;  %v4665_v38 = vld [vmem:[#allocation18_spill] sm:$0xff] }
 0x281   :  { %4657 = vst [vmem:[#allocation74_spill] sm:$0xff] %v3610_v22  ;;  %v3630_v33 = vadd.f32 %v3238_v29, %v4665_v38  ;;  %v4667_v22 = vld [vmem:[#allocation22_spill] sm:$0xff]  ;;  %v3650_v38 = vadd.f32 %v3238_v29, %v3266_v57  ;;  %v3672_v57 = vadd.f32 %v3238_v29, %v3282_v52  ;;  %v3694_v52 = vmul.f32 0.1, %v3318_v30 }
 0x282   :  { %4659 = vst [vmem:[#allocation45_spill] sm:$0xff] %v3614_v47  ;;  %v3634_v14 = vadd.f32 %v3238_v29, %v4667_v22  ;;  %v4669_v47 = vld [vmem:[#allocation32_spill] sm:$0xff]  ;;  %v3657_v22 = vadd.f32 %v3238_v29, %v3270_v41  ;;  %v3678_v41 = vmul.f32 0.1, %v3302_v1 }
 0x283   :  { %4661 = vst [vmem:[#allocation11_spill] sm:$0xff] %v3618_v5  ;;  %v3638_v37 = vadd.f32 %v3238_v29, %v4669_v47  ;;  %v4671_v5 = vld [vmem:[#allocation36_spill] sm:$0xff]  ;;  %v3661_v47 = vadd.f32 %v3238_v29, %v3274_v10  ;;  %v3681_v10 = vmul.f32 0.1, %v3306_v36 }
 0x284   :  { %4663 = vst [vmem:[#allocation13_spill] sm:$0xff] %v3622_v63  ;;  %v3642_v31 = vadd.f32 %v3238_v29, %v4671_v5  ;;  %v4673_v63 = vld [vmem:[#allocation40_spill] sm:$0xff]  ;;  %v3665_v5 = vadd.f32 %v3238_v29, %v3278_v56  ;;  %v3685_v56 = vadd.f32 %v3238_v29, %v3286_v59  ;;  %v4681_v59 = vld [vmem:[#allocation43_spill] sm:$0xff] }
 0x285   :  { %4664 = vst [vmem:[#allocation75_spill] sm:$0xff] %v3626_v12  ;;  %v3646_v58 = vadd.f32 %v3238_v29, %v4673_v63  ;;  %v3668_v63 = vmul.f32 0.1, %v3294_v49  ;;  %v3725_v29 = vmul.f32 0.1, %v4685_v44 }
 0x286   :  { %4666 = vst [vmem:[#allocation18_spill] sm:$0xff] %v3630_v33  ;;  %v3653_v33 = vmul.f32 0.1, %v3290_v16 }
 0x287   :  { %4668 = vst [vmem:[#allocation22_spill] sm:$0xff] %v3634_v14  ;;  %v4683_v14 = vld [vmem:[#allocation21_spill] sm:$0xff]  ;;  %v1328_v18 = vmax.f32 %v3294_v49, %v3668_v63  ;;  %v3736_v49 = vmul.f32 0.1, %v3366_v46  ;;  %v1330_v63 = vmax.f32 %v3302_v1, %v3678_v41  ;;  %v3755_v46 = vmul.f32 0.1, %v3386_v23 }
 0x288   :  { %4670 = vst [vmem:[#allocation32_spill] sm:$0xff] %v3638_v37  ;;  %v3714_v12 = vmul.f32 0.1, %v4683_v14  ;;  %v3774_v23 = vmul.f32 0.1, %v3406_v24  ;;  %v4707_v24 = vld [vmem:[#allocation20_spill] sm:$0xff] }
 0x289   :  { %4672 = vst [vmem:[#allocation36_spill] sm:$0xff] %v3642_v31  ;;  %v4682_v31 = vld [vmem:[#allocation51_spill] sm:$0xff] }
 0x28a   :  { %4674 = vst [vmem:[#allocation40_spill] sm:$0xff] %v3646_v58  ;;  %v3703_v58 = vmul.f32 0.1, %v3330_v32  ;;  %v3711_v37 = vmul.f32 0.1, %v4682_v31 }
 0x28b   :  { %4675 = vst [vmem:[#allocation76_spill] sm:$0xff] %v3650_v38  ;;  %v3675_v38 = vmul.f32 0.1, %v3298_v4 }
 0x28c   :  { %4676 = vst [vmem:[#allocation77_spill] sm:$0xff] %v3657_v22  ;;  %v3700_v22 = vmul.f32 0.1, %v3326_v54 }
 0x28d   :  { %4677 = vst [vmem:[#allocation78_spill] sm:$0xff] %v3661_v47  ;;  %v3691_v47 = vmul.f32 0.1, %v3314_v15  ;;  %v1329_v28 = vmax.f32 %v3298_v4, %v3675_v38  ;;  %v3747_v4 = vmul.f32 0.1, %v4691_v34  ;;  %v1331_v38 = vmax.f32 %v3306_v36, %v3681_v10  ;;  %v4696_v34 = vld [vmem:[#allocation56_spill] sm:$0xff] }
 0x28e   :  { %4678 = vst [vmem:[#allocation79_spill] sm:$0xff] %v3665_v5  ;;  %v3688_v5 = vmul.f32 0.1, %v3310_v7  ;;  %v3769_v36 = vmul.f32 0.1, %v4698_v50  ;;  %v4702_v50 = vld [vmem:[#allocation12_spill] sm:$0xff] }
 0x28f   :  { %4679 = vst [vmem:[#allocation80_spill] sm:$0xff] %v3672_v57  ;;  %v3697_v57 = vmul.f32 0.1, %v3322_v19  ;;  %v1333_v10 = vmax.f32 %v3314_v15, %v3691_v47 }
 0x290   :  { %4680 = vst [vmem:[#allocation81_spill] sm:$0xff] %v3685_v56  ;;  %v3708_v56 = vmul.f32 0.1, %v4681_v59  ;;  %v1332_v41 = vmax.f32 %v3310_v7, %v3688_v5  ;;  %v3780_v7 = vmul.f32 0.1, %v3414_v55  ;;  %v1334_v5 = vmax.f32 %v3318_v30, %v3694_v52  ;;  %v4705_v55 = vld [vmem:[#allocation17_spill] sm:$0xff] }
 0x291   :  { %4687 = vst [vmem:[#allocation43_spill] sm:$0xff] %v3733_v0  ;;  %v3752_v0 = vmul.f32 0.1, %v4693_v40  ;;  %v1335_v47 = vmax.f32 %v3322_v19, %v3697_v57  ;;  %v3802_v30 = vmul.f32 0.1, %v4707_v24  ;;  %v1336_v52 = vmax.f32 %v3326_v54, %v3700_v22  ;;  %v4711_v24 = vld [vmem:[#allocation29_spill] sm:$0xff] }
 0x292   :  { %4688 = vst [vmem:[#allocation51_spill] sm:$0xff] %v3736_v49  ;;  %v4694_v49 = vld [vmem:[#allocation54_spill] sm:$0xff]  ;;  %v3813_v19 = vmul.f32 0.1, %v3450_v62  ;;  %v1337_v57 = vmax.f32 %v3330_v32, %v3703_v58  ;;  %v3824_v54 = vmul.f32 0.1, %v3462_v13  ;;  %v1338_v22 = vmax.f32 %v4681_v59, %v3708_v56 }
 0x293   :  { %4690 = vst [vmem:[#allocation21_spill] sm:$0xff] %v3744_v2  ;;  %v3758_v1 = vmul.f32 0.1, %v4694_v49  ;;  %v3763_v2 = vmul.f32 0.1, %v4695_v11  ;;  %v1339_v58 = vmax.f32 %v4682_v31, %v3711_v37  ;;  %v1340_v59 = vmax.f32 %v4683_v14, %v3714_v12 }
 0x294   :  { %4692 = vst [vmem:[#allocation25_spill] sm:$0xff] %v3747_v4  ;;  %v3766_v4 = vmul.f32 0.1, %v4696_v34  ;;  %v3777_v49 = vmul.f32 0.1, %v3410_v43  ;;  %v4704_v43 = vld [vmem:[#allocation15_spill] sm:$0xff]  ;;  %v1341_v31 = vmax.f32 %v3346_v45, %v3719_v6  ;;  %v1342_v14 = vmax.f32 %v4684_v8, %v3722_v21 }
 0x295   :  { %4699 = vst [vmem:[#allocation41_spill] sm:$0xff] %v3769_v36  ;;  %v3785_v34 = vmul.f32 0.1, %v3418_v27  ;;  %v3788_v36 = vmul.f32 0.1, %v4702_v50  ;;  %v4724_v45 = vmax.f32 %v3290_v16, %v3653_v33  ;;  %v4727_v21 = vld [vmem:[#allocation23_spill] sm:$0xff]  ;;  %v1922_v16 = vpack.c.bf16 %v1336_v52, %v1335_v47 }
 0x296   :  { %4697 = vst [vmem:[#allocation35_spill] sm:$0xff] %v3766_v4  ;;  %v4703_v4 = vld [vmem:[#allocation14_spill] sm:$0xff]  ;;  %v3807_v50 = vmul.f32 0.1, %v3442_v25  ;;  %v3832_v62 = vmul.f32 0.1, %v3470_v39 }
 0x297   :  { %4700 = vst [vmem:[#allocation52_spill] sm:$0xff] %v3777_v49  ;;  %v3791_v15 = vmul.f32 0.1, %v4703_v4  ;;  %v3796_v49 = vmul.f32 0.1, %v4704_v43  ;;  %v1902_v6 = vpack.c.bf16 %v1328_v18, %v4724_v45  ;;  %v4735_v45 = vld [vmem:[#allocation48_spill] sm:$0xff] }
 0x298   :  { %4701 = vst [vmem:[#allocation55_spill] sm:$0xff] %v3780_v7  ;;  %v3799_v7 = vmul.f32 0.1, %v4705_v55  ;;  %v3810_v4 = vmul.f32 0.1, %v3446_v9  ;;  %v4710_v55 = vld [vmem:[#allocation27_spill] sm:$0xff]  ;;  %v1347_v47 = vmax.f32 %v4735_v45, %v3741_v17  ;;  %v1937_v17 = vpack.c.bf16 %v1342_v14, %v1341_v31 }
 0x299   :  { %4708 = vst [vmem:[#allocation82_spill] sm:$0xff] %v3802_v30  ;;  %v3821_v30 = vmul.f32 0.1, %v4711_v24  ;;  %v3829_v9 = vmul.f32 0.1, %v3466_v35  ;;  %v4715_v24 = vld [vmem:[#allocation39_spill] sm:$0xff] }
 0x29a   :  { %4706 = vst [vmem:[#allocation15_spill] sm:$0xff] %v3799_v7  ;;  %v3818_v7 = vmul.f32 0.1, %v4710_v55  ;;  %v3843_v13 = vmul.f32 0.1, %v3482_v51  ;;  %v4719_v51 = vld [vmem:[#allocation9_spill] sm:$0xff] }
 0x29b   :  { %4709 = vst [vmem:[#allocation83_spill] sm:$0xff] %v3813_v19  ;;  %v4713_v19 = vld [vmem:[#allocation38_spill] sm:$0xff]  ;;  %v3846_v56 = vmul.f32 0.1, %v3486_v53  ;;  %v3851_v39 = vmul.f32 0.1, %v3490_v61 }
 0x29c   :  { %4712 = vst [vmem:[#allocation27_spill] sm:$0xff] %v3821_v30  ;;  %v3835_v32 = vmul.f32 0.1, %v4713_v19  ;;  %v3840_v30 = vmul.f32 0.1, %v4715_v24  ;;  %v4717_v19 = vld [vmem:[#allocation6_spill] sm:$0xff] }
 0x29d   :  { %4716 = vst [vmem:[#allocation39_spill] sm:$0xff] %v3843_v13  ;;  %v3857_v37 = vmul.f32 0.1, %v3498_v3  ;;  %v3862_v13 = vmul.f32 0.1, %v4719_v51  ;;  %v1343_v3 = vmax.f32 %v4685_v44, %v3725_v29  ;;  %v1907_v51 = vpack.c.bf16 %v1330_v63, %v1329_v28  ;;  %v4729_v28 = vld [vmem:[#allocation61_spill] sm:$0xff] }
 0x29e   :  { %4714 = vst [vmem:[#allocation84_spill] sm:$0xff] %v3835_v32  ;;  %v3854_v32 = vmul.f32 0.1, %v4717_v19  ;;  %v3865_v53 = vmul.f32 0.1, %v3506_v48  ;;  %v1344_v44 = vmax.f32 %v4686_v42, %v3730_v26  ;;  %v4730_v33 = vld [vmem:[#allocation43_spill] sm:$0xff] }
 0x29f   :  { %4718 = vst [vmem:[#allocation85_spill] sm:$0xff] %v3857_v37  ;;  %v3868_v12 = vmul.f32 0.1, %v3510_v20  ;;  %v3873_v19 = vmul.f32 0.1, %v3514_v60  ;;  %v1917_v37 = vpack.c.bf16 %v1334_v5, %v1333_v10  ;;  %v4728_v60 = vld [vmem:[#allocation60_spill] sm:$0xff]  ;;  %v1927_v5 = vpack.c.bf16 %v1338_v22, %v1337_v57 }
 0x2a0   :  { %4720 = vst [vmem:[#allocation86_spill] sm:$0xff] %v3862_v13  ;;  %v4725_v13 = vld [vmem:[#allocation19_spill] sm:$0xff]  ;;  %v3887_v8 = vmul.f32 0.1, %v4727_v21  ;;  %v3898_v18 = vmul.f32 0.1, %v4729_v28  ;;  %v1350_v22 = vmax.f32 %v4693_v40, %v3752_v0 }
 0x2a1   :  { %4721 = vst [vmem:[#allocation87_spill] sm:$0xff] %v3865_v53  ;;  %v3881_v48 = vmul.f32 0.1, %v4725_v13  ;;  %v4726_v53 = vld [vmem:[#allocation59_spill] sm:$0xff]  ;;  %v4731_v29 = vld [vmem:[#allocation46_spill] sm:$0xff]  ;;  %v4736_v52 = vld [vmem:[#allocation21_spill] sm:$0xff] }
 0x2a2   :  { %4722 = vst [vmem:[#allocation88_spill] sm:$0xff] %v3868_v12  ;;  %v3884_v20 = vmul.f32 0.1, %v4726_v53  ;;  %v1912_v12 = vpack.c.bf16 %v1332_v41, %v1331_v38  ;;  %v1345_v63 = vmax.f32 %v4731_v29, %v4730_v33  ;;  %v4732_v38 = vld [vmem:[#allocation51_spill] sm:$0xff]  ;;  %v4734_v26 = vld [vmem:[#allocation62_spill] sm:$0xff]  ;;  %v1932_v33 = vpack.c.bf16 %v1340_v59, %v1339_v58  ;;  %v4741_v45 = vld [vmem:[#allocation64_spill] sm:$0xff] }
 0x2a3   :  { %4723 = vst [vmem:[#allocation89_spill] sm:$0xff] %v3873_v19  ;;  %v3890_v19 = vmul.f32 0.1, %v4728_v60  ;;  %v4733_v41 = vld [vmem:[#allocation47_spill] sm:$0xff]  ;;  %v3908_v42 = vmul.f32 0.1, %v4734_v26 }
 0x2a4   :  { %1903 = vst [vmem:[%s4276_s4] sm:$0xff] %v1902_v6   ;;  %v1346_v10 = vmax.f32 %v4733_v41, %v4732_v38  ;;  %v4737_v6 = vld [vmem:[#allocation49_spill] sm:$0xff]  ;;  %v4738_v29 = vld [vmem:[#allocation63_spill] sm:$0xff]  ;;  %v4743_v59 = vld [vmem:[#allocation54_spill] sm:$0xff] }
 0x2a5   :  { %2139 = vst [vmem:[%s4276_s4 + $0x8] sm:$0xff] %v1907_v51   ;;  %v1348_v28 = vmax.f32 %v4737_v6, %v4736_v52  ;;  %v3918_v38 = vmul.f32 0.1, %v4738_v29  ;;  %v4739_v41 = vld [vmem:[#allocation25_spill] sm:$0xff]  ;;  %v4740_v51 = vld [vmem:[#allocation50_spill] sm:$0xff]  ;;  %v1352_v6 = vmax.f32 %v4743_v59, %v3758_v1  ;;  %v4744_v40 = vld [vmem:[#allocation28_spill] sm:$0xff] }
 0x2a6   :  { %2140 = vst [vmem:[%s4276_s4 + $0x10] sm:$0xff] %v1912_v12   ;;  %v1349_v57 = vmax.f32 %v4740_v51, %v4739_v41  ;;  %v3928_v52 = vmul.f32 0.1, %v4741_v45  ;;  %v4742_v12 = vld [vmem:[#allocation53_spill] sm:$0xff]  ;;  %v1942_v41 = vpack.c.bf16 %v1344_v44, %v1343_v3  ;;  %v3938_v0 = vmul.f32 0.1, %v4744_v40 }
 0x2a7   :  { %2141 = vst [vmem:[%s4276_s4 + $0x18] sm:$0xff] %v1917_v37   ;;  %v1351_v58 = vmax.f32 %v4742_v12, %v3755_v46  ;;  %v1353_v37 = vmax.f32 %v4695_v11, %v3763_v2  ;;  %v4745_v31 = vld [vmem:[#allocation35_spill] sm:$0xff]  ;;  %v4746_v14 = vld [vmem:[#allocation56_spill] sm:$0xff]  ;;  %v1947_v46 = vpack.c.bf16 %v1346_v10, %v1345_v63  ;;  %v4747_v1 = vld [vmem:[#allocation30_spill] sm:$0xff]  ;;  %v1952_v11 = vpack.c.bf16 %v1348_v28, %v1347_v47 }
 0x2a8   :  { %2142 = vst [vmem:[%s4276_s4 + $0x20] sm:$0xff] %v1922_v16   ;;  %v1354_v51 = vmax.f32 %v4746_v14, %v4745_v31  ;;  %v3948_v12 = vmul.f32 0.1, %v4747_v1  ;;  %v4749_v59 = vld [vmem:[#allocation41_spill] sm:$0xff]  ;;  %v4750_v16 = vld [vmem:[#allocation4_spill] sm:$0xff]  ;;  %v4755_v10 = vld [vmem:[#allocation55_spill] sm:$0xff]  ;;  %v1359_v28 = vmax.f32 %v3418_v27, %v3785_v34 }
 0x2a9   :  { %2143 = vst [vmem:[%s4276_s4 + $0x28] sm:$0xff] %v1927_v5   ;;  %v1355_v3 = vmax.f32 %v4750_v16, %v4749_v59  ;;  %v4751_v44 = vld [vmem:[#allocation5_spill] sm:$0xff]  ;;  %v4753_v14 = vld [vmem:[#allocation52_spill] sm:$0xff]  ;;  %v4756_v1 = vld [vmem:[#allocation10_spill] sm:$0xff]  ;;  %v1957_v59 = vpack.c.bf16 %v1350_v22, %v1349_v57  ;;  %v1362_v22 = vmax.f32 %v4704_v43, %v3796_v49 }
 0x2aa   :  { %4748 = vst [vmem:[#allocation19_spill] sm:$0xff] %v3948_v12  ;;  %v1356_v40 = vmax.f32 %v4751_v44, %v3774_v23  ;;  %v4752_v2 = vld [vmem:[#allocation33_spill] sm:$0xff]  ;;  %v4754_v5 = vld [vmem:[#allocation8_spill] sm:$0xff]  ;;  %v1358_v12 = vmax.f32 %v4756_v1, %v4755_v10  ;;  %v1962_v44 = vpack.c.bf16 %v1352_v6, %v1351_v58  ;;  %v4759_v1 = vld [vmem:[#allocation66_spill] sm:$0xff]  ;;  %v1967_v27 = vpack.c.bf16 %v1354_v51, %v1353_v37 }
 0x2ab   :  { %2144 = vst [vmem:[%s4276_s4 + $0x30] sm:$0xff] %v1932_v33   ;;  %v3958_v31 = vmul.f32 0.1, %v4752_v2  ;;  %v1357_v63 = vmax.f32 %v4754_v5, %v4753_v14  ;;  %v4757_v23 = vld [vmem:[#allocation65_spill] sm:$0xff]  ;;  %v4758_v47 = vld [vmem:[#allocation12_spill] sm:$0xff]  ;;  %v4761_v34 = vld [vmem:[#allocation67_spill] sm:$0xff]  ;;  %v1365_v37 = vmax.f32 %v3442_v25, %v3807_v50 }
 0x2ac   :  { %2145 = vst [vmem:[%s4276_s4 + $0x38] sm:$0xff] %v1937_v17   ;;  %v3968_v16 = vmul.f32 0.1, %v4757_v23  ;;  %v1360_v33 = vmax.f32 %v4758_v47, %v3788_v36  ;;  %v3978_v14 = vmul.f32 0.1, %v4759_v1  ;;  %v4760_v17 = vld [vmem:[#allocation14_spill] sm:$0xff] }
 0x2ad   :  { %2146 = vst [vmem:[%s4276_s4 + $0x40] sm:$0xff] %v1942_v41   ;;  %v1361_v57 = vmax.f32 %v4760_v17, %v3791_v15  ;;  %v3988_v36 = vmul.f32 0.1, %v4761_v34  ;;  %v4762_v5 = vld [vmem:[#allocation15_spill] sm:$0xff]  ;;  %v4763_v41 = vld [vmem:[#allocation17_spill] sm:$0xff]  ;;  %v4764_v6 = vld [vmem:[#allocation82_spill] sm:$0xff]  ;;  %v1972_v15 = vpack.c.bf16 %v1356_v40, %v1355_v3  ;;  %v1977_v17 = vpack.c.bf16 %v1358_v12, %v1357_v63 }
 0x2ae   :  { %2147 = vst [vmem:[%s4276_s4 + $0x48] sm:$0xff] %v1947_v46   ;;  %v1363_v58 = vmax.f32 %v4763_v41, %v4762_v5  ;;  %v4765_v10 = vld [vmem:[#allocation20_spill] sm:$0xff]  ;;  %v4768_v5 = vld [vmem:[#allocation37_spill] sm:$0xff]  ;;  %v1368_v3 = vmax.f32 %v4710_v55, %v3818_v7  ;;  %v1982_v25 = vpack.c.bf16 %v1360_v33, %v1359_v28  ;;  %v4774_v63 = vld [vmem:[#allocation31_spill] sm:$0xff]  ;;  %v1371_v28 = vmax.f32 %v3466_v35, %v3829_v9 }
 0x2af   :  { %v1364_v47 = vmax.f32 %v4765_v10, %v4764_v6  ;;  %2148 = vst [vmem:[%s4276_s4 + $0x50] sm:$0xff] %v1952_v11   ;;  %v4766_v43 = vld [vmem:[#allocation68_spill] sm:$0xff]  ;;  %v4008_v41 = vmul.f32 0.1, %v4768_v5  ;;  %v4769_v6 = vld [vmem:[#allocation83_spill] sm:$0xff]  ;;  %v4770_v11 = vld [vmem:[#allocation26_spill] sm:$0xff] }
 0x2b0   :  { %v3998_v49 = vmul.f32 0.1, %v4766_v43  ;;  %v4767_v51 = vld [vmem:[#allocation24_spill] sm:$0xff]  ;;  %2149 = vst [vmem:[%s4276_s4 + $0x58] sm:$0xff] %v1957_v59   ;;  %v1367_v40 = vmax.f32 %v4770_v11, %v4769_v6  ;;  %v4771_v50 = vld [vmem:[#allocation69_spill] sm:$0xff]  ;;  %v4772_v10 = vld [vmem:[#allocation27_spill] sm:$0xff]  ;;  %v1987_v6 = vpack.c.bf16 %v1362_v22, %v1361_v57  ;;  %v1374_v22 = vmax.f32 %v4715_v24, %v3840_v30 }
 0x2b1   :  { %v1366_v46 = vmax.f32 %v4767_v51, %v3810_v4  ;;  %2150 = vst [vmem:[%s4276_s4 + $0x60] sm:$0xff] %v1962_v44   ;;  %v4018_v4 = vmul.f32 0.1, %v4771_v50  ;;  %v4773_v59 = vld [vmem:[#allocation29_spill] sm:$0xff]  ;;  %v1370_v51 = vmax.f32 %v4774_v63, %v3824_v54  ;;  %v4775_v55 = vld [vmem:[#allocation70_spill] sm:$0xff]  ;;  %v1992_v11 = vpack.c.bf16 %v1364_v47, %v1363_v58  ;;  %v4777_v54 = vld [vmem:[#allocation71_spill] sm:$0xff] }
 0x2b2   :  { %v1369_v12 = vmax.f32 %v4773_v59, %v4772_v10  ;;  %2151 = vst [vmem:[%s4276_s4 + $0x68] sm:$0xff] %v1967_v27   ;;  %v4028_v7 = vmul.f32 0.1, %v4775_v55  ;;  %v4776_v33 = vld [vmem:[#allocation34_spill] sm:$0xff]  ;;  %v4038_v10 = vmul.f32 0.1, %v4777_v54 }
 0x2b3   :  { %v1372_v44 = vmax.f32 %v4776_v33, %v3832_v62  ;;  %2152 = vst [vmem:[%s4276_s4 + $0x70] sm:$0xff] %v1972_v15   ;;  %v4778_v59 = vld [vmem:[#allocation84_spill] sm:$0xff]  ;;  %v4779_v27 = vld [vmem:[#allocation38_spill] sm:$0xff]  ;;  %v1997_v9 = vpack.c.bf16 %v1366_v46, %v1365_v37  ;;  %v4781_v63 = vld [vmem:[#allocation39_spill] sm:$0xff]  ;;  %v1377_v37 = vmax.f32 %v3490_v61, %v3851_v39 }
 0x2b4   :  { %v1373_v57 = vmax.f32 %v4779_v27, %v4778_v59  ;;  %2153 = vst [vmem:[%s4276_s4 + $0x78] sm:$0xff] %v1977_v17   ;;  %v4780_v62 = vld [vmem:[#allocation72_spill] sm:$0xff]  ;;  %v4782_v15 = vld [vmem:[#allocation2_spill] sm:$0xff]  ;;  %v4783_v47 = vld [vmem:[#allocation3_spill] sm:$0xff]  ;;  %v2002_v59 = vpack.c.bf16 %v1368_v3, %v1367_v40  ;;  %v2007_v27 = vpack.c.bf16 %v1370_v51, %v1369_v12 }
 0x2b5   :  { %v4048_v35 = vmul.f32 0.1, %v4780_v62  ;;  %v1375_v58 = vmax.f32 %v4782_v15, %v4781_v63  ;;  %v1376_v33 = vmax.f32 %v4783_v47, %v3846_v56  ;;  %2154 = vst [vmem:[%s4276_s4 + $0x80] sm:$0xff] %v1982_v25   ;;  %v4784_v24 = vld [vmem:[#allocation42_spill] sm:$0xff]  ;;  %v4786_v56 = vld [vmem:[#allocation73_spill] sm:$0xff]  ;;  %v4789_v25 = vld [vmem:[#allocation7_spill] sm:$0xff]  ;;  %v2012_v39 = vpack.c.bf16 %v1372_v44, %v1371_v28 }
 0x2b6   :  { %v4058_v30 = vmul.f32 0.1, %v4784_v24  ;;  %v4785_v46 = vld [vmem:[#allocation6_spill] sm:$0xff]  ;;  %2155 = vst [vmem:[%s4276_s4 + $0x88] sm:$0xff] %v1987_v6   ;;  %v4068_v63 = vmul.f32 0.1, %v4786_v56  ;;  %v1384_v44 = vmax.f32 %v4725_v13, %v3881_v48 }
 0x2b7   :  { %v1378_v17 = vmax.f32 %v4785_v46, %v3854_v32  ;;  %v4788_v15 = vld [vmem:[#allocation85_spill] sm:$0xff]  ;;  %v4790_v3 = vld [vmem:[#allocation86_spill] sm:$0xff]  ;;  %2156 = vst [vmem:[%s4276_s4 + $0x90] sm:$0xff] %v1992_v11   ;;  %v4792_v61 = vld [vmem:[#allocation44_spill] sm:$0xff] }
 0x2b8   :  { %4787 = vst [vmem:[#allocation59_spill] sm:$0xff] %v4068_v63  ;;  %v1379_v40 = vmax.f32 %v4789_v25, %v4788_v15  ;;  %v4791_v47 = vld [vmem:[#allocation9_spill] sm:$0xff]  ;;  %v4078_v32 = vmul.f32 0.1, %v4792_v61  ;;  %v4793_v46 = vld [vmem:[#allocation87_spill] sm:$0xff]  ;;  %v4794_v6 = vld [vmem:[#allocation16_spill] sm:$0xff]  ;;  %v2017_v15 = vpack.c.bf16 %v1374_v22, %v1373_v57  ;;  %v1385_v57 = vmax.f32 %v4726_v53, %v3884_v20 }
 0x2b9   :  { %v1380_v24 = vmax.f32 %v4791_v47, %v4790_v3  ;;  %v1381_v12 = vmax.f32 %v4794_v6, %v4793_v46  ;;  %v4795_v51 = vld [vmem:[#allocation88_spill] sm:$0xff]  ;;  %v4796_v56 = vld [vmem:[#allocation57_spill] sm:$0xff]  ;;  %2157 = vst [vmem:[%s4276_s4 + $0x98] sm:$0xff] %v1997_v9   ;;  %v4797_v25 = vld [vmem:[#allocation74_spill] sm:$0xff]  ;;  %v2022_v46 = vpack.c.bf16 %v1376_v33, %v1375_v58  ;;  %v1386_v22 = vmax.f32 %v4727_v21, %v3887_v8 }
 0x2ba   :  { %v1382_v63 = vmax.f32 %v4796_v56, %v4795_v51  ;;  %v4088_v3 = vmul.f32 0.1, %v4797_v25  ;;  %v4798_v47 = vld [vmem:[#allocation89_spill] sm:$0xff]  ;;  %v4799_v11 = vld [vmem:[#allocation58_spill] sm:$0xff]  ;;  %2158 = vst [vmem:[%s4276_s4 + $0xa0] sm:$0xff] %v2002_v59   ;;  %v2027_v9 = vpack.c.bf16 %v1378_v17, %v1377_v37  ;;  %v4801_v13 = vld [vmem:[#allocation11_spill] sm:$0xff]  ;;  %v1387_v58 = vmax.f32 %v4728_v60, %v3890_v19 }
 0x2bb   :  { %v1383_v28 = vmax.f32 %v4799_v11, %v4798_v47  ;;  %v4800_v56 = vld [vmem:[#allocation45_spill] sm:$0xff]  ;;  %2159 = vst [vmem:[%s4276_s4 + $0xa8] sm:$0xff] %v2007_v27   ;;  %v4108_v48 = vmul.f32 0.1, %v4801_v13  ;;  %v2032_v53 = vpack.c.bf16 %v1380_v24, %v1379_v40  ;;  %v1389_v8 = vmax.f32 %v4734_v26, %v3908_v42  ;;  %v4804_v19 = vld [vmem:[#allocation75_spill] sm:$0xff]  ;;  %v4805_v17 = vld [vmem:[#allocation28_spill] sm:$0xff] }
 0x2bc   :  { %v4098_v6 = vmul.f32 0.1, %v4800_v56  ;;  %v4802_v33 = vld [vmem:[#allocation61_spill] sm:$0xff]  ;;  %2160 = vst [vmem:[%s4276_s4 + $0xb0] sm:$0xff] %v2012_v39   ;;  %v1390_v37 = vmax.f32 %v4738_v29, %v3918_v38  ;;  %v2037_v60 = vpack.c.bf16 %v1382_v63, %v1381_v12  ;;  %v1391_v24 = vmax.f32 %v4741_v45, %v3928_v52  ;;  %v4806_v42 = vld [vmem:[#allocation18_spill] sm:$0xff]  ;;  %v4807_v38 = vld [vmem:[#allocation19_spill] sm:$0xff] }
 0x2bd   :  { %v1388_v59 = vmax.f32 %v4802_v33, %v3898_v18  ;;  %v4803_v20 = vld [vmem:[#allocation13_spill] sm:$0xff]  ;;  %2161 = vst [vmem:[%s4276_s4 + $0xb8] sm:$0xff] %v2017_v15   ;;  %v4128_v18 = vmul.f32 0.1, %v4804_v19  ;;  %v1392_v27 = vmax.f32 %v4805_v17, %v3938_v0  ;;  %v2042_v26 = vpack.c.bf16 %v1384_v44, %v1383_v28  ;;  %v4808_v40 = vld [vmem:[#allocation30_spill] sm:$0xff] }
 0x2be   :  { %v4118_v21 = vmul.f32 0.1, %v4803_v20  ;;  %2162 = vst [vmem:[%s4276_s4 + $0xc0] sm:$0xff] %v2022_v46   ;;  %v4138_v29 = vmul.f32 0.1, %v4806_v42  ;;  %v1393_v63 = vmax.f32 %v4808_v40, %v4807_v38  ;;  %v1394_v39 = vmax.f32 %v4752_v2, %v3958_v31  ;;  %v4809_v52 = vld [vmem:[#allocation22_spill] sm:$0xff] }
 0x2bf   :  { %2163 = vst [vmem:[%s4276_s4 + $0xc8] sm:$0xff] %v2027_v9   ;;  %v2047_v45 = vpack.c.bf16 %v1386_v22, %v1385_v57  ;;  %v4148_v0 = vmul.f32 0.1, %v4809_v52  ;;  %v1395_v12 = vmax.f32 %v4757_v23, %v3968_v16  ;;  %v1396_v51 = vmax.f32 %v4759_v1, %v3978_v14  ;;  %v4810_v2 = vld [vmem:[#allocation32_spill] sm:$0xff]  ;;  %v4814_v46 = vld [vmem:[#allocation42_spill] sm:$0xff]  ;;  %v4817_v22 = vld [vmem:[#allocation73_spill] sm:$0xff] }
 0x2c0   :  { %2164 = vst [vmem:[%s4276_s4 + $0xd0] sm:$0xff] %v2032_v53   ;;  %v2052_v15 = vpack.c.bf16 %v1388_v59, %v1387_v58  ;;  %v1318_v31 = vmul.f32 0.1, %v4810_v2  ;;  %v1397_v47 = vmax.f32 %v4761_v34, %v3988_v36  ;;  %v1398_v11 = vmax.f32 %v4766_v43, %v3998_v49  ;;  %v4811_v16 = vld [vmem:[#allocation36_spill] sm:$0xff] }
 0x2c1   :  { %2165 = vst [vmem:[%s4276_s4 + $0xd8] sm:$0xff] %v2037_v60   ;;  %v2057_v23 = vpack.c.bf16 %v1390_v37, %v1389_v8  ;;  %v1319_v1 = vmul.f32 0.1, %v4811_v16  ;;  %v1399_v14 = vmax.f32 %v4768_v5, %v4008_v41  ;;  %v1400_v28 = vmax.f32 %v4771_v50, %v4018_v4  ;;  %v4812_v36 = vld [vmem:[#allocation40_spill] sm:$0xff]  ;;  %v4819_v8 = vld [vmem:[#allocation79_spill] sm:$0xff] }
 0x2c2   :  { %2166 = vst [vmem:[%s4276_s4 + $0xe0] sm:$0xff] %v2042_v26   ;;  %v2062_v34 = vpack.c.bf16 %v1392_v27, %v1391_v24  ;;  %v1320_v43 = vmul.f32 0.1, %v4812_v36  ;;  %v1401_v49 = vmax.f32 %v4775_v55, %v4028_v7  ;;  %v1402_v44 = vmax.f32 %v4777_v54, %v4038_v10  ;;  %v4813_v41 = vld [vmem:[#allocation76_spill] sm:$0xff]  ;;  %v4815_v7 = vld [vmem:[#allocation77_spill] sm:$0xff]  ;;  %v4816_v10 = vld [vmem:[#allocation59_spill] sm:$0xff] }
 0x2c3   :  { %2167 = vst [vmem:[%s4276_s4 + $0xe8] sm:$0xff] %v2047_v45   ;;  %v2067_v5 = vpack.c.bf16 %v1394_v39, %v1393_v63  ;;  %v1321_v50 = vmul.f32 0.1, %v4813_v41  ;;  %v1403_v4 = vmax.f32 %v4780_v62, %v4048_v35  ;;  %v1404_v57 = vmax.f32 %v4814_v46, %v4058_v30  ;;  %v4818_v35 = vld [vmem:[#allocation78_spill] sm:$0xff] }
 0x2c4   :  { %2168 = vst [vmem:[%s4276_s4 + $0xf0] sm:$0xff] %v2052_v15   ;;  %v2072_v55 = vpack.c.bf16 %v1396_v51, %v1395_v12  ;;  %v1322_v54 = vmul.f32 0.1, %v4815_v7  ;;  %v1405_v9 = vmax.f32 %v4817_v22, %v4816_v10  ;;  %v1406_v58 = vmax.f32 %v4792_v61, %v4078_v32 }
 0x2c5   :  { %2169 = vst [vmem:[%s4276_s4 + $0xf8] sm:$0xff] %v2057_v23   ;;  %v2077_v62 = vpack.c.bf16 %v1398_v11, %v1397_v47  ;;  %v1323_v30 = vmul.f32 0.1, %v4818_v35  ;;  %v1407_v33 = vmax.f32 %v4797_v25, %v4088_v3  ;;  %v1408_v59 = vmax.f32 %v4800_v56, %v4098_v6  ;;  %v4820_v3 = vld [vmem:[#allocation80_spill] sm:$0xff] }
 0x2c6   :  { %2170 = vst [vmem:[%s4276_s4 + $0x100] sm:$0xff] %v2062_v34   ;;  %v2082_v53 = vpack.c.bf16 %v1400_v28, %v1399_v14  ;;  %v1324_v61 = vmul.f32 0.1, %v4819_v8  ;;  %v1409_v32 = vmax.f32 %v4801_v13, %v4108_v48  ;;  %v1410_v37 = vmax.f32 %v4803_v20, %v4118_v21  ;;  %v4821_v48 = vld [vmem:[#allocation81_spill] sm:$0xff] }
 0x2c7   :  { %2171 = vst [vmem:[%s4276_s4 + $0x108] sm:$0xff] %v2067_v5   ;;  %v2087_v25 = vpack.c.bf16 %v1402_v44, %v1401_v49  ;;  %v1325_v56 = vmul.f32 0.1, %v4820_v3  ;;  %v1411_v6 = vmax.f32 %v4804_v19, %v4128_v18  ;;  %v1412_v60 = vmax.f32 %v4806_v42, %v4138_v29 }
 0x2c8   :  { %2172 = vst [vmem:[%s4276_s4 + $0x110] sm:$0xff] %v2072_v55   ;;  %v2092_v13 = vpack.c.bf16 %v1404_v57, %v1403_v4  ;;  %v1326_v20 = vmul.f32 0.1, %v4821_v48  ;;  %v1413_v21 = vmax.f32 %v4809_v52, %v4148_v0  ;;  %v1414_v24 = vmax.f32 %v4810_v2, %v1318_v31 }
 0x2c9   :  { %2173 = vst [vmem:[%s4276_s4 + $0x118] sm:$0xff] %v2077_v62   ;;  %v2097_v19 = vpack.c.bf16 %v1406_v58, %v1405_v9  ;;  %v1415_v18 = vmax.f32 %v4811_v16, %v1319_v1  ;;  %v1416_v17 = vmax.f32 %v4812_v36, %v1320_v43  ;;  %v2102_v27 = vpack.c.bf16 %v1408_v59, %v1407_v33 }
 0x2ca   :  { %2174 = vst [vmem:[%s4276_s4 + $0x120] sm:$0xff] %v2082_v53   ;;  %v1417_v26 = vmax.f32 %v4813_v41, %v1321_v50  ;;  %v1418_v42 = vmax.f32 %v4815_v7, %v1322_v54  ;;  %v2107_v29 = vpack.c.bf16 %v1410_v37, %v1409_v32  ;;  %v1419_v38 = vmax.f32 %v4818_v35, %v1323_v30 }
 0x2cb   :  { %2175 = vst [vmem:[%s4276_s4 + $0x128] sm:$0xff] %v2087_v25   ;;  %v1420_v40 = vmax.f32 %v4819_v8, %v1324_v61  ;;  %v2112_v63 = vpack.c.bf16 %v1412_v60, %v1411_v6  ;;  %v1421_v39 = vmax.f32 %v4820_v3, %v1325_v56  ;;  %v1422_v45 = vmax.f32 %v4821_v48, %v1326_v20 }
 0x2cc   :  { %2176 = vst [vmem:[%s4276_s4 + $0x130] sm:$0xff] %v2092_v13   ;;  %v2117_v52 = vpack.c.bf16 %v1414_v24, %v1413_v21  ;;  %v2122_v0 = vpack.c.bf16 %v1416_v17, %v1415_v18  ;;  %v2127_v12 = vpack.c.bf16 %v1418_v42, %v1417_v26 }
 0x2cd   :  { %2177 = vst [vmem:[%s4276_s4 + $0x138] sm:$0xff] %v2097_v19   ;;  %v2132_v51 = vpack.c.bf16 %v1420_v40, %v1419_v38  ;;  %v2137_v15 = vpack.c.bf16 %v1422_v45, %v1421_v39 }
 0x2ce   :  { %2178 = vst [vmem:[%s4276_s4 + $0x140] sm:$0xff] %v2102_v27  }
 0x2cf   :  { %2179 = vst [vmem:[%s4276_s4 + $0x148] sm:$0xff] %v2107_v29  }
 0x2d0   :  { %2180 = vst [vmem:[%s4276_s4 + $0x150] sm:$0xff] %v2112_v63  }
 0x2d1   :  { %2181 = vst [vmem:[%s4276_s4 + $0x158] sm:$0xff] %v2117_v52  }
 0x2d2   :  { %2182 = vst [vmem:[%s4276_s4 + $0x160] sm:$0xff] %v2122_v0  }
 0x2d3   :  { %2183 = vst [vmem:[%s4276_s4 + $0x168] sm:$0xff] %v2127_v12  }
 0x2d4   :  { %2184 = vst [vmem:[%s4276_s4 + $0x170] sm:$0xff] %v2132_v51  }
 0x2d5   :  { %2185 = vst [vmem:[%s4276_s4 + $0x178] sm:$0xff] %v2137_v15  }

// kernel: sn_discriminator_forward.6
= control target key start
LH: loop header
LB: loop body
LE: loop exit
PB: predicated region body
PF: predicated region fallthrough
CT: control target
= control target key end

     0   :  { %s1059_s1 = inlined_call_operand.vmem [shape: bf16[128,128], index: 1, kind: input, shape index: {}]   ;;  %s1060_s0 = inlined_call_operand.vmem [shape: bf16[192,128], index: 0, kind: input, shape index: {}]   ;;  %s1061_s2 = inlined_call_operand.vmem [shape: f32[1,128], index: 2, kind: input, shape index: {}]   ;;  %s1062_s3 = inlined_call_operand.vmem [shape: f32[1,128], index: 3, kind: input, shape index: {}]   ;;  %s1063_s4 = inlined_call_operand.vmem [shape: bf16[192,128], index: 4, kind: output, shape index: {}]  }
   0x1   :  { %v602_v0 = vld [vmem:[%s1059_s1 + $0x38] sm:$0xff]  ;;  %v601_v1 = vld [vmem:[%s1059_s1 + $0x30] sm:$0xff]  ;;  %v600_v2 = vld [vmem:[%s1059_s1 + $0x28] sm:$0xff] }
   0x2   :  { %177 = vmatpush.bf16.msra.mxu0 %v602_v0  ;;  %674 = vmatpush.bf16.msra.mxu1 %v602_v0  ;;  %v599_v3 = vld [vmem:[%s1059_s1 + $0x20] sm:$0xff]  ;;  %v598_v4 = vld [vmem:[%s1059_s1 + $0x18] sm:$0xff]  ;;  %v597_v5 = vld [vmem:[%s1059_s1 + $0x10] sm:$0xff] }
   0x3   :  { %675 = vmatpush.bf16.msra.mxu2 %v602_v0  ;;  %676 = vmatpush.bf16.msra.mxu3 %v602_v0  ;;  %v596_v6 = vld [vmem:[%s1059_s1 + $0x8] sm:$0xff]  ;;  %v595_v7 = vld [vmem:[%s1059_s1] sm:$0xff]  ;;  %v586_v9 = vld [vmem:[%s1060_s0 + $0x18] sm:$0xff] }
   0x4   :  { %v583_v8 = vld [vmem:[%s1060_s0] sm:$0xff]  ;;  %v589_v10 = vld [vmem:[%s1060_s0 + $0x30] sm:$0xff]  ;;  %v592_v11 = vld [vmem:[%s1060_s0 + $0x48] sm:$0xff] }
   0x5   :  { %v584_v12 = vld [vmem:[%s1060_s0 + $0x8] sm:$0xff]  ;;  %v587_v13 = vld [vmem:[%s1060_s0 + $0x20] sm:$0xff]  ;;  %v590_v14 = vld [vmem:[%s1060_s0 + $0x38] sm:$0xff] }
   0x6   :  { %178 = vmatpush.bf16.msra.mxu0 %v601_v1  ;;  %677 = vmatpush.bf16.msra.mxu1 %v601_v1  ;;  %v593_v15 = vld [vmem:[%s1060_s0 + $0x50] sm:$0xff]  ;;  %v588_v17 = vld [vmem:[%s1060_s0 + $0x28] sm:$0xff]  ;;  %v591_v18 = vld [vmem:[%s1060_s0 + $0x40] sm:$0xff] }
   0x7   :  { %678 = vmatpush.bf16.msra.mxu2 %v601_v1  ;;  %679 = vmatpush.bf16.msra.mxu3 %v601_v1  ;;  %v585_v16 = vld [vmem:[%s1060_s0 + $0x10] sm:$0xff]  ;;  %v594_v19 = vld [vmem:[%s1060_s0 + $0x58] sm:$0xff] }
   0xa   :  { %179 = vmatpush.bf16.msra.mxu0 %v600_v2  ;;  %680 = vmatpush.bf16.msra.mxu1 %v600_v2 }
   0xb   :  { %681 = vmatpush.bf16.msra.mxu2 %v600_v2  ;;  %682 = vmatpush.bf16.msra.mxu3 %v600_v2 }
   0xe   :  { %180 = vmatpush.bf16.msra.mxu0 %v599_v3  ;;  %683 = vmatpush.bf16.msra.mxu1 %v599_v3 }
   0xf   :  { %684 = vmatpush.bf16.msra.mxu2 %v599_v3  ;;  %685 = vmatpush.bf16.msra.mxu3 %v599_v3 }
  0x12   :  { %181 = vmatpush.bf16.msra.mxu0 %v598_v4  ;;  %686 = vmatpush.bf16.msra.mxu1 %v598_v4 }
  0x13   :  { %687 = vmatpush.bf16.msra.mxu2 %v598_v4  ;;  %688 = vmatpush.bf16.msra.mxu3 %v598_v4 }
  0x16   :  { %182 = vmatpush.bf16.msra.mxu0 %v597_v5  ;;  %689 = vmatpush.bf16.msra.mxu1 %v597_v5 }
  0x17   :  { %690 = vmatpush.bf16.msra.mxu2 %v597_v5  ;;  %691 = vmatpush.bf16.msra.mxu3 %v597_v5 }
  0x1a   :  { %183 = vmatpush.bf16.msra.mxu0 %v596_v6  ;;  %692 = vmatpush.bf16.msra.mxu1 %v596_v6 }
  0x1b   :  { %693 = vmatpush.bf16.msra.mxu2 %v596_v6  ;;  %694 = vmatpush.bf16.msra.mxu3 %v596_v6 }
  0x1e   :  { %184 = vmatpush.bf16.msra.mxu0 %v595_v7  ;;  %695 = vmatpush.bf16.msra.mxu1 %v595_v7 }
  0x1f   :  { %696 = vmatpush.bf16.msra.mxu2 %v595_v7  ;;  %697 = vmatpush.bf16.msra.mxu3 %v595_v7 }
  0x21   :  { %185 = vmatmul.bf16.vlgmr.msra.gmra.mxu0 %v583_v8  ;;  %200 = vmatmul.bf16.vlgmr.msra.gmra.mxu1 %v586_v9 }
  0x22   :  { %215 = vmatmul.bf16.vlgmr.msra.gmra.mxu2 %v589_v10  ;;  %230 = vmatmul.bf16.vlgmr.msra.gmra.mxu3 %v592_v11 }
  0x31   :  { %190 = vmatmul.bf16.gmra.mxu0 %v584_v12  ;;  %205 = vmatmul.bf16.gmra.mxu1 %v587_v13 }
  0x32   :  { %220 = vmatmul.bf16.gmra.mxu2 %v590_v14  ;;  %235 = vmatmul.bf16.gmra.mxu3 %v593_v15 }
  0x41   :  { %195 = vmatmul.bf16.gmra.mxu0 %v585_v16  ;;  %210 = vmatmul.bf16.gmra.mxu1 %v588_v17 }
  0x42   :  { %225 = vmatmul.bf16.gmra.mxu2 %v591_v18  ;;  %240 = vmatmul.bf16.gmra.mxu3 %v594_v19 }
  0x9e   :  { %v785_v20 = vpop.f32.mrf.mxu0  ;;  %v787_v21 = vpop.f32.mrf.mxu1 }
  0x9f   :  { %v275_v34 = vmul.f32 %v785_v20, %v785_v20  ;;  %v281_v52 = vmul.f32 %v787_v21, %v787_v21 }
  0xa5   :  { %v793_v24 = vpop.f32.mrf.mxu2  ;;  %v803_v29 = vpop.f32.mrf.mxu3 }
  0xa6   :  { %v789_v22 = vpop.f32.mrf.mxu0  ;;  %v791_v23 = vpop.f32.mrf.mxu1  ;;  %v287_v10 = vmul.f32 %v793_v24, %v793_v24 }
  0xa7   :  { %v276_v31 = vmul.f32 %v789_v22, %v789_v22  ;;  %v246_v35 = vadd.f32 %v789_v22, %v785_v20  ;;  %v282_v56 = vmul.f32 %v791_v23, %v791_v23 }
  0xa9   :  { %v299_v38 = vadd.f32 %v276_v31, %v275_v34 }
  0xad   :  { %v799_v27 = vpop.f32.mrf.mxu2  ;;  %v819_v37 = vpop.f32.mrf.mxu3 }
  0xae   :  { %v795_v25 = vpop.f32.mrf.mxu0  ;;  %v797_v26 = vpop.f32.mrf.mxu1  ;;  %v288_v13 = vmul.f32 %v799_v27, %v799_v27 }
  0xaf   :  { %v277_v36 = vmul.f32 %v795_v25, %v795_v25  ;;  %v247_v39 = vadd.f32 %v246_v35, %v795_v25  ;;  %v283_v59 = vmul.f32 %v797_v26, %v797_v26 }
  0xb1   :  { %v300_v41 = vadd.f32 %v299_v38, %v277_v36 }
  0xb5   :  { %v811_v33 = vpop.f32.mrf.mxu2  ;;  %v840_v55 = vpop.f32.mrf.mxu3 }
  0xb6   :  { %v801_v28 = vpop.f32.mrf.mxu0  ;;  %v805_v30 = vpop.f32.mrf.mxu1  ;;  %v289_v16 = vmul.f32 %v811_v33, %v811_v33 }
  0xb7   :  { %v278_v40 = vmul.f32 %v801_v28, %v801_v28  ;;  %v248_v42 = vadd.f32 %v247_v39, %v801_v28  ;;  %v284_v62 = vmul.f32 %v805_v30, %v805_v30 }
  0xb9   :  { %v301_v44 = vadd.f32 %v300_v41, %v278_v40 }
  0xbd   :  { %v835_v51 = vpop.f32.mrf.mxu2  ;;  %v861_v9 = vpop.f32.mrf.mxu3 }
  0xbe   :  { %v809_v32 = vpop.f32.mrf.mxu0  ;;  %v828_v46 = vpop.f32.mrf.mxu1  ;;  %v290_v19 = vmul.f32 %v835_v51, %v835_v51 }
  0xbf   :  { %v279_v43 = vmul.f32 %v809_v32, %v809_v32  ;;  %v249_v45 = vadd.f32 %v248_v42, %v809_v32  ;;  %v285_v2 = vmul.f32 %v828_v46, %v828_v46 }
  0xc1   :  { %v302_v48 = vadd.f32 %v301_v44, %v279_v43  ;;  %v293_v44 = vmul.f32 %v803_v29, %v803_v29 }
  0xc5   :  { %v856_v5 = vpop.f32.mrf.mxu2  ;;  %v880_v40 = vpop.f32.mrf.mxu3 }
  0xc6   :  { %v830_v47 = vpop.f32.mrf.mxu0  ;;  %v851_v1 = vpop.f32.mrf.mxu1  ;;  %v291_v38 = vmul.f32 %v856_v5, %v856_v5 }
  0xc7   :  { %v250_v49 = vadd.f32 %v249_v45, %v830_v47  ;;  %v280_v50 = vmul.f32 %v830_v47, %v830_v47  ;;  %v286_v7 = vmul.f32 %v851_v1, %v851_v1 }
  0xc9   :  { %v251_v53 = vadd.f32 %v250_v49, %v787_v21  ;;  %v303_v54 = vadd.f32 %v302_v48, %v280_v50  ;;  %v294_v49 = vmul.f32 %v819_v37, %v819_v37 }
  0xcb   :  { %v252_v57 = vadd.f32 %v251_v53, %v791_v23  ;;  %v304_v58 = vadd.f32 %v303_v54, %v281_v52  ;;  %v295_v53 = vmul.f32 %v840_v55, %v840_v55 }
  0xcd   :  { %v305_v60 = vadd.f32 %v304_v58, %v282_v56  ;;  %v253_v61 = vadd.f32 %v252_v57, %v797_v26  ;;  %v875_v35 = vpop.f32.mrf.mxu2  ;;  %v296_v57 = vmul.f32 %v861_v9, %v861_v9 }
  0xce   :  { %v292_v43 = vmul.f32 %v875_v35, %v875_v35 }
  0xcf   :  { %v254_v63 = vadd.f32 %v253_v61, %v805_v30  ;;  %v306_v0 = vadd.f32 %v305_v60, %v283_v59  ;;  %v897_v60 = vpop.f32.mrf.mxu3 }
  0xd1   :  { %v255_v3 = vadd.f32 %v254_v63, %v828_v46  ;;  %v307_v4 = vadd.f32 %v306_v0, %v284_v62  ;;  %v297_v62 = vmul.f32 %v880_v40, %v880_v40 }
  0xd3   :  { %v256_v6 = vadd.f32 %v255_v3, %v851_v1  ;;  %v308_v8 = vadd.f32 %v307_v4, %v285_v2  ;;  %v298_v3 = vmul.f32 %v897_v60, %v897_v60 }
  0xd5   :  { %v257_v11 = vadd.f32 %v256_v6, %v793_v24  ;;  %v309_v12 = vadd.f32 %v308_v8, %v286_v7 }
  0xd7   :  { %v258_v14 = vadd.f32 %v257_v11, %v799_v27  ;;  %v310_v15 = vadd.f32 %v309_v12, %v287_v10 }
  0xd9   :  { %v311_v17 = vadd.f32 %v310_v15, %v288_v13  ;;  %v259_v18 = vadd.f32 %v258_v14, %v811_v33 }
  0xdb   :  { %v260_v31 = vadd.f32 %v259_v18, %v835_v51  ;;  %v312_v34 = vadd.f32 %v311_v17, %v289_v16 }
  0xdd   :  { %v261_v36 = vadd.f32 %v260_v31, %v856_v5  ;;  %v313_v39 = vadd.f32 %v312_v34, %v290_v19 }
  0xdf   :  { %v314_v41 = vadd.f32 %v313_v39, %v291_v38  ;;  %v262_v42 = vadd.f32 %v261_v36, %v875_v35 }
  0xe1   :  { %v263_v45 = vadd.f32 %v262_v42, %v803_v29  ;;  %v315_v48 = vadd.f32 %v314_v41, %v292_v43 }
  0xe3   :  { %v264_v50 = vadd.f32 %v263_v45, %v819_v37  ;;  %v316_v52 = vadd.f32 %v315_v48, %v293_v44  ;;  %v333_v48 = vld [vmem:[%s1061_s2] sm:$0x1] }
  0xe5   :  { %v317_v54 = vadd.f32 %v316_v52, %v294_v49  ;;  %v265_v56 = vadd.f32 %v264_v50, %v840_v55 }
  0xe7   :  { %v266_v58 = vadd.f32 %v265_v56, %v861_v9  ;;  %v318_v59 = vadd.f32 %v317_v54, %v295_v53  ;;  %v346_v54 = vld [vmem:[%s1062_s3] sm:$0x1] }
  0xe9   :  { %v267_v61 = vadd.f32 %v266_v58, %v880_v40  ;;  %v319_v63 = vadd.f32 %v318_v59, %v296_v57 }
  0xeb   :  { %v320_v0 = vadd.f32 %v319_v63, %v297_v62  ;;  %v268_v2 = vadd.f32 %v267_v61, %v897_v60 }
  0xed   :  { %v269_v4 = vrot.slane %v268_v2, 4  ;;  %v321_v6 = vadd.f32 %v320_v0, %v298_v3 }
  0xef   :  { %v270_v7 = vadd.f32 %v269_v4, %v268_v2  ;;  %v322_v8 = vrot.slane %v321_v6, 4 }
  0xf1   :  { %v271_v10 = vrot.slane %v270_v7, 2  ;;  %v323_v11 = vadd.f32 %v322_v8, %v321_v6 }
  0xf3   :  { %v272_v12 = vadd.f32 %v271_v10, %v270_v7  ;;  %v324_v13 = vrot.slane %v323_v11, 2 }
  0xf5   :  { %v273_v14 = vrot.slane %v272_v12, 1  ;;  %v325_v15 = vadd.f32 %v324_v13, %v323_v11 }
  0xf7   :  { %v274_v16 = vadd.f32 %v273_v14, %v272_v12  ;;  %v326_v17 = vrot.slane %v325_v15, 1 }
  0xf9   :  { %v327_v18 = vadd.f32 %v326_v17, %v325_v15  ;;  %v328_v19 = vmul.f32 0.0052083335, %v274_v16 }
  0xfb   :  { %v329_v31 = vmul.f32 0.0052083335, %v327_v18  ;;  %v330_v34 = vmul.f32 %v328_v19, %v328_v19 }
  0xfd   :  { %v331_v36 = vsub.f32 %v329_v31, %v330_v34 }
  0xff   :  { %v332_v38 = vmax.f32 %v331_v36, 0.0 }
 0x101   :  { %v334_v39 = vadd.f32 1e-05, %v332_v38 }
 0x103   :  { %698 = vrsqrt.f32 %v334_v39  ;;  %vm341_vm1 = vweird.f32 %v334_v39 }
 0x109   :  { %v699_v41 = vpop.eup %698 }
 0x10a   :  { %v336_v42 = vmul.f32 %v699_v41, %v334_v39  ;;  %vm342_vm0 = vweird.f32 %v699_v41 }
 0x10b   :  { %vm343_vm2 = vmor %vm341_vm1, %vm342_vm0 }
 0x10c   :  { %v337_v43 = vmul.f32 %v699_v41, %v336_v42 }
 0x10e   :  { %v338_v44 = vmul.f32 0.5, %v337_v43 }
 0x110   :  { %v339_v45 = vsub.f32 1.5, %v338_v44 }
 0x112   :  { %v340_v49 = vmul.f32 %v699_v41, %v339_v45 }
 0x114   :  { %v344_v50 = vsel %vm343_vm2, %v699_v41, %v340_v49 }
 0x115   :  { %v345_v52 = vmul.f32 %v344_v50, %v333_v48 }
 0x117   :  { %v347_v53 = vmul.f32 %v345_v52, %v328_v19  ;;  %v350_v56 = vperm.slane %v345_v52, 0 }
 0x119   :  { %v348_v57 = vsub.f32 %v346_v54, %v347_v53  ;;  %v352_v58 = vmul.f32 %v350_v56, %v785_v20  ;;  %v353_v59 = vmul.f32 %v350_v56, %v789_v22  ;;  %v354_v61 = vmul.f32 %v350_v56, %v795_v25 }
 0x11a   :  { %v355_v62 = vmul.f32 %v350_v56, %v801_v28  ;;  %v356_v63 = vmul.f32 %v350_v56, %v809_v32  ;;  %v357_v0 = vmul.f32 %v350_v56, %v830_v47  ;;  %v358_v2 = vmul.f32 %v350_v56, %v787_v21 }
 0x11b   :  { %v359_v3 = vmul.f32 %v350_v56, %v791_v23  ;;  %v360_v4 = vmul.f32 %v350_v56, %v797_v26  ;;  %v361_v6 = vmul.f32 %v350_v56, %v805_v30  ;;  %v362_v20 = vmul.f32 %v350_v56, %v828_v46 }
 0x11c   :  { %v363_v22 = vmul.f32 %v350_v56, %v851_v1  ;;  %v377_v7 = vperm.slane %v348_v57, 0  ;;  %v364_v25 = vmul.f32 %v350_v56, %v793_v24  ;;  %v365_v28 = vmul.f32 %v350_v56, %v799_v27 }
 0x11d   :  { %v366_v32 = vmul.f32 %v350_v56, %v811_v33  ;;  %v367_v47 = vmul.f32 %v350_v56, %v835_v51  ;;  %v368_v21 = vmul.f32 %v350_v56, %v856_v5  ;;  %v369_v23 = vmul.f32 %v350_v56, %v875_v35 }
 0x11e   :  { %v370_v26 = vmul.f32 %v350_v56, %v803_v29  ;;  %v371_v30 = vmul.f32 %v350_v56, %v819_v37  ;;  %v372_v46 = vmul.f32 %v350_v56, %v840_v55  ;;  %v373_v1 = vmul.f32 %v350_v56, %v861_v9 }
 0x11f   :  { %v374_v24 = vmul.f32 %v350_v56, %v880_v40  ;;  %v375_v27 = vmul.f32 %v350_v56, %v897_v60  ;;  %v935_v8 = vadd.f32 %v377_v7, %v352_v58  ;;  %v937_v33 = vadd.f32 %v377_v7, %v353_v59 }
 0x120   :  { %v939_v51 = vadd.f32 %v377_v7, %v354_v61  ;;  %v382_v5 = vadd.f32 %v377_v7, %v355_v62  ;;  %v941_v35 = vadd.f32 %v377_v7, %v356_v63  ;;  %v943_v29 = vadd.f32 %v377_v7, %v357_v0 }
 0x121   :  { %v945_v37 = vadd.f32 %v377_v7, %v358_v2  ;;  %v386_v55 = vadd.f32 %v377_v7, %v359_v3  ;;  %v947_v10 = vadd.f32 %v377_v7, %v360_v4  ;;  %v949_v9 = vadd.f32 %v377_v7, %v361_v6 }
 0x122   :  { %v951_v40 = vadd.f32 %v377_v7, %v362_v20  ;;  %v953_v60 = vadd.f32 %v377_v7, %v363_v22  ;;  %v955_v11 = vadd.f32 %v377_v7, %v364_v25  ;;  %v957_v12 = vadd.f32 %v377_v7, %v365_v28 }
 0x123   :  { %v959_v13 = vadd.f32 %v377_v7, %v366_v32  ;;  %v961_v14 = vadd.f32 %v377_v7, %v367_v47  ;;  %v963_v15 = vadd.f32 %v377_v7, %v368_v21  ;;  %v965_v16 = vadd.f32 %v377_v7, %v369_v23 }
 0x124   :  { %v967_v17 = vadd.f32 %v377_v7, %v370_v26  ;;  %v403_v18 = vmul.f32 0.1, %v935_v8  ;;  %v970_v19 = vadd.f32 %v377_v7, %v371_v30  ;;  %v972_v31 = vadd.f32 %v377_v7, %v372_v46 }
 0x125   :  { %v974_v34 = vadd.f32 %v377_v7, %v373_v1  ;;  %v404_v36 = vmul.f32 0.1, %v937_v33  ;;  %v977_v38 = vadd.f32 %v377_v7, %v374_v24  ;;  %v405_v39 = vmul.f32 0.1, %v939_v51 }
 0x126   :  { %v406_v41 = vmul.f32 0.1, %v382_v5  ;;  %v407_v42 = vmul.f32 0.1, %v941_v35  ;;  %v981_v43 = vadd.f32 %v377_v7, %v375_v27  ;;  %v408_v44 = vmul.f32 0.1, %v943_v29 }
 0x127   :  { %v409_v45 = vmul.f32 0.1, %v945_v37  ;;  %v410_v48 = vmul.f32 0.1, %v386_v55  ;;  %v411_v49 = vmul.f32 0.1, %v947_v10  ;;  %v427_v53 = vmax.f32 %v935_v8, %v403_v18 }
 0x128   :  { %v412_v50 = vmul.f32 0.1, %v949_v9  ;;  %v413_v52 = vmul.f32 0.1, %v951_v40  ;;  %v414_v54 = vmul.f32 0.1, %v953_v60  ;;  %v428_v58 = vmax.f32 %v937_v33, %v404_v36 }
 0x129   :  { %v415_v56 = vmul.f32 0.1, %v955_v11  ;;  %v416_v57 = vmul.f32 0.1, %v957_v12  ;;  %v417_v59 = vmul.f32 0.1, %v959_v13  ;;  %v429_v63 = vmax.f32 %v939_v51, %v405_v39 }
 0x12a   :  { %v418_v61 = vmul.f32 0.1, %v961_v14  ;;  %v419_v62 = vmul.f32 0.1, %v963_v15  ;;  %v420_v0 = vmul.f32 0.1, %v965_v16  ;;  %v430_v4 = vmax.f32 %v382_v5, %v406_v41 }
 0x12b   :  { %v421_v2 = vmul.f32 0.1, %v967_v17  ;;  %v422_v3 = vmul.f32 0.1, %v970_v19  ;;  %v431_v6 = vmax.f32 %v941_v35, %v407_v42  ;;  %v432_v20 = vmax.f32 %v943_v29, %v408_v44 }
 0x12c   :  { %v433_v22 = vmax.f32 %v945_v37, %v409_v45  ;;  %v434_v7 = vmax.f32 %v386_v55, %v410_v48  ;;  %v423_v25 = vmul.f32 0.1, %v972_v31  ;;  %v424_v28 = vmul.f32 0.1, %v974_v34 }
 0x12d   :  { %v435_v32 = vmax.f32 %v947_v10, %v411_v49  ;;  %v436_v47 = vmax.f32 %v949_v9, %v412_v50  ;;  %v425_v21 = vmul.f32 0.1, %v977_v38  ;;  %v426_v23 = vmul.f32 0.1, %v981_v43 }
 0x12e   :  { %v437_v26 = vmax.f32 %v951_v40, %v413_v52  ;;  %v438_v30 = vmax.f32 %v953_v60, %v414_v54  ;;  %v439_v46 = vmax.f32 %v955_v11, %v415_v56  ;;  %v440_v1 = vmax.f32 %v957_v12, %v416_v57 }
 0x12f   :  { %v606_v24 = vpack.c.bf16 %v428_v58, %v427_v53  ;;  %v611_v27 = vpack.c.bf16 %v430_v4, %v429_v63  ;;  %v441_v8 = vmax.f32 %v959_v13, %v417_v59  ;;  %v442_v33 = vmax.f32 %v961_v14, %v418_v61 }
 0x130   :  { %v616_v51 = vpack.c.bf16 %v432_v20, %v431_v6  ;;  %v621_v5 = vpack.c.bf16 %v434_v7, %v433_v22  ;;  %v443_v35 = vmax.f32 %v963_v15, %v419_v62  ;;  %v444_v29 = vmax.f32 %v965_v16, %v420_v0 }
 0x131   :  { %607 = vst [vmem:[%s1063_s4] sm:$0xff] %v606_v24   ;;  %v626_v37 = vpack.c.bf16 %v436_v47, %v435_v32  ;;  %v445_v55 = vmax.f32 %v967_v17, %v421_v2  ;;  %v446_v10 = vmax.f32 %v970_v19, %v422_v3  ;;  %v631_v9 = vpack.c.bf16 %v438_v30, %v437_v26 }
 0x132   :  { %663 = vst [vmem:[%s1063_s4 + $0x8] sm:$0xff] %v611_v27   ;;  %v447_v40 = vmax.f32 %v972_v31, %v423_v25  ;;  %v448_v60 = vmax.f32 %v974_v34, %v424_v28  ;;  %v636_v11 = vpack.c.bf16 %v440_v1, %v439_v46  ;;  %v449_v12 = vmax.f32 %v977_v38, %v425_v21 }
 0x133   :  { %664 = vst [vmem:[%s1063_s4 + $0x10] sm:$0xff] %v616_v51   ;;  %v450_v13 = vmax.f32 %v981_v43, %v426_v23  ;;  %v641_v14 = vpack.c.bf16 %v442_v33, %v441_v8  ;;  %v646_v15 = vpack.c.bf16 %v444_v29, %v443_v35  ;;  %v651_v16 = vpack.c.bf16 %v446_v10, %v445_v55 }
 0x134   :  { %665 = vst [vmem:[%s1063_s4 + $0x18] sm:$0xff] %v621_v5   ;;  %v656_v17 = vpack.c.bf16 %v448_v60, %v447_v40 }
 0x135   :  { %666 = vst [vmem:[%s1063_s4 + $0x20] sm:$0xff] %v626_v37   ;;  %v661_v18 = vpack.c.bf16 %v450_v13, %v449_v12 }
 0x136   :  { %667 = vst [vmem:[%s1063_s4 + $0x28] sm:$0xff] %v631_v9  }
 0x137   :  { %668 = vst [vmem:[%s1063_s4 + $0x30] sm:$0xff] %v636_v11  }
 0x138   :  { %669 = vst [vmem:[%s1063_s4 + $0x38] sm:$0xff] %v641_v14  }
 0x139   :  { %670 = vst [vmem:[%s1063_s4 + $0x40] sm:$0xff] %v646_v15  }
 0x13a   :  { %671 = vst [vmem:[%s1063_s4 + $0x48] sm:$0xff] %v651_v16  }
 0x13b   :  { %672 = vst [vmem:[%s1063_s4 + $0x50] sm:$0xff] %v656_v17  }
 0x13c   :  { %673 = vst [vmem:[%s1063_s4 + $0x58] sm:$0xff] %v661_v18  }

// kernel: sn_discriminator_forward.8
= control target key start
LH: loop header
LB: loop body
LE: loop exit
PB: predicated region body
PF: predicated region fallthrough
CT: control target
= control target key end

     0   :  { %s605_s1 = inlined_call_operand.vmem [shape: bf16[256,128], index: 1, kind: input, shape index: {}]   ;;  %s606_s0 = inlined_call_operand.vmem [shape: bf16[48,256], index: 0, kind: input, shape index: {}]   ;;  %s607_s2 = inlined_call_operand.vmem [shape: f32[1,128], index: 2, kind: input, shape index: {}]   ;;  %s608_s3 = inlined_call_operand.vmem [shape: f32[1,128], index: 3, kind: input, shape index: {}]   ;;  %s609_s4 = inlined_call_operand.vmem [shape: bf16[48,128], index: 4, kind: output, shape index: {}]  }
   0x1   :  { %v425_v0 = vld [vmem:[%s605_s1 + $0x38] sm:$0xff]  ;;  %v424_v2 = vld [vmem:[%s605_s1 + $0x30] sm:$0xff]  ;;  %v423_v4 = vld [vmem:[%s605_s1 + $0x28] sm:$0xff] }
   0x2   :  { %v433_v1 = vld [vmem:[%s605_s1 + $0x78] sm:$0xff]  ;;  %181 = vmatpush.bf16.msra.mxu0 %v425_v0  ;;  %451 = vmatpush.bf16.msra.mxu2 %v425_v0  ;;  %v432_v3 = vld [vmem:[%s605_s1 + $0x70] sm:$0xff]  ;;  %v431_v5 = vld [vmem:[%s605_s1 + $0x68] sm:$0xff] }
   0x3   :  { %205 = vmatpush.bf16.msra.mxu1 %v433_v1  ;;  %459 = vmatpush.bf16.msra.mxu3 %v433_v1  ;;  %v422_v6 = vld [vmem:[%s605_s1 + $0x20] sm:$0xff]  ;;  %v421_v8 = vld [vmem:[%s605_s1 + $0x18] sm:$0xff]  ;;  %v420_v10 = vld [vmem:[%s605_s1 + $0x10] sm:$0xff] }
   0x4   :  { %v430_v7 = vld [vmem:[%s605_s1 + $0x60] sm:$0xff]  ;;  %v429_v9 = vld [vmem:[%s605_s1 + $0x58] sm:$0xff]  ;;  %v428_v11 = vld [vmem:[%s605_s1 + $0x50] sm:$0xff] }
   0x5   :  { %v419_v12 = vld [vmem:[%s605_s1 + $0x8] sm:$0xff]  ;;  %v418_v14 = vld [vmem:[%s605_s1] sm:$0xff]  ;;  %v334_v18 = vld [vmem:[%s606_s0 + $0x10] sm:$0xf] }
   0x6   :  { %182 = vmatpush.bf16.msra.mxu0 %v424_v2  ;;  %452 = vmatpush.bf16.msra.mxu2 %v424_v2  ;;  %v427_v13 = vld [vmem:[%s605_s1 + $0x48] sm:$0xff]  ;;  %v426_v15 = vld [vmem:[%s605_s1 + $0x40] sm:$0xff]  ;;  %v415_v19 = vld [vmem:[%s606_s0 + $0x14] sm:$0xf0] }
   0x7   :  { %206 = vmatpush.bf16.msra.mxu1 %v432_v3  ;;  %460 = vmatpush.bf16.msra.mxu3 %v432_v3  ;;  %v326_v16 = vld [vmem:[%s606_s0] sm:$0xf]  ;;  %v413_v17 = vld [vmem:[%s606_s0 + $0x4] sm:$0xf0]  ;;  %v412_v20 = vld [vmem:[%s606_s0 + $0x4] sm:$0xf]  ;;  %v335_v25 = vor.u32 %v415_v19, %v334_v18 }
   0x8   :  { %v328_v21 = vld [vmem:[%s606_s0 + $0x8] sm:$0xf0]  ;;  %v414_v22 = vld [vmem:[%s606_s0 + $0x14] sm:$0xf]  ;;  %v336_v23 = vld [vmem:[%s606_s0 + $0x18] sm:$0xf0]  ;;  %v327_v24 = vor.u32 %v413_v17, %v326_v16 }
   0x9   :  { %v331_v26 = vor.u32 %v412_v20, %v328_v21  ;;  %v339_v27 = vor.u32 %v414_v22, %v336_v23  ;;  %v342_v28 = vld [vmem:[%s606_s0 + $0x20] sm:$0xf]  ;;  %v417_v29 = vld [vmem:[%s606_s0 + $0x24] sm:$0xf0]  ;;  %v416_v30 = vld [vmem:[%s606_s0 + $0x24] sm:$0xf] }
   0xa   :  { %183 = vmatpush.bf16.msra.mxu0 %v423_v4  ;;  %453 = vmatpush.bf16.msra.mxu2 %v423_v4  ;;  %v344_v31 = vld [vmem:[%s606_s0 + $0x28] sm:$0xf0]  ;;  %v343_v32 = vor.u32 %v417_v29, %v342_v28 }
   0xb   :  { %207 = vmatpush.bf16.msra.mxu1 %v431_v5  ;;  %461 = vmatpush.bf16.msra.mxu3 %v431_v5  ;;  %v347_v33 = vor.u32 %v416_v30, %v344_v31  ;;  %v275_v31 = vld [vmem:[%s608_s3] sm:$0x1] }
   0xe   :  { %184 = vmatpush.bf16.msra.mxu0 %v422_v6  ;;  %454 = vmatpush.bf16.msra.mxu2 %v422_v6 }
   0xf   :  { %208 = vmatpush.bf16.msra.mxu1 %v430_v7  ;;  %462 = vmatpush.bf16.msra.mxu3 %v430_v7 }
  0x12   :  { %185 = vmatpush.bf16.msra.mxu0 %v421_v8  ;;  %455 = vmatpush.bf16.msra.mxu2 %v421_v8 }
  0x13   :  { %209 = vmatpush.bf16.msra.mxu1 %v429_v9  ;;  %463 = vmatpush.bf16.msra.mxu3 %v429_v9 }
  0x16   :  { %186 = vmatpush.bf16.msra.mxu0 %v420_v10  ;;  %456 = vmatpush.bf16.msra.mxu2 %v420_v10 }
  0x17   :  { %210 = vmatpush.bf16.msra.mxu1 %v428_v11  ;;  %464 = vmatpush.bf16.msra.mxu3 %v428_v11 }
  0x1a   :  { %187 = vmatpush.bf16.msra.mxu0 %v419_v12  ;;  %457 = vmatpush.bf16.msra.mxu2 %v419_v12 }
  0x1b   :  { %211 = vmatpush.bf16.msra.mxu1 %v427_v13  ;;  %465 = vmatpush.bf16.msra.mxu3 %v427_v13 }
  0x1e   :  { %188 = vmatpush.bf16.msra.mxu0 %v418_v14  ;;  %458 = vmatpush.bf16.msra.mxu2 %v418_v14 }
  0x1f   :  { %212 = vmatpush.bf16.msra.mxu1 %v426_v15  ;;  %466 = vmatpush.bf16.msra.mxu3 %v426_v15 }
  0x21   :  { %189 = vmatmul.bf16.vlgmr.msra.gmra.mxu0 %v327_v24  ;;  %194 = vmatmul.bf16.vlgmr.msra.gmra.mxu2 %v335_v25 }
  0x22   :  { %213 = vmatmul.bf16.vlgmr.msra.gmra.mxu1 %v331_v26  ;;  %218 = vmatmul.bf16.vlgmr.msra.gmra.mxu3 %v339_v27  ;;  %v262_v27 = vld [vmem:[%s607_s2] sm:$0x1] }
  0x31   :  { %199 = vmatmul.bf16.gmra.mxu2 %v343_v32 }
  0x32   :  { %223 = vmatmul.bf16.gmra.mxu3 %v347_v33 }
  0x9e   :  { %v190_v34 = vpop.f32.mrf.mxu0 }
  0x9f   :  { %v214_v35 = vpop.f32.mrf.mxu1 }
  0xa0   :  { %v578_v42 = vadd.f32 %v214_v35, %v190_v34 }
  0xa2   :  { %v240_v44 = vmul.f32 %v578_v42, %v578_v42 }
  0xa4   :  { %v195_v36 = vpop.f32.mrf.mxu2 }
  0xa5   :  { %v219_v37 = vpop.f32.mrf.mxu3 }
  0xa6   :  { %v192_v38 = vpop.f32.mrf.mxu0  ;;  %v220_v48 = vadd.f32 %v219_v37, %v195_v36 }
  0xa7   :  { %v216_v40 = vpop.f32.mrf.mxu1 }
  0xa8   :  { %v580_v43 = vadd.f32 %v216_v40, %v192_v38  ;;  %v242_v53 = vmul.f32 %v220_v48, %v220_v48 }
  0xaa   :  { %v241_v45 = vmul.f32 %v580_v43, %v580_v43  ;;  %v229_v49 = vadd.f32 %v580_v43, %v578_v42 }
  0xac   :  { %v197_v39 = vpop.f32.mrf.mxu2  ;;  %v246_v51 = vadd.f32 %v241_v45, %v240_v44  ;;  %v230_v54 = vadd.f32 %v229_v49, %v220_v48 }
  0xad   :  { %v221_v41 = vpop.f32.mrf.mxu3 }
  0xae   :  { %v222_v50 = vadd.f32 %v221_v41, %v197_v39  ;;  %v247_v57 = vadd.f32 %v246_v51, %v242_v53 }
  0xb0   :  { %v243_v55 = vmul.f32 %v222_v50, %v222_v50  ;;  %v231_v56 = vadd.f32 %v230_v54, %v222_v50 }
  0xb2   :  { %v248_v61 = vadd.f32 %v247_v57, %v243_v55 }
  0xb4   :  { %v200_v46 = vpop.f32.mrf.mxu2 }
  0xb5   :  { %v224_v47 = vpop.f32.mrf.mxu3 }
  0xb6   :  { %v225_v52 = vadd.f32 %v224_v47, %v200_v46 }
  0xb8   :  { %v244_v58 = vmul.f32 %v225_v52, %v225_v52  ;;  %v232_v62 = vadd.f32 %v231_v56, %v225_v52 }
  0xba   :  { %v249_v0 = vadd.f32 %v248_v61, %v244_v58 }
  0xbc   :  { %v202_v59 = vpop.f32.mrf.mxu2 }
  0xbd   :  { %v226_v60 = vpop.f32.mrf.mxu3 }
  0xbe   :  { %v227_v63 = vadd.f32 %v226_v60, %v202_v59 }
  0xc0   :  { %v233_v1 = vadd.f32 %v232_v62, %v227_v63  ;;  %v245_v2 = vmul.f32 %v227_v63, %v227_v63 }
  0xc2   :  { %v234_v3 = vrot.slane %v233_v1, 4  ;;  %v250_v4 = vadd.f32 %v249_v0, %v245_v2 }
  0xc4   :  { %v235_v5 = vadd.f32 %v234_v3, %v233_v1  ;;  %v251_v6 = vrot.slane %v250_v4, 4 }
  0xc6   :  { %v236_v7 = vrot.slane %v235_v5, 2  ;;  %v252_v8 = vadd.f32 %v251_v6, %v250_v4 }
  0xc8   :  { %v237_v9 = vadd.f32 %v236_v7, %v235_v5  ;;  %v253_v10 = vrot.slane %v252_v8, 2 }
  0xca   :  { %v238_v11 = vrot.slane %v237_v9, 1  ;;  %v254_v12 = vadd.f32 %v253_v10, %v252_v8 }
  0xcc   :  { %v239_v13 = vadd.f32 %v238_v11, %v237_v9  ;;  %v255_v14 = vrot.slane %v254_v12, 1 }
  0xce   :  { %v256_v15 = vadd.f32 %v255_v14, %v254_v12  ;;  %v257_v16 = vmul.f32 0.020833334, %v239_v13 }
  0xd0   :  { %v258_v17 = vmul.f32 0.020833334, %v256_v15  ;;  %v259_v18 = vmul.f32 %v257_v16, %v257_v16 }
  0xd2   :  { %v260_v19 = vsub.f32 %v258_v17, %v259_v18 }
  0xd4   :  { %v261_v20 = vmax.f32 %v260_v19, 0.0 }
  0xd6   :  { %v263_v21 = vadd.f32 1e-05, %v261_v20 }
  0xd8   :  { %467 = vrsqrt.f32 %v263_v21  ;;  %vm270_vm1 = vweird.f32 %v263_v21 }
  0xde   :  { %v468_v22 = vpop.eup %467 }
  0xdf   :  { %v265_v23 = vmul.f32 %v468_v22, %v263_v21  ;;  %vm271_vm0 = vweird.f32 %v468_v22 }
  0xe0   :  { %vm272_vm2 = vmor %vm270_vm1, %vm271_vm0 }
  0xe1   :  { %v266_v24 = vmul.f32 %v468_v22, %v265_v23 }
  0xe3   :  { %v267_v25 = vmul.f32 0.5, %v266_v24 }
  0xe5   :  { %v268_v26 = vsub.f32 1.5, %v267_v25 }
  0xe7   :  { %v269_v28 = vmul.f32 %v468_v22, %v268_v26 }
  0xe9   :  { %v273_v29 = vsel %vm272_vm2, %v468_v22, %v269_v28 }
  0xea   :  { %v274_v30 = vmul.f32 %v273_v29, %v262_v27 }
  0xec   :  { %v276_v32 = vmul.f32 %v274_v30, %v257_v16  ;;  %v279_v33 = vperm.slane %v274_v30, 0 }
  0xee   :  { %v277_v34 = vsub.f32 %v275_v31, %v276_v32  ;;  %v281_v35 = vmul.f32 %v279_v33, %v578_v42  ;;  %v282_v36 = vmul.f32 %v279_v33, %v580_v43  ;;  %v283_v37 = vmul.f32 %v279_v33, %v220_v48 }
  0xef   :  { %v284_v38 = vmul.f32 %v279_v33, %v222_v50  ;;  %v285_v40 = vmul.f32 %v279_v33, %v225_v52  ;;  %v286_v41 = vmul.f32 %v279_v33, %v227_v63 }
  0xf0   :  { %v288_v39 = vperm.slane %v277_v34, 0 }
  0xf2   :  { %v290_v44 = vadd.f32 %v288_v39, %v281_v35  ;;  %v291_v45 = vadd.f32 %v288_v39, %v282_v36  ;;  %v292_v46 = vadd.f32 %v288_v39, %v283_v37  ;;  %v293_v47 = vadd.f32 %v288_v39, %v284_v38 }
  0xf3   :  { %v294_v49 = vadd.f32 %v288_v39, %v285_v40  ;;  %v295_v51 = vadd.f32 %v288_v39, %v286_v41 }
  0xf4   :  { %v296_v53 = vmul.f32 0.1, %v290_v44  ;;  %v297_v54 = vmul.f32 0.1, %v291_v45  ;;  %v298_v55 = vmul.f32 0.1, %v292_v46 }
  0xf5   :  { %v299_v56 = vmul.f32 0.1, %v293_v47  ;;  %v300_v57 = vmul.f32 0.1, %v294_v49  ;;  %v301_v58 = vmul.f32 0.1, %v295_v51 }
  0xf6   :  { %v302_v42 = vmax.f32 %v290_v44, %v296_v53  ;;  %v303_v59 = vmax.f32 %v291_v45, %v297_v54  ;;  %v304_v43 = vmax.f32 %v292_v46, %v298_v55 }
  0xf7   :  { %v305_v48 = vmax.f32 %v293_v47, %v299_v56  ;;  %v306_v50 = vmax.f32 %v294_v49, %v300_v57  ;;  %v307_v60 = vmax.f32 %v295_v51, %v301_v58 }
  0xf8   :  { %v437_v52 = vpack.c.bf16 %v303_v59, %v302_v42 }
  0xf9   :  { %v442_v61 = vpack.c.bf16 %v305_v48, %v304_v43  ;;  %v447_v62 = vpack.c.bf16 %v307_v60, %v306_v50 }
  0xfa   :  { %438 = vst [vmem:[%s609_s4] sm:$0xff] %v437_v52  }
  0xfb   :  { %449 = vst [vmem:[%s609_s4 + $0x8] sm:$0xff] %v442_v61  }
  0xfc   :  { %450 = vst [vmem:[%s609_s4 + $0x10] sm:$0xff] %v447_v62  }

// kernel: sn_discriminator_forward.9
= control target key start
LH: loop header
LB: loop body
LE: loop exit
PB: predicated region body
PF: predicated region fallthrough
CT: control target
= control target key end

     0   :  { %s543_s1 = inlined_call_operand.vmem [shape: bf16[256,128], index: 1, kind: input, shape index: {}]   ;;  %s544_s3 = inlined_call_operand.vmem [shape: bf16[128,128], index: 3, kind: input, shape index: {}]   ;;  %s545_s2 = inlined_call_operand.vmem [shape: f32[1,128], index: 2, kind: input, shape index: {}]   ;;  %s546_s0 = inlined_call_operand.vmem [shape: bf16[16,256], index: 0, kind: input, shape index: {}]   ;;  %s547_s4 = inlined_call_operand.vmem [shape: f32[1,128], index: 4, kind: input, shape index: {}]   ;;  %s548_s5 = inlined_call_operand.vmem [shape: f32[16,128], index: 5, kind: output, shape index: {}]  }
   0x1   :  { %v398_v0 = vld [vmem:[%s543_s1 + $0x38] sm:$0xff]  ;;  %v397_v2 = vld [vmem:[%s543_s1 + $0x30] sm:$0xff]  ;;  %v396_v4 = vld [vmem:[%s543_s1 + $0x28] sm:$0xff] }
   0x2   :  { %v406_v1 = vld [vmem:[%s543_s1 + $0x78] sm:$0xff]  ;;  %164 = vmatpush.bf16.msra.mxu0 %v398_v0  ;;  %v405_v3 = vld [vmem:[%s543_s1 + $0x70] sm:$0xff]  ;;  %v404_v5 = vld [vmem:[%s543_s1 + $0x68] sm:$0xff] }
   0x3   :  { %178 = vmatpush.bf16.msra.mxu1 %v406_v1  ;;  %v414_v6 = vld [vmem:[%s544_s3 + $0x38] sm:$0xff]  ;;  %v413_v7 = vld [vmem:[%s544_s3 + $0x30] sm:$0xff]  ;;  %v395_v8 = vld [vmem:[%s543_s1 + $0x20] sm:$0xff] }
   0x4   :  { %265 = vmatpush.bf16.msra.mxu2 %v414_v6  ;;  %v403_v9 = vld [vmem:[%s543_s1 + $0x60] sm:$0xff]  ;;  %v412_v10 = vld [vmem:[%s544_s3 + $0x28] sm:$0xff]  ;;  %v394_v11 = vld [vmem:[%s543_s1 + $0x18] sm:$0xff] }
   0x5   :  { %v402_v12 = vld [vmem:[%s543_s1 + $0x58] sm:$0xff]  ;;  %v393_v13 = vld [vmem:[%s543_s1 + $0x10] sm:$0xff]  ;;  %v392_v15 = vld [vmem:[%s543_s1 + $0x8] sm:$0xff] }
   0x6   :  { %165 = vmatpush.bf16.msra.mxu0 %v397_v2  ;;  %v401_v14 = vld [vmem:[%s543_s1 + $0x50] sm:$0xff]  ;;  %v400_v16 = vld [vmem:[%s543_s1 + $0x48] sm:$0xff]  ;;  %v391_v17 = vld [vmem:[%s543_s1] sm:$0xff] }
   0x7   :  { %179 = vmatpush.bf16.msra.mxu1 %v405_v3  ;;  %v399_v18 = vld [vmem:[%s543_s1 + $0x40] sm:$0xff]  ;;  %v390_v20 = vld [vmem:[%s546_s0 + $0x4] sm:$0xf0]  ;;  %v289_v22 = vld [vmem:[%s546_s0 + $0x8] sm:$0xf0] }
   0x8   :  { %266 = vmatpush.bf16.msra.mxu2 %v413_v7  ;;  %v287_v19 = vld [vmem:[%s546_s0] sm:$0xf]  ;;  %v389_v21 = vld [vmem:[%s546_s0 + $0x4] sm:$0xf]  ;;  %v410_v26 = vld [vmem:[%s544_s3 + $0x18] sm:$0xff] }
   0x9   :  { %v288_v23 = vor.u32 %v390_v20, %v287_v19  ;;  %v292_v24 = vor.u32 %v389_v21, %v289_v22  ;;  %v411_v25 = vld [vmem:[%s544_s3 + $0x20] sm:$0xff]  ;;  %v409_v27 = vld [vmem:[%s544_s3 + $0x10] sm:$0xff]  ;;  %v408_v28 = vld [vmem:[%s544_s3 + $0x8] sm:$0xff] }
   0xa   :  { %166 = vmatpush.bf16.msra.mxu0 %v396_v4  ;;  %v407_v29 = vld [vmem:[%s544_s3] sm:$0xff] }
   0xb   :  { %180 = vmatpush.bf16.msra.mxu1 %v404_v5  ;;  %v415_v30 = vld [vmem:[%s545_s2] ss:$0 sm:$0xff] }
   0xc   :  { %267 = vmatpush.bf16.msra.mxu2 %v412_v10  ;;  %v416_v44 = vld [vmem:[%s547_s4] ss:$0 sm:$0xff] }
   0xe   :  { %167 = vmatpush.bf16.msra.mxu0 %v395_v8 }
   0xf   :  { %181 = vmatpush.bf16.msra.mxu1 %v403_v9 }
  0x10   :  { %268 = vmatpush.bf16.msra.mxu2 %v411_v25 }
  0x12   :  { %168 = vmatpush.bf16.msra.mxu0 %v394_v11 }
  0x13   :  { %182 = vmatpush.bf16.msra.mxu1 %v402_v12 }
  0x14   :  { %269 = vmatpush.bf16.msra.mxu2 %v410_v26 }
  0x16   :  { %169 = vmatpush.bf16.msra.mxu0 %v393_v13 }
  0x17   :  { %183 = vmatpush.bf16.msra.mxu1 %v401_v14 }
  0x18   :  { %270 = vmatpush.bf16.msra.mxu2 %v409_v27 }
  0x1a   :  { %170 = vmatpush.bf16.msra.mxu0 %v392_v15 }
  0x1b   :  { %184 = vmatpush.bf16.msra.mxu1 %v400_v16 }
  0x1c   :  { %271 = vmatpush.bf16.msra.mxu2 %v408_v28 }
  0x1e   :  { %171 = vmatpush.bf16.msra.mxu0 %v391_v17 }
  0x1f   :  { %185 = vmatpush.bf16.msra.mxu1 %v399_v18 }
  0x20   :  { %272 = vmatpush.bf16.msra.mxu2 %v407_v29 }
  0x21   :  { %172 = vmatmul.bf16.vlgmr.msra.gmra.mxu0 %v288_v23 }
  0x22   :  { %186 = vmatmul.bf16.vlgmr.msra.gmra.mxu1 %v292_v24 }
  0x9e   :  { %v173_v31 = vpop.f32.mrf.mxu0 }
  0x9f   :  { %v187_v32 = vpop.f32.mrf.mxu1  ;;  %v174_v33 = vadd.f32 %v415_v30, %v173_v31 }
  0xa1   :  { %v188_v34 = vadd.f32 %v187_v32, %v174_v33 }
  0xa3   :  { %v192_v38 = vmul.f32 0.1, %v188_v34 }
  0xa5   :  { %v194_v41 = vmax.f32 %v188_v34, %v192_v38 }
  0xa6   :  { %v175_v35 = vpop.f32.mrf.mxu0 }
  0xa7   :  { %v176_v36 = vadd.f32 %v415_v30, %v175_v35  ;;  %v189_v37 = vpop.f32.mrf.mxu1 }
  0xa9   :  { %v190_v39 = vadd.f32 %v189_v37, %v176_v36 }
  0xab   :  { %v193_v40 = vmul.f32 0.1, %v190_v39 }
  0xad   :  { %v195_v42 = vmax.f32 %v190_v39, %v193_v40 }
  0xaf   :  { %v196_v43 = vpack.c.bf16 %v195_v42, %v194_v41 }
  0xb1   :  { %273 = vmatmul.bf16.vlgmr.msra.gmra.mxu2 %v196_v43 }
 0x134   :  { %v274_v45 = vpop.f32.mrf.mxu2 }
 0x135   :  { %v275_v46 = vadd.f32 %v416_v44, %v274_v45 }
 0x137   :  { %279 = vst [vmem:[%s548_s5] sm:$0xff] %v275_v46 }
 0x13c   :  { %v276_v47 = vpop.f32.mrf.mxu2 }
 0x13d   :  { %v277_v48 = vadd.f32 %v416_v44, %v276_v47 }
 0x13f   :  { %280 = vst [vmem:[%s548_s5 + $0x8] sm:$0xff] %v277_v48 }

</bundles_post_ra>
